<compile_context>
chip_gen: v7x
topology: tpu7x:2x2x1
jax: 0.10.0
libtpu: 0.0.40
codegen_flags: <defaults>
</compile_context>

<pallas_src>
import numpy as np
import jax
import jax.numpy as jnp
from jax.experimental import pallas as pl
from jax.experimental.pallas import tpu as pltpu


def make_decoder_kernel(T, H, L, fuse_lstm_matmuls):
    """Whole T-step decoder recurrence in one kernel invocation (no grid)."""

    def kernel(gx_emb_ref, kv_ref, mask_ref, enc_ref, h0_ref, c0_ref,
               wkv_ref, w_fused_ref, b_fused_ref, wd_ref, bd_ref,
               out_ref, hout_ref, cout_ref):
        mm_dtype = w_fused_ref.dtype          # bf16 on v6e/v7x, f32 otherwise

        # Tiny problem -> load once, keep everything in vregs across the loop.
        enc = enc_ref[...]                     # (B, S, H) f32
        kv = kv_ref[...]                       # (B, S)    f32  = (W_q enc)·v
        valid = mask_ref[...] > 0.5            # (B, S)    bool
        wkv = wkv_ref[...]                     # (1, H)    f32  = W_k v
        h = [h0_ref[l] for l in range(L)]
        c = [c0_ref[l] for l in range(L)]

        for t in range(T):                     # serial recurrence, fully unrolled
            # ---- MLP attention (decomposed scores; no (B,S,H) work per step) ----
            qv = jnp.sum(h[L - 1] * wkv, axis=-1, keepdims=True)          # (B, 1)
            scores = qv + kv                                              # (B, S)
            scores = jnp.where(valid, scores,
                               jnp.full_like(scores, -1000000.0))
            scores = scores - jnp.max(scores, axis=-1, keepdims=True)
            e = jnp.exp(scores)
            attn = e / jnp.sum(e, axis=-1, keepdims=True)                 # (B, S)
            # TODO(synk): attention dropout omitted (eval-mode identity).
            context = jnp.sum(attn[:, :, None] * enc, axis=1)             # (B, H)

            # ---- stacked LSTM step (gate order permuted to i, f, o, g) ----
            layer_in = context
            for l in range(L):
                if fuse_lstm_matmuls:
                    xin = jnp.concatenate([layer_in, h[l]], axis=-1)      # (B, 2H)
                    gates = jnp.dot(xin.astype(mm_dtype), w_fused_ref[l],
                                    preferred_element_type=jnp.float32)
                else:
                    # fallback: two K=H dots (portable across Mosaic versions)
                    w_l = w_fused_ref[l]                                  # (2H, 4H)
                    gates = (jnp.dot(layer_in.astype(mm_dtype), w_l[:H],
                                     preferred_element_type=jnp.float32)
                             + jnp.dot(h[l].astype(mm_dtype), w_l[H:],
                                       preferred_element_type=jnp.float32))
                gates = gates + b_fused_ref[l]            # bih + bhh folded
                if l == 0:
                    gates = gates + gx_emb_ref[t]         # precomputed x_emb @ W_ih_emb
                sig = jax.nn.sigmoid(gates[:, :3 * H])    # i, f, o in one sigmoid
                i_g = sig[:, :H]
                f_g = sig[:, H:2 * H]
                o_g = sig[:, 2 * H:3 * H]
                g_g = jnp.tanh(gates[:, 3 * H:])
                c_new = f_g * c[l] + i_g * g_g
                h_new = o_g * jnp.tanh(c_new)
                h[l] = h_new
                c[l] = c_new
                layer_in = h_new

            # ---- dense head (vocab padded to a lane-dense multiple of 128) ----
            out_ref[t] = (jnp.dot(layer_in.astype(mm_dtype), wd_ref[...],
                                  preferred_element_type=jnp.float32)
                          + bd_ref[...])

        # Final state written once, after the time loop.
        for l in range(L):
            hout_ref[l] = h[l]
            cout_ref[l] = c[l]

    return kernel


def seq2seq_attention_decoder_forward(X_tokens, enc_outputs, h0, c0,
                                      enc_valid_len, params, *,
                                      matmul_dtype=jnp.float32,
                                      fuse_lstm_matmuls=True):
    B, T = X_tokens.shape
    _, S, H = enc_outputs.shape
    L = h0.shape[0]
    V, E = params["embedding"].shape
    Vp = ((V + 127) // 128) * 128          # lane-dense padded vocab

    # Gate-column permutation: PyTorch order (i, f, g, o) -> (i, f, o, g) so the
    # kernel applies one sigmoid to the first 3H columns and one tanh to the rest.
    perm = np.concatenate([np.arange(H), H + np.arange(H),
                           3 * H + np.arange(H), 2 * H + np.arange(H)])

    with jax.default_matmul_precision("highest"):
        wih_a = params["wih_a"][:, :, perm]                       # (L, H, 4H)
        wih_b0 = params["wih_b"][0][:, perm]                      # (E, 4H)
        whh = params["whh"][:, :, perm]                           # (L, H, 4H)
        # Fused per-layer gate weight [W_ih ; W_hh] and folded bias.
        w_fused = jnp.concatenate([wih_a, whh], axis=1).astype(matmul_dtype)
        b_fused = (params["bih"] + params["bhh"])[:, :, perm]     # (L, 1, 4H)

        # Embedding lookup (time-major) + precomputed layer-0 embedding gate
        # projection for all T steps in one matmul.
        x_emb = jnp.transpose(params["embedding"][X_tokens], (1, 0, 2))  # (T,B,E)
        gx_emb = jnp.einsum("tbe,ef->tbf", x_emb, wih_b0)                # (T,B,4H)

        # Attention precomputes (exact up to FP associativity; module has no tanh).
        v_vec = params["v"][0]                                           # (H,)
        kv = jnp.einsum("bsh,h->bs", enc_outputs, params["wq"] @ v_vec)  # (B,S)
        wkv = (params["wk"] @ v_vec)[None, :]                            # (1,H)

        # Dense head padded to a lane-dense vocab width.
        wd_p = jnp.zeros((H, Vp), jnp.float32).at[:, :V].set(
            params["wd"]).astype(matmul_dtype)
        bd_p = jnp.zeros((1, Vp), jnp.float32).at[:, :V].set(params["bd"])

    # sequence_mask validity (True = keep).
    mask = (jnp.arange(S, dtype=jnp.int32)[None, :]
            < enc_valid_len[:, None]).astype(jnp.float32)                # (B,S)

    kernel = make_decoder_kernel(T, H, L, fuse_lstm_matmuls)

    logits_p, h_fin, c_fin = pl.pallas_call(
        kernel,
        out_shape=(
            jax.ShapeDtypeStruct((T, B, Vp), jnp.float32),
            jax.ShapeDtypeStruct((L, B, H), jnp.float32),
            jax.ShapeDtypeStruct((L, B, H), jnp.float32),
        ),
        compiler_params=pltpu.CompilerParams(
            vmem_limit_bytes=32 * 1024 * 1024),
    )(gx_emb, kv, mask, enc_outputs.astype(jnp.float32), h0, c0,
      wkv, w_fused, b_fused, wd_p, bd_p)

    outputs = jnp.transpose(logits_p[:, :, :V], (1, 0, 2))               # (B,T,V)
    return outputs, (enc_outputs, (h_fin, c_fin), enc_valid_len)


def reference_forward(X_tokens, enc_outputs, h0, c0, enc_valid_len, params):
    """Pure-JAX reference with the original module's algebra (full features)."""
    B, T = X_tokens.shape
    _, S, H = enc_outputs.shape
    L = h0.shape[0]
    with jax.default_matmul_precision("highest"):
        x_seq = jnp.transpose(params["embedding"][X_tokens], (1, 0, 2))
        mask = (jnp.arange(S)[None, :] < enc_valid_len[:, None])
        h, c = h0, c0
        outs = []
        kproj = jnp.einsum("bsh,hu->bsu", enc_outputs, params["wq"])
        for t in range(T):
            q_proj = h[-1] @ params["wk"]
            features = q_proj[:, None, :] + kproj
            scores = jnp.sum(features * params["v"], axis=-1)
            scores = jnp.where(mask, scores, -1000000.0)
            attn = jax.nn.softmax(scores, axis=-1)
            context = jnp.einsum("bs,bsh->bh", attn, enc_outputs)
            x_t = x_seq[t]
            new_h, new_c, layer_in = [], [], None
            for l in range(L):
                if l == 0:
                    gx = context @ params["wih_a"][l] + x_t @ params["wih_b"][0]
                else:
                    gx = layer_in @ params["wih_a"][l]
                gates = gx + h[l] @ params["whh"][l] + params["bih"][l, 0] + params["bhh"][l, 0]
                i_g = jax.nn.sigmoid(gates[:, :H])
                f_g = jax.nn.sigmoid(gates[:, H:2 * H])
                g_g = jnp.tanh(gates[:, 2 * H:3 * H])
                o_g = jax.nn.sigmoid(gates[:, 3 * H:])
                c_l = f_g * c[l] + i_g * g_g
                h_l = o_g * jnp.tanh(c_l)
                new_h.append(h_l)
                new_c.append(c_l)
                layer_in = h_l
            h, c = jnp.stack(new_h), jnp.stack(new_c)
            outs.append(layer_in @ params["wd"] + params["bd"][0])
        logits = jnp.transpose(jnp.stack(outs), (1, 0, 2))
        return logits, h, c


if __name__ == "__main__":
    B, S, T = 2, 8, 4            # batch, encoder seq len, decoder steps
    E, H, L, V = 16, 32, 2, 64   # embed, hidden, lstm layers, vocab

    key = jax.random.PRNGKey(0)
    ks = jax.random.split(key, 16)
    sc = 0.1
    params = dict(
        embedding=sc * jax.random.normal(ks[0], (V, E), jnp.float32),
        wk=sc * jax.random.normal(ks[1], (H, H), jnp.float32),
        wq=sc * jax.random.normal(ks[2], (H, H), jnp.float32),
        v=sc * jax.random.normal(ks[3], (1, H), jnp.float32),
        wih_a=sc * jax.random.normal(ks[4], (L, H, 4 * H), jnp.float32),
        wih_b=sc * jax.random.normal(ks[5], (1, E, 4 * H), jnp.float32),
        whh=sc * jax.random.normal(ks[6], (L, H, 4 * H), jnp.float32),
        bih=sc * jax.random.normal(ks[7], (L, 1, 4 * H), jnp.float32),
        bhh=sc * jax.random.normal(ks[8], (L, 1, 4 * H), jnp.float32),
        wd=sc * jax.random.normal(ks[9], (H, V), jnp.float32),
        bd=sc * jax.random.normal(ks[10], (1, V), jnp.float32),
    )
    X_tokens = jax.random.randint(ks[11], (B, T), 0, V)
    enc_outputs = sc * jax.random.normal(ks[12], (B, S, H), jnp.float32)
    h0 = sc * jax.random.normal(ks[13], (L, B, H), jnp.float32)
    c0 = sc * jax.random.normal(ks[14], (L, B, H), jnp.float32)
    enc_valid_len = jnp.array([5, 8], dtype=jnp.int32)

    def run(matmul_dtype, fuse):
        out, (_, (hf, cf), _) = seq2seq_attention_decoder_forward(
            X_tokens, enc_outputs, h0, c0, enc_valid_len, params,
            matmul_dtype=matmul_dtype, fuse_lstm_matmuls=fuse)
        jax.block_until_ready(out)
        return out, hf, cf

    # f32 run with the fused [x;h] gate matmul; if this Mosaic build lacks
    # unaligned minor-dim concatenation, fall back to the two-dot gate path.
    try:
        outputs, h_fin, c_fin = run(jnp.float32, True)
        fused = True
    except Exception:  # TODO(synk): drop fallback once min Mosaic supports it
        outputs, h_fin, c_fin = run(jnp.float32, False)
        fused = False

    ref_logits, ref_h, ref_c = reference_forward(
        X_tokens, enc_outputs, h0, c0, enc_valid_len, params)
    np.testing.assert_allclose(np.asarray(outputs), np.asarray(ref_logits),
                               rtol=1e-3, atol=1e-3)
    np.testing.assert_allclose(np.asarray(h_fin), np.asarray(ref_h),
                               rtol=1e-3, atol=1e-3)
    np.testing.assert_allclose(np.asarray(c_fin), np.asarray(ref_c),
                               rtol=1e-3, atol=1e-3)

    # bf16 MXU-operand run (v6e/v7x recommendation); elementwise math stays f32.
    outputs_bf16, _, _ = run(jnp.bfloat16, fused)
    np.testing.assert_allclose(np.asarray(outputs_bf16), np.asarray(ref_logits),
                               rtol=5e-2, atol=5e-2)

    print("KERNEL_OK")
</pallas_src>

<mosaic_0001>
module attributes {stable_mosaic.version = 11 : i64} {
  func.func @kernel(%arg0: memref<4x2x128xf32, #tpu.memory_space<vmem>>, %arg1: memref<2x8xf32, #tpu.memory_space<vmem>>, %arg2: memref<2x8xf32, #tpu.memory_space<vmem>>, %arg3: memref<2x8x32xf32, #tpu.memory_space<vmem>>, %arg4: memref<2x2x32xf32, #tpu.memory_space<vmem>>, %arg5: memref<2x2x32xf32, #tpu.memory_space<vmem>>, %arg6: memref<1x32xf32, #tpu.memory_space<vmem>>, %arg7: memref<2x64x128xf32, #tpu.memory_space<vmem>>, %arg8: memref<2x1x128xf32, #tpu.memory_space<vmem>>, %arg9: memref<32x128xf32, #tpu.memory_space<vmem>>, %arg10: memref<1x128xf32, #tpu.memory_space<vmem>>, %arg11: memref<4x2x128xf32, #tpu.memory_space<vmem>>, %arg12: memref<2x2x32xf32, #tpu.memory_space<vmem>>, %arg13: memref<2x2x32xf32, #tpu.memory_space<vmem>>) attributes {dimension_semantics = [], scalar_prefetch = 0 : i64, scratch_operands = 0 : i64, tpu.core_type = #tpu.core_type<tc>} {
    %c0 = arith.constant 0 : index
    %c0_0 = arith.constant 0 : index
    %c0_1 = arith.constant 0 : index
    %0 = vector.load %arg3[%c0, %c0_0, %c0_1] : memref<2x8x32xf32, #tpu.memory_space<vmem>>, vector<2x8x32xf32>
    %c0_2 = arith.constant 0 : index
    %c0_3 = arith.constant 0 : index
    %1 = vector.load %arg1[%c0_2, %c0_3] : memref<2x8xf32, #tpu.memory_space<vmem>>, vector<2x8xf32>
    %c0_4 = arith.constant 0 : index
    %c0_5 = arith.constant 0 : index
    %2 = vector.load %arg2[%c0_4, %c0_5] : memref<2x8xf32, #tpu.memory_space<vmem>>, vector<2x8xf32>
    %cst = arith.constant 5.000000e-01 : f32
    %3 = vector.broadcast %cst : f32 to vector<2x8xf32>
    %4 = arith.cmpf ogt, %2, %3 : vector<2x8xf32>
    %c0_6 = arith.constant 0 : index
    %c0_7 = arith.constant 0 : index
    %5 = vector.load %arg6[%c0_6, %c0_7] : memref<1x32xf32, #tpu.memory_space<vmem>>, vector<1x32xf32>
    %c0_8 = arith.constant 0 : index
    %c0_9 = arith.constant 0 : index
    %c0_10 = arith.constant 0 : index
    %6 = vector.load %arg4[%c0_8, %c0_9, %c0_10] : memref<2x2x32xf32, #tpu.memory_space<vmem>>, vector<1x2x32xf32>
    %7 = vector.shape_cast %6 : vector<1x2x32xf32> to vector<2x32xf32>
    %c1 = arith.constant 1 : index
    %c0_11 = arith.constant 0 : index
    %c0_12 = arith.constant 0 : index
    %8 = vector.load %arg4[%c1, %c0_11, %c0_12] : memref<2x2x32xf32, #tpu.memory_space<vmem>>, vector<1x2x32xf32>
    %9 = vector.shape_cast %8 : vector<1x2x32xf32> to vector<2x32xf32>
    %c0_13 = arith.constant 0 : index
    %c0_14 = arith.constant 0 : index
    %c0_15 = arith.constant 0 : index
    %10 = vector.load %arg5[%c0_13, %c0_14, %c0_15] : memref<2x2x32xf32, #tpu.memory_space<vmem>>, vector<1x2x32xf32>
    %11 = vector.shape_cast %10 : vector<1x2x32xf32> to vector<2x32xf32>
    %c1_16 = arith.constant 1 : index
    %c0_17 = arith.constant 0 : index
    %c0_18 = arith.constant 0 : index
    %12 = vector.load %arg5[%c1_16, %c0_17, %c0_18] : memref<2x2x32xf32, #tpu.memory_space<vmem>>, vector<1x2x32xf32>
    %13 = vector.shape_cast %12 : vector<1x2x32xf32> to vector<2x32xf32>
    %14 = vector.broadcast %5 : vector<1x32xf32> to vector<2x32xf32>
    %15 = arith.mulf %9, %14 : vector<2x32xf32>
    %cst_19 = arith.constant dense<0.000000e+00> : vector<2xf32>
    %16 = vector.multi_reduction <add>, %15, %cst_19 [1] : vector<2x32xf32> to vector<2xf32>
    %17 = vector.shape_cast %16 : vector<2xf32> to vector<2x1xf32>
    %18 = vector.broadcast %17 : vector<2x1xf32> to vector<2x8xf32>
    %19 = arith.addf %18, %1 : vector<2x8xf32>
    %cst_20 = arith.constant -1.000000e+06 : f32
    %20 = vector.broadcast %cst_20 : f32 to vector<2x8xf32>
    %21 = arith.select %4, %19, %20 : vector<2x8xi1>, vector<2x8xf32>
    %cst_21 = arith.constant dense<0xFF800000> : vector<2xf32>
    %22 = vector.multi_reduction <maximumf>, %21, %cst_21 [1] : vector<2x8xf32> to vector<2xf32>
    %23 = vector.shape_cast %22 : vector<2xf32> to vector<2x1xf32>
    %24 = vector.broadcast %23 : vector<2x1xf32> to vector<2x8xf32>
    %25 = arith.subf %21, %24 : vector<2x8xf32>
    %26 = math.exp %25 : vector<2x8xf32>
    %cst_22 = arith.constant dense<0.000000e+00> : vector<2xf32>
    %27 = vector.multi_reduction <add>, %26, %cst_22 [1] : vector<2x8xf32> to vector<2xf32>
    %28 = vector.shape_cast %27 : vector<2xf32> to vector<2x1xf32>
    %29 = vector.broadcast %28 : vector<2x1xf32> to vector<2x8xf32>
    %30 = arith.divf %26, %29 : vector<2x8xf32>
    %31 = vector.shape_cast %30 : vector<2x8xf32> to vector<2x8x1xf32>
    %32 = vector.broadcast %31 : vector<2x8x1xf32> to vector<2x8x32xf32>
    %33 = arith.mulf %32, %0 : vector<2x8x32xf32>
    %cst_23 = arith.constant dense<0.000000e+00> : vector<2x32xf32>
    %34 = vector.multi_reduction <add>, %33, %cst_23 [1] : vector<2x8x32xf32> to vector<2x32xf32>
    %35 = tpu.concatenate %34, %7 in 1 : vector<2x32xf32>, vector<2x32xf32> -> vector<2x64xf32>
    %c0_24 = arith.constant 0 : index
    %c0_25 = arith.constant 0 : index
    %c0_26 = arith.constant 0 : index
    %36 = vector.load %arg7[%c0_24, %c0_25, %c0_26] : memref<2x64x128xf32, #tpu.memory_space<vmem>>, vector<1x64x128xf32>
    %37 = vector.shape_cast %36 : vector<1x64x128xf32> to vector<64x128xf32>
    %cst_27 = arith.constant dense<0.000000e+00> : vector<2x128xf32>
    %38 = tpu.matmul %35, %37, %cst_27 {dimension_numbers = #tpu.dot_dimension_numbers<[1], [0], [0], [1], [0, 0, 1, 1], [], []>} : vector<2x64xf32>, vector<64x128xf32>, vector<2x128xf32> -> vector<2x128xf32>
    %c0_28 = arith.constant 0 : index
    %c0_29 = arith.constant 0 : index
    %c0_30 = arith.constant 0 : index
    %39 = vector.load %arg8[%c0_28, %c0_29, %c0_30] : memref<2x1x128xf32, #tpu.memory_space<vmem>>, vector<1x1x128xf32>
    %40 = vector.shape_cast %39 : vector<1x1x128xf32> to vector<1x128xf32>
    %41 = vector.broadcast %40 : vector<1x128xf32> to vector<2x128xf32>
    %42 = arith.addf %38, %41 : vector<2x128xf32>
    %c0_31 = arith.constant 0 : index
    %c0_32 = arith.constant 0 : index
    %c0_33 = arith.constant 0 : index
    %43 = vector.load %arg0[%c0_31, %c0_32, %c0_33] : memref<4x2x128xf32, #tpu.memory_space<vmem>>, vector<1x2x128xf32>
    %44 = vector.shape_cast %43 : vector<1x2x128xf32> to vector<2x128xf32>
    %45 = arith.addf %42, %44 : vector<2x128xf32>
    %46 = vector.extract_strided_slice %45 {offsets = [0, 0], sizes = [2, 96], strides = [1, 1]} : vector<2x128xf32> to vector<2x96xf32>
    %47 = arith.negf %46 : vector<2x96xf32>
    %48 = math.exp %47 : vector<2x96xf32>
    %cst_34 = arith.constant 1.000000e+00 : f32
    %49 = vector.broadcast %cst_34 : f32 to vector<2x96xf32>
    %50 = arith.addf %49, %48 : vector<2x96xf32>
    %51 = arith.divf %49, %50 : vector<2x96xf32>
    %52 = vector.extract_strided_slice %51 {offsets = [0, 0], sizes = [2, 32], strides = [1, 1]} : vector<2x96xf32> to vector<2x32xf32>
    %53 = vector.extract_strided_slice %51 {offsets = [0, 32], sizes = [2, 32], strides = [1, 1]} : vector<2x96xf32> to vector<2x32xf32>
    %54 = vector.extract_strided_slice %51 {offsets = [0, 64], sizes = [2, 32], strides = [1, 1]} : vector<2x96xf32> to vector<2x32xf32>
    %55 = vector.extract_strided_slice %45 {offsets = [0, 96], sizes = [2, 32], strides = [1, 1]} : vector<2x128xf32> to vector<2x32xf32>
    %56 = math.tanh %55 : vector<2x32xf32>
    %57 = arith.mulf %53, %11 : vector<2x32xf32>
    %58 = arith.mulf %52, %56 : vector<2x32xf32>
    %59 = arith.addf %57, %58 : vector<2x32xf32>
    %60 = math.tanh %59 : vector<2x32xf32>
    %61 = arith.mulf %54, %60 : vector<2x32xf32>
    %62 = tpu.concatenate %61, %9 in 1 : vector<2x32xf32>, vector<2x32xf32> -> vector<2x64xf32>
    %c1_35 = arith.constant 1 : index
    %c0_36 = arith.constant 0 : index
    %c0_37 = arith.constant 0 : index
    %63 = vector.load %arg7[%c1_35, %c0_36, %c0_37] : memref<2x64x128xf32, #tpu.memory_space<vmem>>, vector<1x64x128xf32>
    %64 = vector.shape_cast %63 : vector<1x64x128xf32> to vector<64x128xf32>
    %cst_38 = arith.constant dense<0.000000e+00> : vector<2x128xf32>
    %65 = tpu.matmul %62, %64, %cst_38 {dimension_numbers = #tpu.dot_dimension_numbers<[1], [0], [0], [1], [0, 0, 1, 1], [], []>} : vector<2x64xf32>, vector<64x128xf32>, vector<2x128xf32> -> vector<2x128xf32>
    %c1_39 = arith.constant 1 : index
    %c0_40 = arith.constant 0 : index
    %c0_41 = arith.constant 0 : index
    %66 = vector.load %arg8[%c1_39, %c0_40, %c0_41] : memref<2x1x128xf32, #tpu.memory_space<vmem>>, vector<1x1x128xf32>
    %67 = vector.shape_cast %66 : vector<1x1x128xf32> to vector<1x128xf32>
    %68 = vector.broadcast %67 : vector<1x128xf32> to vector<2x128xf32>
    %69 = arith.addf %65, %68 : vector<2x128xf32>
    %70 = vector.extract_strided_slice %69 {offsets = [0, 0], sizes = [2, 96], strides = [1, 1]} : vector<2x128xf32> to vector<2x96xf32>
    %71 = arith.negf %70 : vector<2x96xf32>
    %72 = math.exp %71 : vector<2x96xf32>
    %cst_42 = arith.constant 1.000000e+00 : f32
    %73 = vector.broadcast %cst_42 : f32 to vector<2x96xf32>
    %74 = arith.addf %73, %72 : vector<2x96xf32>
    %75 = arith.divf %73, %74 : vector<2x96xf32>
    %76 = vector.extract_strided_slice %75 {offsets = [0, 0], sizes = [2, 32], strides = [1, 1]} : vector<2x96xf32> to vector<2x32xf32>
    %77 = vector.extract_strided_slice %75 {offsets = [0, 32], sizes = [2, 32], strides = [1, 1]} : vector<2x96xf32> to vector<2x32xf32>
    %78 = vector.extract_strided_slice %75 {offsets = [0, 64], sizes = [2, 32], strides = [1, 1]} : vector<2x96xf32> to vector<2x32xf32>
    %79 = vector.extract_strided_slice %69 {offsets = [0, 96], sizes = [2, 32], strides = [1, 1]} : vector<2x128xf32> to vector<2x32xf32>
    %80 = math.tanh %79 : vector<2x32xf32>
    %81 = arith.mulf %77, %13 : vector<2x32xf32>
    %82 = arith.mulf %76, %80 : vector<2x32xf32>
    %83 = arith.addf %81, %82 : vector<2x32xf32>
    %84 = math.tanh %83 : vector<2x32xf32>
    %85 = arith.mulf %78, %84 : vector<2x32xf32>
    %c0_43 = arith.constant 0 : index
    %c0_44 = arith.constant 0 : index
    %86 = vector.load %arg9[%c0_43, %c0_44] : memref<32x128xf32, #tpu.memory_space<vmem>>, vector<32x128xf32>
    %cst_45 = arith.constant dense<0.000000e+00> : vector<2x128xf32>
    %87 = tpu.matmul %85, %86, %cst_45 {dimension_numbers = #tpu.dot_dimension_numbers<[1], [0], [0], [1], [0, 0, 1, 1], [], []>} : vector<2x32xf32>, vector<32x128xf32>, vector<2x128xf32> -> vector<2x128xf32>
    %c0_46 = arith.constant 0 : index
    %c0_47 = arith.constant 0 : index
    %88 = vector.load %arg10[%c0_46, %c0_47] : memref<1x128xf32, #tpu.memory_space<vmem>>, vector<1x128xf32>
    %89 = vector.broadcast %88 : vector<1x128xf32> to vector<2x128xf32>
    %90 = arith.addf %87, %89 : vector<2x128xf32>
    %c0_48 = arith.constant 0 : index
    %c0_49 = arith.constant 0 : index
    %c0_50 = arith.constant 0 : index
    %91 = vector.load %arg11[%c0_48, %c0_49, %c0_50] : memref<4x2x128xf32, #tpu.memory_space<vmem>>, vector<1x2x128xf32>
    %92 = vector.shape_cast %91 : vector<1x2x128xf32> to vector<2x128xf32>
    %93 = vector.shape_cast %90 : vector<2x128xf32> to vector<1x2x128xf32>
    tpu.vector_store %arg11[%c0_48, %c0_49, %c0_50], %93 {strides = array<i32>} : memref<4x2x128xf32, #tpu.memory_space<vmem>>, vector<1x2x128xf32>,
    %94 = vector.broadcast %5 : vector<1x32xf32> to vector<2x32xf32>
    %95 = arith.mulf %85, %94 : vector<2x32xf32>
    %cst_51 = arith.constant dense<0.000000e+00> : vector<2xf32>
    %96 = vector.multi_reduction <add>, %95, %cst_51 [1] : vector<2x32xf32> to vector<2xf32>
    %97 = vector.shape_cast %96 : vector<2xf32> to vector<2x1xf32>
    %98 = vector.broadcast %97 : vector<2x1xf32> to vector<2x8xf32>
    %99 = arith.addf %98, %1 : vector<2x8xf32>
    %cst_52 = arith.constant -1.000000e+06 : f32
    %100 = vector.broadcast %cst_52 : f32 to vector<2x8xf32>
    %101 = arith.select %4, %99, %100 : vector<2x8xi1>, vector<2x8xf32>
    %cst_53 = arith.constant dense<0xFF800000> : vector<2xf32>
    %102 = vector.multi_reduction <maximumf>, %101, %cst_53 [1] : vector<2x8xf32> to vector<2xf32>
    %103 = vector.shape_cast %102 : vector<2xf32> to vector<2x1xf32>
    %104 = vector.broadcast %103 : vector<2x1xf32> to vector<2x8xf32>
    %105 = arith.subf %101, %104 : vector<2x8xf32>
    %106 = math.exp %105 : vector<2x8xf32>
    %cst_54 = arith.constant dense<0.000000e+00> : vector<2xf32>
    %107 = vector.multi_reduction <add>, %106, %cst_54 [1] : vector<2x8xf32> to vector<2xf32>
    %108 = vector.shape_cast %107 : vector<2xf32> to vector<2x1xf32>
    %109 = vector.broadcast %108 : vector<2x1xf32> to vector<2x8xf32>
    %110 = arith.divf %106, %109 : vector<2x8xf32>
    %111 = vector.shape_cast %110 : vector<2x8xf32> to vector<2x8x1xf32>
    %112 = vector.broadcast %111 : vector<2x8x1xf32> to vector<2x8x32xf32>
    %113 = arith.mulf %112, %0 : vector<2x8x32xf32>
    %cst_55 = arith.constant dense<0.000000e+00> : vector<2x32xf32>
    %114 = vector.multi_reduction <add>, %113, %cst_55 [1] : vector<2x8x32xf32> to vector<2x32xf32>
    %115 = tpu.concatenate %114, %61 in 1 : vector<2x32xf32>, vector<2x32xf32> -> vector<2x64xf32>
    %c0_56 = arith.constant 0 : index
    %c0_57 = arith.constant 0 : index
    %c0_58 = arith.constant 0 : index
    %116 = vector.load %arg7[%c0_56, %c0_57, %c0_58] : memref<2x64x128xf32, #tpu.memory_space<vmem>>, vector<1x64x128xf32>
    %117 = vector.shape_cast %116 : vector<1x64x128xf32> to vector<64x128xf32>
    %cst_59 = arith.constant dense<0.000000e+00> : vector<2x128xf32>
    %118 = tpu.matmul %115, %117, %cst_59 {dimension_numbers = #tpu.dot_dimension_numbers<[1], [0], [0], [1], [0, 0, 1, 1], [], []>} : vector<2x64xf32>, vector<64x128xf32>, vector<2x128xf32> -> vector<2x128xf32>
    %c0_60 = arith.constant 0 : index
    %c0_61 = arith.constant 0 : index
    %c0_62 = arith.constant 0 : index
    %119 = vector.load %arg8[%c0_60, %c0_61, %c0_62] : memref<2x1x128xf32, #tpu.memory_space<vmem>>, vector<1x1x128xf32>
    %120 = vector.shape_cast %119 : vector<1x1x128xf32> to vector<1x128xf32>
    %121 = vector.broadcast %120 : vector<1x128xf32> to vector<2x128xf32>
    %122 = arith.addf %118, %121 : vector<2x128xf32>
    %c1_63 = arith.constant 1 : index
    %c0_64 = arith.constant 0 : index
    %c0_65 = arith.constant 0 : index
    %123 = vector.load %arg0[%c1_63, %c0_64, %c0_65] : memref<4x2x128xf32, #tpu.memory_space<vmem>>, vector<1x2x128xf32>
    %124 = vector.shape_cast %123 : vector<1x2x128xf32> to vector<2x128xf32>
    %125 = arith.addf %122, %124 : vector<2x128xf32>
    %126 = vector.extract_strided_slice %125 {offsets = [0, 0], sizes = [2, 96], strides = [1, 1]} : vector<2x128xf32> to vector<2x96xf32>
    %127 = arith.negf %126 : vector<2x96xf32>
    %128 = math.exp %127 : vector<2x96xf32>
    %cst_66 = arith.constant 1.000000e+00 : f32
    %129 = vector.broadcast %cst_66 : f32 to vector<2x96xf32>
    %130 = arith.addf %129, %128 : vector<2x96xf32>
    %131 = arith.divf %129, %130 : vector<2x96xf32>
    %132 = vector.extract_strided_slice %131 {offsets = [0, 0], sizes = [2, 32], strides = [1, 1]} : vector<2x96xf32> to vector<2x32xf32>
    %133 = vector.extract_strided_slice %131 {offsets = [0, 32], sizes = [2, 32], strides = [1, 1]} : vector<2x96xf32> to vector<2x32xf32>
    %134 = vector.extract_strided_slice %131 {offsets = [0, 64], sizes = [2, 32], strides = [1, 1]} : vector<2x96xf32> to vector<2x32xf32>
    %135 = vector.extract_strided_slice %125 {offsets = [0, 96], sizes = [2, 32], strides = [1, 1]} : vector<2x128xf32> to vector<2x32xf32>
    %136 = math.tanh %135 : vector<2x32xf32>
    %137 = arith.mulf %133, %59 : vector<2x32xf32>
    %138 = arith.mulf %132, %136 : vector<2x32xf32>
    %139 = arith.addf %137, %138 : vector<2x32xf32>
    %140 = math.tanh %139 : vector<2x32xf32>
    %141 = arith.mulf %134, %140 : vector<2x32xf32>
    %142 = tpu.concatenate %141, %85 in 1 : vector<2x32xf32>, vector<2x32xf32> -> vector<2x64xf32>
    %c1_67 = arith.constant 1 : index
    %c0_68 = arith.constant 0 : index
    %c0_69 = arith.constant 0 : index
    %143 = vector.load %arg7[%c1_67, %c0_68, %c0_69] : memref<2x64x128xf32, #tpu.memory_space<vmem>>, vector<1x64x128xf32>
    %144 = vector.shape_cast %143 : vector<1x64x128xf32> to vector<64x128xf32>
    %cst_70 = arith.constant dense<0.000000e+00> : vector<2x128xf32>
    %145 = tpu.matmul %142, %144, %cst_70 {dimension_numbers = #tpu.dot_dimension_numbers<[1], [0], [0], [1], [0, 0, 1, 1], [], []>} : vector<2x64xf32>, vector<64x128xf32>, vector<2x128xf32> -> vector<2x128xf32>
    %c1_71 = arith.constant 1 : index
    %c0_72 = arith.constant 0 : index
    %c0_73 = arith.constant 0 : index
    %146 = vector.load %arg8[%c1_71, %c0_72, %c0_73] : memref<2x1x128xf32, #tpu.memory_space<vmem>>, vector<1x1x128xf32>
    %147 = vector.shape_cast %146 : vector<1x1x128xf32> to vector<1x128xf32>
    %148 = vector.broadcast %147 : vector<1x128xf32> to vector<2x128xf32>
    %149 = arith.addf %145, %148 : vector<2x128xf32>
    %150 = vector.extract_strided_slice %149 {offsets = [0, 0], sizes = [2, 96], strides = [1, 1]} : vector<2x128xf32> to vector<2x96xf32>
    %151 = arith.negf %150 : vector<2x96xf32>
    %152 = math.exp %151 : vector<2x96xf32>
    %cst_74 = arith.constant 1.000000e+00 : f32
    %153 = vector.broadcast %cst_74 : f32 to vector<2x96xf32>
    %154 = arith.addf %153, %152 : vector<2x96xf32>
    %155 = arith.divf %153, %154 : vector<2x96xf32>
    %156 = vector.extract_strided_slice %155 {offsets = [0, 0], sizes = [2, 32], strides = [1, 1]} : vector<2x96xf32> to vector<2x32xf32>
    %157 = vector.extract_strided_slice %155 {offsets = [0, 32], sizes = [2, 32], strides = [1, 1]} : vector<2x96xf32> to vector<2x32xf32>
    %158 = vector.extract_strided_slice %155 {offsets = [0, 64], sizes = [2, 32], strides = [1, 1]} : vector<2x96xf32> to vector<2x32xf32>
    %159 = vector.extract_strided_slice %149 {offsets = [0, 96], sizes = [2, 32], strides = [1, 1]} : vector<2x128xf32> to vector<2x32xf32>
    %160 = math.tanh %159 : vector<2x32xf32>
    %161 = arith.mulf %157, %83 : vector<2x32xf32>
    %162 = arith.mulf %156, %160 : vector<2x32xf32>
    %163 = arith.addf %161, %162 : vector<2x32xf32>
    %164 = math.tanh %163 : vector<2x32xf32>
    %165 = arith.mulf %158, %164 : vector<2x32xf32>
    %c0_75 = arith.constant 0 : index
    %c0_76 = arith.constant 0 : index
    %166 = vector.load %arg9[%c0_75, %c0_76] : memref<32x128xf32, #tpu.memory_space<vmem>>, vector<32x128xf32>
    %cst_77 = arith.constant dense<0.000000e+00> : vector<2x128xf32>
    %167 = tpu.matmul %165, %166, %cst_77 {dimension_numbers = #tpu.dot_dimension_numbers<[1], [0], [0], [1], [0, 0, 1, 1], [], []>} : vector<2x32xf32>, vector<32x128xf32>, vector<2x128xf32> -> vector<2x128xf32>
    %c0_78 = arith.constant 0 : index
    %c0_79 = arith.constant 0 : index
    %168 = vector.load %arg10[%c0_78, %c0_79] : memref<1x128xf32, #tpu.memory_space<vmem>>, vector<1x128xf32>
    %169 = vector.broadcast %168 : vector<1x128xf32> to vector<2x128xf32>
    %170 = arith.addf %167, %169 : vector<2x128xf32>
    %c1_80 = arith.constant 1 : index
    %c0_81 = arith.constant 0 : index
    %c0_82 = arith.constant 0 : index
    %171 = vector.load %arg11[%c1_80, %c0_81, %c0_82] : memref<4x2x128xf32, #tpu.memory_space<vmem>>, vector<1x2x128xf32>
    %172 = vector.shape_cast %171 : vector<1x2x128xf32> to vector<2x128xf32>
    %173 = vector.shape_cast %170 : vector<2x128xf32> to vector<1x2x128xf32>
    tpu.vector_store %arg11[%c1_80, %c0_81, %c0_82], %173 {strides = array<i32>} : memref<4x2x128xf32, #tpu.memory_space<vmem>>, vector<1x2x128xf32>,
    %174 = vector.broadcast %5 : vector<1x32xf32> to vector<2x32xf32>
    %175 = arith.mulf %165, %174 : vector<2x32xf32>
    %cst_83 = arith.constant dense<0.000000e+00> : vector<2xf32>
    %176 = vector.multi_reduction <add>, %175, %cst_83 [1] : vector<2x32xf32> to vector<2xf32>
    %177 = vector.shape_cast %176 : vector<2xf32> to vector<2x1xf32>
    %178 = vector.broadcast %177 : vector<2x1xf32> to vector<2x8xf32>
    %179 = arith.addf %178, %1 : vector<2x8xf32>
    %cst_84 = arith.constant -1.000000e+06 : f32
    %180 = vector.broadcast %cst_84 : f32 to vector<2x8xf32>
    %181 = arith.select %4, %179, %180 : vector<2x8xi1>, vector<2x8xf32>
    %cst_85 = arith.constant dense<0xFF800000> : vector<2xf32>
    %182 = vector.multi_reduction <maximumf>, %181, %cst_85 [1] : vector<2x8xf32> to vector<2xf32>
    %183 = vector.shape_cast %182 : vector<2xf32> to vector<2x1xf32>
    %184 = vector.broadcast %183 : vector<2x1xf32> to vector<2x8xf32>
    %185 = arith.subf %181, %184 : vector<2x8xf32>
    %186 = math.exp %185 : vector<2x8xf32>
    %cst_86 = arith.constant dense<0.000000e+00> : vector<2xf32>
    %187 = vector.multi_reduction <add>, %186, %cst_86 [1] : vector<2x8xf32> to vector<2xf32>
    %188 = vector.shape_cast %187 : vector<2xf32> to vector<2x1xf32>
    %189 = vector.broadcast %188 : vector<2x1xf32> to vector<2x8xf32>
    %190 = arith.divf %186, %189 : vector<2x8xf32>
    %191 = vector.shape_cast %190 : vector<2x8xf32> to vector<2x8x1xf32>
    %192 = vector.broadcast %191 : vector<2x8x1xf32> to vector<2x8x32xf32>
    %193 = arith.mulf %192, %0 : vector<2x8x32xf32>
    %cst_87 = arith.constant dense<0.000000e+00> : vector<2x32xf32>
    %194 = vector.multi_reduction <add>, %193, %cst_87 [1] : vector<2x8x32xf32> to vector<2x32xf32>
    %195 = tpu.concatenate %194, %141 in 1 : vector<2x32xf32>, vector<2x32xf32> -> vector<2x64xf32>
    %c0_88 = arith.constant 0 : index
    %c0_89 = arith.constant 0 : index
    %c0_90 = arith.constant 0 : index
    %196 = vector.load %arg7[%c0_88, %c0_89, %c0_90] : memref<2x64x128xf32, #tpu.memory_space<vmem>>, vector<1x64x128xf32>
    %197 = vector.shape_cast %196 : vector<1x64x128xf32> to vector<64x128xf32>
    %cst_91 = arith.constant dense<0.000000e+00> : vector<2x128xf32>
    %198 = tpu.matmul %195, %197, %cst_91 {dimension_numbers = #tpu.dot_dimension_numbers<[1], [0], [0], [1], [0, 0, 1, 1], [], []>} : vector<2x64xf32>, vector<64x128xf32>, vector<2x128xf32> -> vector<2x128xf32>
    %c0_92 = arith.constant 0 : index
    %c0_93 = arith.constant 0 : index
    %c0_94 = arith.constant 0 : index
    %199 = vector.load %arg8[%c0_92, %c0_93, %c0_94] : memref<2x1x128xf32, #tpu.memory_space<vmem>>, vector<1x1x128xf32>
    %200 = vector.shape_cast %199 : vector<1x1x128xf32> to vector<1x128xf32>
    %201 = vector.broadcast %200 : vector<1x128xf32> to vector<2x128xf32>
    %202 = arith.addf %198, %201 : vector<2x128xf32>
    %c2 = arith.constant 2 : index
    %c0_95 = arith.constant 0 : index
    %c0_96 = arith.constant 0 : index
    %203 = vector.load %arg0[%c2, %c0_95, %c0_96] : memref<4x2x128xf32, #tpu.memory_space<vmem>>, vector<1x2x128xf32>
    %204 = vector.shape_cast %203 : vector<1x2x128xf32> to vector<2x128xf32>
    %205 = arith.addf %202, %204 : vector<2x128xf32>
    %206 = vector.extract_strided_slice %205 {offsets = [0, 0], sizes = [2, 96], strides = [1, 1]} : vector<2x128xf32> to vector<2x96xf32>
    %207 = arith.negf %206 : vector<2x96xf32>
    %208 = math.exp %207 : vector<2x96xf32>
    %cst_97 = arith.constant 1.000000e+00 : f32
    %209 = vector.broadcast %cst_97 : f32 to vector<2x96xf32>
    %210 = arith.addf %209, %208 : vector<2x96xf32>
    %211 = arith.divf %209, %210 : vector<2x96xf32>
    %212 = vector.extract_strided_slice %211 {offsets = [0, 0], sizes = [2, 32], strides = [1, 1]} : vector<2x96xf32> to vector<2x32xf32>
    %213 = vector.extract_strided_slice %211 {offsets = [0, 32], sizes = [2, 32], strides = [1, 1]} : vector<2x96xf32> to vector<2x32xf32>
    %214 = vector.extract_strided_slice %211 {offsets = [0, 64], sizes = [2, 32], strides = [1, 1]} : vector<2x96xf32> to vector<2x32xf32>
    %215 = vector.extract_strided_slice %205 {offsets = [0, 96], sizes = [2, 32], strides = [1, 1]} : vector<2x128xf32> to vector<2x32xf32>
    %216 = math.tanh %215 : vector<2x32xf32>
    %217 = arith.mulf %213, %139 : vector<2x32xf32>
    %218 = arith.mulf %212, %216 : vector<2x32xf32>
    %219 = arith.addf %217, %218 : vector<2x32xf32>
    %220 = math.tanh %219 : vector<2x32xf32>
    %221 = arith.mulf %214, %220 : vector<2x32xf32>
    %222 = tpu.concatenate %221, %165 in 1 : vector<2x32xf32>, vector<2x32xf32> -> vector<2x64xf32>
    %c1_98 = arith.constant 1 : index
    %c0_99 = arith.constant 0 : index
    %c0_100 = arith.constant 0 : index
    %223 = vector.load %arg7[%c1_98, %c0_99, %c0_100] : memref<2x64x128xf32, #tpu.memory_space<vmem>>, vector<1x64x128xf32>
    %224 = vector.shape_cast %223 : vector<1x64x128xf32> to vector<64x128xf32>
    %cst_101 = arith.constant dense<0.000000e+00> : vector<2x128xf32>
    %225 = tpu.matmul %222, %224, %cst_101 {dimension_numbers = #tpu.dot_dimension_numbers<[1], [0], [0], [1], [0, 0, 1, 1], [], []>} : vector<2x64xf32>, vector<64x128xf32>, vector<2x128xf32> -> vector<2x128xf32>
    %c1_102 = arith.constant 1 : index
    %c0_103 = arith.constant 0 : index
    %c0_104 = arith.constant 0 : index
    %226 = vector.load %arg8[%c1_102, %c0_103, %c0_104] : memref<2x1x128xf32, #tpu.memory_space<vmem>>, vector<1x1x128xf32>
    %227 = vector.shape_cast %226 : vector<1x1x128xf32> to vector<1x128xf32>
    %228 = vector.broadcast %227 : vector<1x128xf32> to vector<2x128xf32>
    %229 = arith.addf %225, %228 : vector<2x128xf32>
    %230 = vector.extract_strided_slice %229 {offsets = [0, 0], sizes = [2, 96], strides = [1, 1]} : vector<2x128xf32> to vector<2x96xf32>
    %231 = arith.negf %230 : vector<2x96xf32>
    %232 = math.exp %231 : vector<2x96xf32>
    %cst_105 = arith.constant 1.000000e+00 : f32
    %233 = vector.broadcast %cst_105 : f32 to vector<2x96xf32>
    %234 = arith.addf %233, %232 : vector<2x96xf32>
    %235 = arith.divf %233, %234 : vector<2x96xf32>
    %236 = vector.extract_strided_slice %235 {offsets = [0, 0], sizes = [2, 32], strides = [1, 1]} : vector<2x96xf32> to vector<2x32xf32>
    %237 = vector.extract_strided_slice %235 {offsets = [0, 32], sizes = [2, 32], strides = [1, 1]} : vector<2x96xf32> to vector<2x32xf32>
    %238 = vector.extract_strided_slice %235 {offsets = [0, 64], sizes = [2, 32], strides = [1, 1]} : vector<2x96xf32> to vector<2x32xf32>
    %239 = vector.extract_strided_slice %229 {offsets = [0, 96], sizes = [2, 32], strides = [1, 1]} : vector<2x128xf32> to vector<2x32xf32>
    %240 = math.tanh %239 : vector<2x32xf32>
    %241 = arith.mulf %237, %163 : vector<2x32xf32>
    %242 = arith.mulf %236, %240 : vector<2x32xf32>
    %243 = arith.addf %241, %242 : vector<2x32xf32>
    %244 = math.tanh %243 : vector<2x32xf32>
    %245 = arith.mulf %238, %244 : vector<2x32xf32>
    %c0_106 = arith.constant 0 : index
    %c0_107 = arith.constant 0 : index
    %246 = vector.load %arg9[%c0_106, %c0_107] : memref<32x128xf32, #tpu.memory_space<vmem>>, vector<32x128xf32>
    %cst_108 = arith.constant dense<0.000000e+00> : vector<2x128xf32>
    %247 = tpu.matmul %245, %246, %cst_108 {dimension_numbers = #tpu.dot_dimension_numbers<[1], [0], [0], [1], [0, 0, 1, 1], [], []>} : vector<2x32xf32>, vector<32x128xf32>, vector<2x128xf32> -> vector<2x128xf32>
    %c0_109 = arith.constant 0 : index
    %c0_110 = arith.constant 0 : index
    %248 = vector.load %arg10[%c0_109, %c0_110] : memref<1x128xf32, #tpu.memory_space<vmem>>, vector<1x128xf32>
    %249 = vector.broadcast %248 : vector<1x128xf32> to vector<2x128xf32>
    %250 = arith.addf %247, %249 : vector<2x128xf32>
    %c2_111 = arith.constant 2 : index
    %c0_112 = arith.constant 0 : index
    %c0_113 = arith.constant 0 : index
    %251 = vector.load %arg11[%c2_111, %c0_112, %c0_113] : memref<4x2x128xf32, #tpu.memory_space<vmem>>, vector<1x2x128xf32>
    %252 = vector.shape_cast %251 : vector<1x2x128xf32> to vector<2x128xf32>
    %253 = vector.shape_cast %250 : vector<2x128xf32> to vector<1x2x128xf32>
    tpu.vector_store %arg11[%c2_111, %c0_112, %c0_113], %253 {strides = array<i32>} : memref<4x2x128xf32, #tpu.memory_space<vmem>>, vector<1x2x128xf32>,
    %254 = vector.broadcast %5 : vector<1x32xf32> to vector<2x32xf32>
    %255 = arith.mulf %245, %254 : vector<2x32xf32>
    %cst_114 = arith.constant dense<0.000000e+00> : vector<2xf32>
    %256 = vector.multi_reduction <add>, %255, %cst_114 [1] : vector<2x32xf32> to vector<2xf32>
    %257 = vector.shape_cast %256 : vector<2xf32> to vector<2x1xf32>
    %258 = vector.broadcast %257 : vector<2x1xf32> to vector<2x8xf32>
    %259 = arith.addf %258, %1 : vector<2x8xf32>
    %cst_115 = arith.constant -1.000000e+06 : f32
    %260 = vector.broadcast %cst_115 : f32 to vector<2x8xf32>
    %261 = arith.select %4, %259, %260 : vector<2x8xi1>, vector<2x8xf32>
    %cst_116 = arith.constant dense<0xFF800000> : vector<2xf32>
    %262 = vector.multi_reduction <maximumf>, %261, %cst_116 [1] : vector<2x8xf32> to vector<2xf32>
    %263 = vector.shape_cast %262 : vector<2xf32> to vector<2x1xf32>
    %264 = vector.broadcast %263 : vector<2x1xf32> to vector<2x8xf32>
    %265 = arith.subf %261, %264 : vector<2x8xf32>
    %266 = math.exp %265 : vector<2x8xf32>
    %cst_117 = arith.constant dense<0.000000e+00> : vector<2xf32>
    %267 = vector.multi_reduction <add>, %266, %cst_117 [1] : vector<2x8xf32> to vector<2xf32>
    %268 = vector.shape_cast %267 : vector<2xf32> to vector<2x1xf32>
    %269 = vector.broadcast %268 : vector<2x1xf32> to vector<2x8xf32>
    %270 = arith.divf %266, %269 : vector<2x8xf32>
    %271 = vector.shape_cast %270 : vector<2x8xf32> to vector<2x8x1xf32>
    %272 = vector.broadcast %271 : vector<2x8x1xf32> to vector<2x8x32xf32>
    %273 = arith.mulf %272, %0 : vector<2x8x32xf32>
    %cst_118 = arith.constant dense<0.000000e+00> : vector<2x32xf32>
    %274 = vector.multi_reduction <add>, %273, %cst_118 [1] : vector<2x8x32xf32> to vector<2x32xf32>
    %275 = tpu.concatenate %274, %221 in 1 : vector<2x32xf32>, vector<2x32xf32> -> vector<2x64xf32>
    %c0_119 = arith.constant 0 : index
    %c0_120 = arith.constant 0 : index
    %c0_121 = arith.constant 0 : index
    %276 = vector.load %arg7[%c0_119, %c0_120, %c0_121] : memref<2x64x128xf32, #tpu.memory_space<vmem>>, vector<1x64x128xf32>
    %277 = vector.shape_cast %276 : vector<1x64x128xf32> to vector<64x128xf32>
    %cst_122 = arith.constant dense<0.000000e+00> : vector<2x128xf32>
    %278 = tpu.matmul %275, %277, %cst_122 {dimension_numbers = #tpu.dot_dimension_numbers<[1], [0], [0], [1], [0, 0, 1, 1], [], []>} : vector<2x64xf32>, vector<64x128xf32>, vector<2x128xf32> -> vector<2x128xf32>
    %c0_123 = arith.constant 0 : index
    %c0_124 = arith.constant 0 : index
    %c0_125 = arith.constant 0 : index
    %279 = vector.load %arg8[%c0_123, %c0_124, %c0_125] : memref<2x1x128xf32, #tpu.memory_space<vmem>>, vector<1x1x128xf32>
    %280 = vector.shape_cast %279 : vector<1x1x128xf32> to vector<1x128xf32>
    %281 = vector.broadcast %280 : vector<1x128xf32> to vector<2x128xf32>
    %282 = arith.addf %278, %281 : vector<2x128xf32>
    %c3 = arith.constant 3 : index
    %c0_126 = arith.constant 0 : index
    %c0_127 = arith.constant 0 : index
    %283 = vector.load %arg0[%c3, %c0_126, %c0_127] : memref<4x2x128xf32, #tpu.memory_space<vmem>>, vector<1x2x128xf32>
    %284 = vector.shape_cast %283 : vector<1x2x128xf32> to vector<2x128xf32>
    %285 = arith.addf %282, %284 : vector<2x128xf32>
    %286 = vector.extract_strided_slice %285 {offsets = [0, 0], sizes = [2, 96], strides = [1, 1]} : vector<2x128xf32> to vector<2x96xf32>
    %287 = arith.negf %286 : vector<2x96xf32>
    %288 = math.exp %287 : vector<2x96xf32>
    %cst_128 = arith.constant 1.000000e+00 : f32
    %289 = vector.broadcast %cst_128 : f32 to vector<2x96xf32>
    %290 = arith.addf %289, %288 : vector<2x96xf32>
    %291 = arith.divf %289, %290 : vector<2x96xf32>
    %292 = vector.extract_strided_slice %291 {offsets = [0, 0], sizes = [2, 32], strides = [1, 1]} : vector<2x96xf32> to vector<2x32xf32>
    %293 = vector.extract_strided_slice %291 {offsets = [0, 32], sizes = [2, 32], strides = [1, 1]} : vector<2x96xf32> to vector<2x32xf32>
    %294 = vector.extract_strided_slice %291 {offsets = [0, 64], sizes = [2, 32], strides = [1, 1]} : vector<2x96xf32> to vector<2x32xf32>
    %295 = vector.extract_strided_slice %285 {offsets = [0, 96], sizes = [2, 32], strides = [1, 1]} : vector<2x128xf32> to vector<2x32xf32>
    %296 = math.tanh %295 : vector<2x32xf32>
    %297 = arith.mulf %293, %219 : vector<2x32xf32>
    %298 = arith.mulf %292, %296 : vector<2x32xf32>
    %299 = arith.addf %297, %298 : vector<2x32xf32>
    %300 = math.tanh %299 : vector<2x32xf32>
    %301 = arith.mulf %294, %300 : vector<2x32xf32>
    %302 = tpu.concatenate %301, %245 in 1 : vector<2x32xf32>, vector<2x32xf32> -> vector<2x64xf32>
    %c1_129 = arith.constant 1 : index
    %c0_130 = arith.constant 0 : index
    %c0_131 = arith.constant 0 : index
    %303 = vector.load %arg7[%c1_129, %c0_130, %c0_131] : memref<2x64x128xf32, #tpu.memory_space<vmem>>, vector<1x64x128xf32>
    %304 = vector.shape_cast %303 : vector<1x64x128xf32> to vector<64x128xf32>
    %cst_132 = arith.constant dense<0.000000e+00> : vector<2x128xf32>
    %305 = tpu.matmul %302, %304, %cst_132 {dimension_numbers = #tpu.dot_dimension_numbers<[1], [0], [0], [1], [0, 0, 1, 1], [], []>} : vector<2x64xf32>, vector<64x128xf32>, vector<2x128xf32> -> vector<2x128xf32>
    %c1_133 = arith.constant 1 : index
    %c0_134 = arith.constant 0 : index
    %c0_135 = arith.constant 0 : index
    %306 = vector.load %arg8[%c1_133, %c0_134, %c0_135] : memref<2x1x128xf32, #tpu.memory_space<vmem>>, vector<1x1x128xf32>
    %307 = vector.shape_cast %306 : vector<1x1x128xf32> to vector<1x128xf32>
    %308 = vector.broadcast %307 : vector<1x128xf32> to vector<2x128xf32>
    %309 = arith.addf %305, %308 : vector<2x128xf32>
    %310 = vector.extract_strided_slice %309 {offsets = [0, 0], sizes = [2, 96], strides = [1, 1]} : vector<2x128xf32> to vector<2x96xf32>
    %311 = arith.negf %310 : vector<2x96xf32>
    %312 = math.exp %311 : vector<2x96xf32>
    %cst_136 = arith.constant 1.000000e+00 : f32
    %313 = vector.broadcast %cst_136 : f32 to vector<2x96xf32>
    %314 = arith.addf %313, %312 : vector<2x96xf32>
    %315 = arith.divf %313, %314 : vector<2x96xf32>
    %316 = vector.extract_strided_slice %315 {offsets = [0, 0], sizes = [2, 32], strides = [1, 1]} : vector<2x96xf32> to vector<2x32xf32>
    %317 = vector.extract_strided_slice %315 {offsets = [0, 32], sizes = [2, 32], strides = [1, 1]} : vector<2x96xf32> to vector<2x32xf32>
    %318 = vector.extract_strided_slice %315 {offsets = [0, 64], sizes = [2, 32], strides = [1, 1]} : vector<2x96xf32> to vector<2x32xf32>
    %319 = vector.extract_strided_slice %309 {offsets = [0, 96], sizes = [2, 32], strides = [1, 1]} : vector<2x128xf32> to vector<2x32xf32>
    %320 = math.tanh %319 : vector<2x32xf32>
    %321 = arith.mulf %317, %243 : vector<2x32xf32>
    %322 = arith.mulf %316, %320 : vector<2x32xf32>
    %323 = arith.addf %321, %322 : vector<2x32xf32>
    %324 = math.tanh %323 : vector<2x32xf32>
    %325 = arith.mulf %318, %324 : vector<2x32xf32>
    %c0_137 = arith.constant 0 : index
    %c0_138 = arith.constant 0 : index
    %326 = vector.load %arg9[%c0_137, %c0_138] : memref<32x128xf32, #tpu.memory_space<vmem>>, vector<32x128xf32>
    %cst_139 = arith.constant dense<0.000000e+00> : vector<2x128xf32>
    %327 = tpu.matmul %325, %326, %cst_139 {dimension_numbers = #tpu.dot_dimension_numbers<[1], [0], [0], [1], [0, 0, 1, 1], [], []>} : vector<2x32xf32>, vector<32x128xf32>, vector<2x128xf32> -> vector<2x128xf32>
    %c0_140 = arith.constant 0 : index
    %c0_141 = arith.constant 0 : index
    %328 = vector.load %arg10[%c0_140, %c0_141] : memref<1x128xf32, #tpu.memory_space<vmem>>, vector<1x128xf32>
    %329 = vector.broadcast %328 : vector<1x128xf32> to vector<2x128xf32>
    %330 = arith.addf %327, %329 : vector<2x128xf32>
    %c3_142 = arith.constant 3 : index
    %c0_143 = arith.constant 0 : index
    %c0_144 = arith.constant 0 : index
    %331 = vector.load %arg11[%c3_142, %c0_143, %c0_144] : memref<4x2x128xf32, #tpu.memory_space<vmem>>, vector<1x2x128xf32>
    %332 = vector.shape_cast %331 : vector<1x2x128xf32> to vector<2x128xf32>
    %333 = vector.shape_cast %330 : vector<2x128xf32> to vector<1x2x128xf32>
    tpu.vector_store %arg11[%c3_142, %c0_143, %c0_144], %333 {strides = array<i32>} : memref<4x2x128xf32, #tpu.memory_space<vmem>>, vector<1x2x128xf32>,
    %c0_145 = arith.constant 0 : index
    %c0_146 = arith.constant 0 : index
    %c0_147 = arith.constant 0 : index
    %334 = vector.load %arg12[%c0_145, %c0_146, %c0_147] : memref<2x2x32xf32, #tpu.memory_space<vmem>>, vector<1x2x32xf32>
    %335 = vector.shape_cast %334 : vector<1x2x32xf32> to vector<2x32xf32>
    %336 = vector.shape_cast %301 : vector<2x32xf32> to vector<1x2x32xf32>
    tpu.vector_store %arg12[%c0_145, %c0_146, %c0_147], %336 {strides = array<i32>} : memref<2x2x32xf32, #tpu.memory_space<vmem>>, vector<1x2x32xf32>,
    %c0_148 = arith.constant 0 : index
    %c0_149 = arith.constant 0 : index
    %c0_150 = arith.constant 0 : index
    %337 = vector.load %arg13[%c0_148, %c0_149, %c0_150] : memref<2x2x32xf32, #tpu.memory_space<vmem>>, vector<1x2x32xf32>
    %338 = vector.shape_cast %337 : vector<1x2x32xf32> to vector<2x32xf32>
    %339 = vector.shape_cast %299 : vector<2x32xf32> to vector<1x2x32xf32>
    tpu.vector_store %arg13[%c0_148, %c0_149, %c0_150], %339 {strides = array<i32>} : memref<2x2x32xf32, #tpu.memory_space<vmem>>, vector<1x2x32xf32>,
    %c1_151 = arith.constant 1 : index
    %c0_152 = arith.constant 0 : index
    %c0_153 = arith.constant 0 : index
    %340 = vector.load %arg12[%c1_151, %c0_152, %c0_153] : memref<2x2x32xf32, #tpu.memory_space<vmem>>, vector<1x2x32xf32>
    %341 = vector.shape_cast %340 : vector<1x2x32xf32> to vector<2x32xf32>
    %342 = vector.shape_cast %325 : vector<2x32xf32> to vector<1x2x32xf32>
    tpu.vector_store %arg12[%c1_151, %c0_152, %c0_153], %342 {strides = array<i32>} : memref<2x2x32xf32, #tpu.memory_space<vmem>>, vector<1x2x32xf32>,
    %c1_154 = arith.constant 1 : index
    %c0_155 = arith.constant 0 : index
    %c0_156 = arith.constant 0 : index
    %343 = vector.load %arg13[%c1_154, %c0_155, %c0_156] : memref<2x2x32xf32, #tpu.memory_space<vmem>>, vector<1x2x32xf32>
    %344 = vector.shape_cast %343 : vector<1x2x32xf32> to vector<2x32xf32>
    %345 = vector.shape_cast %323 : vector<2x32xf32> to vector<1x2x32xf32>
    tpu.vector_store %arg13[%c1_154, %c0_155, %c0_156], %345 {strides = array<i32>} : memref<2x2x32xf32, #tpu.memory_space<vmem>>, vector<1x2x32xf32>,
    return
  }
}

module attributes {stable_mosaic.version = 11 : i64} {
  func.func @kernel(%arg0: memref<4x2x128xf32, #tpu.memory_space<vmem>>, %arg1: memref<2x8xf32, #tpu.memory_space<vmem>>, %arg2: memref<2x8xf32, #tpu.memory_space<vmem>>, %arg3: memref<2x8x32xf32, #tpu.memory_space<vmem>>, %arg4: memref<2x2x32xf32, #tpu.memory_space<vmem>>, %arg5: memref<2x2x32xf32, #tpu.memory_space<vmem>>, %arg6: memref<1x32xf32, #tpu.memory_space<vmem>>, %arg7: memref<2x64x128xf32, #tpu.memory_space<vmem>>, %arg8: memref<2x1x128xf32, #tpu.memory_space<vmem>>, %arg9: memref<32x128xf32, #tpu.memory_space<vmem>>, %arg10: memref<1x128xf32, #tpu.memory_space<vmem>>, %arg11: memref<4x2x128xf32, #tpu.memory_space<vmem>>, %arg12: memref<2x2x32xf32, #tpu.memory_space<vmem>>, %arg13: memref<2x2x32xf32, #tpu.memory_space<vmem>>) attributes {dimension_semantics = [], scalar_prefetch = 0 : i64, scratch_operands = 0 : i64, tpu.core_type = #tpu.core_type<tc>} {
    %c0 = arith.constant 0 : index
    %c0_0 = arith.constant 0 : index
    %c0_1 = arith.constant 0 : index
    %0 = vector.load %arg3[%c0, %c0_0, %c0_1] : memref<2x8x32xf32, #tpu.memory_space<vmem>>, vector<2x8x32xf32>
    %c0_2 = arith.constant 0 : index
    %c0_3 = arith.constant 0 : index
    %1 = vector.load %arg1[%c0_2, %c0_3] : memref<2x8xf32, #tpu.memory_space<vmem>>, vector<2x8xf32>
    %c0_4 = arith.constant 0 : index
    %c0_5 = arith.constant 0 : index
    %2 = vector.load %arg2[%c0_4, %c0_5] : memref<2x8xf32, #tpu.memory_space<vmem>>, vector<2x8xf32>
    %cst = arith.constant 5.000000e-01 : f32
    %3 = vector.broadcast %cst : f32 to vector<2x8xf32>
    %4 = arith.cmpf ogt, %2, %3 : vector<2x8xf32>
    %c0_6 = arith.constant 0 : index
    %c0_7 = arith.constant 0 : index
    %5 = vector.load %arg6[%c0_6, %c0_7] : memref<1x32xf32, #tpu.memory_space<vmem>>, vector<1x32xf32>
    %c0_8 = arith.constant 0 : index
    %c0_9 = arith.constant 0 : index
    %c0_10 = arith.constant 0 : index
    %6 = vector.load %arg4[%c0_8, %c0_9, %c0_10] : memref<2x2x32xf32, #tpu.memory_space<vmem>>, vector<1x2x32xf32>
    %7 = vector.shape_cast %6 : vector<1x2x32xf32> to vector<2x32xf32>
    %c1 = arith.constant 1 : index
    %c0_11 = arith.constant 0 : index
    %c0_12 = arith.constant 0 : index
    %8 = vector.load %arg4[%c1, %c0_11, %c0_12] : memref<2x2x32xf32, #tpu.memory_space<vmem>>, vector<1x2x32xf32>
    %9 = vector.shape_cast %8 : vector<1x2x32xf32> to vector<2x32xf32>
    %c0_13 = arith.constant 0 : index
    %c0_14 = arith.constant 0 : index
    %c0_15 = arith.constant 0 : index
    %10 = vector.load %arg5[%c0_13, %c0_14, %c0_15] : memref<2x2x32xf32, #tpu.memory_space<vmem>>, vector<1x2x32xf32>
    %11 = vector.shape_cast %10 : vector<1x2x32xf32> to vector<2x32xf32>
    %c1_16 = arith.constant 1 : index
    %c0_17 = arith.constant 0 : index
    %c0_18 = arith.constant 0 : index
    %12 = vector.load %arg5[%c1_16, %c0_17, %c0_18] : memref<2x2x32xf32, #tpu.memory_space<vmem>>, vector<1x2x32xf32>
    %13 = vector.shape_cast %12 : vector<1x2x32xf32> to vector<2x32xf32>
    %14 = vector.broadcast %5 : vector<1x32xf32> to vector<2x32xf32>
    %15 = arith.mulf %9, %14 : vector<2x32xf32>
    %cst_19 = arith.constant dense<0.000000e+00> : vector<2xf32>
    %16 = vector.multi_reduction <add>, %15, %cst_19 [1] : vector<2x32xf32> to vector<2xf32>
    %17 = vector.shape_cast %16 : vector<2xf32> to vector<2x1xf32>
    %18 = vector.broadcast %17 : vector<2x1xf32> to vector<2x8xf32>
    %19 = arith.addf %18, %1 : vector<2x8xf32>
    %cst_20 = arith.constant -1.000000e+06 : f32
    %20 = vector.broadcast %cst_20 : f32 to vector<2x8xf32>
    %21 = arith.select %4, %19, %20 : vector<2x8xi1>, vector<2x8xf32>
    %cst_21 = arith.constant dense<0xFF800000> : vector<2xf32>
    %22 = vector.multi_reduction <maximumf>, %21, %cst_21 [1] : vector<2x8xf32> to vector<2xf32>
    %23 = vector.shape_cast %22 : vector<2xf32> to vector<2x1xf32>
    %24 = vector.broadcast %23 : vector<2x1xf32> to vector<2x8xf32>
    %25 = arith.subf %21, %24 : vector<2x8xf32>
    %26 = math.exp %25 : vector<2x8xf32>
    %cst_22 = arith.constant dense<0.000000e+00> : vector<2xf32>
    %27 = vector.multi_reduction <add>, %26, %cst_22 [1] : vector<2x8xf32> to vector<2xf32>
    %28 = vector.shape_cast %27 : vector<2xf32> to vector<2x1xf32>
    %29 = vector.broadcast %28 : vector<2x1xf32> to vector<2x8xf32>
    %30 = arith.divf %26, %29 : vector<2x8xf32>
    %31 = vector.shape_cast %30 : vector<2x8xf32> to vector<2x8x1xf32>
    %32 = vector.broadcast %31 : vector<2x8x1xf32> to vector<2x8x32xf32>
    %33 = arith.mulf %32, %0 : vector<2x8x32xf32>
    %cst_23 = arith.constant dense<0.000000e+00> : vector<2x32xf32>
    %34 = vector.multi_reduction <add>, %33, %cst_23 [1] : vector<2x8x32xf32> to vector<2x32xf32>
    %c0_24 = arith.constant 0 : index
    %c0_25 = arith.constant 0 : index
    %c0_26 = arith.constant 0 : index
    %35 = vector.load %arg7[%c0_24, %c0_25, %c0_26] : memref<2x64x128xf32, #tpu.memory_space<vmem>>, vector<1x64x128xf32>
    %36 = vector.shape_cast %35 : vector<1x64x128xf32> to vector<64x128xf32>
    %37 = vector.extract_strided_slice %36 {offsets = [0, 0], sizes = [32, 128], strides = [1, 1]} : vector<64x128xf32> to vector<32x128xf32>
    %cst_27 = arith.constant dense<0.000000e+00> : vector<2x128xf32>
    %38 = tpu.matmul %34, %37, %cst_27 {dimension_numbers = #tpu.dot_dimension_numbers<[1], [0], [0], [1], [0, 0, 1, 1], [], []>} : vector<2x32xf32>, vector<32x128xf32>, vector<2x128xf32> -> vector<2x128xf32>
    %39 = vector.extract_strided_slice %36 {offsets = [32, 0], sizes = [32, 128], strides = [1, 1]} : vector<64x128xf32> to vector<32x128xf32>
    %cst_28 = arith.constant dense<0.000000e+00> : vector<2x128xf32>
    %40 = tpu.matmul %7, %39, %cst_28 {dimension_numbers = #tpu.dot_dimension_numbers<[1], [0], [0], [1], [0, 0, 1, 1], [], []>} : vector<2x32xf32>, vector<32x128xf32>, vector<2x128xf32> -> vector<2x128xf32>
    %41 = arith.addf %38, %40 : vector<2x128xf32>
    %c0_29 = arith.constant 0 : index
    %c0_30 = arith.constant 0 : index
    %c0_31 = arith.constant 0 : index
    %42 = vector.load %arg8[%c0_29, %c0_30, %c0_31] : memref<2x1x128xf32, #tpu.memory_space<vmem>>, vector<1x1x128xf32>
    %43 = vector.shape_cast %42 : vector<1x1x128xf32> to vector<1x128xf32>
    %44 = vector.broadcast %43 : vector<1x128xf32> to vector<2x128xf32>
    %45 = arith.addf %41, %44 : vector<2x128xf32>
    %c0_32 = arith.constant 0 : index
    %c0_33 = arith.constant 0 : index
    %c0_34 = arith.constant 0 : index
    %46 = vector.load %arg0[%c0_32, %c0_33, %c0_34] : memref<4x2x128xf32, #tpu.memory_space<vmem>>, vector<1x2x128xf32>
    %47 = vector.shape_cast %46 : vector<1x2x128xf32> to vector<2x128xf32>
    %48 = arith.addf %45, %47 : vector<2x128xf32>
    %49 = vector.extract_strided_slice %48 {offsets = [0, 0], sizes = [2, 96], strides = [1, 1]} : vector<2x128xf32> to vector<2x96xf32>
    %50 = arith.negf %49 : vector<2x96xf32>
    %51 = math.exp %50 : vector<2x96xf32>
    %cst_35 = arith.constant 1.000000e+00 : f32
    %52 = vector.broadcast %cst_35 : f32 to vector<2x96xf32>
    %53 = arith.addf %52, %51 : vector<2x96xf32>
    %54 = arith.divf %52, %53 : vector<2x96xf32>
    %55 = vector.extract_strided_slice %54 {offsets = [0, 0], sizes = [2, 32], strides = [1, 1]} : vector<2x96xf32> to vector<2x32xf32>
    %56 = vector.extract_strided_slice %54 {offsets = [0, 32], sizes = [2, 32], strides = [1, 1]} : vector<2x96xf32> to vector<2x32xf32>
    %57 = vector.extract_strided_slice %54 {offsets = [0, 64], sizes = [2, 32], strides = [1, 1]} : vector<2x96xf32> to vector<2x32xf32>
    %58 = vector.extract_strided_slice %48 {offsets = [0, 96], sizes = [2, 32], strides = [1, 1]} : vector<2x128xf32> to vector<2x32xf32>
    %59 = math.tanh %58 : vector<2x32xf32>
    %60 = arith.mulf %56, %11 : vector<2x32xf32>
    %61 = arith.mulf %55, %59 : vector<2x32xf32>
    %62 = arith.addf %60, %61 : vector<2x32xf32>
    %63 = math.tanh %62 : vector<2x32xf32>
    %64 = arith.mulf %57, %63 : vector<2x32xf32>
    %c1_36 = arith.constant 1 : index
    %c0_37 = arith.constant 0 : index
    %c0_38 = arith.constant 0 : index
    %65 = vector.load %arg7[%c1_36, %c0_37, %c0_38] : memref<2x64x128xf32, #tpu.memory_space<vmem>>, vector<1x64x128xf32>
    %66 = vector.shape_cast %65 : vector<1x64x128xf32> to vector<64x128xf32>
    %67 = vector.extract_strided_slice %66 {offsets = [0, 0], sizes = [32, 128], strides = [1, 1]} : vector<64x128xf32> to vector<32x128xf32>
    %cst_39 = arith.constant dense<0.000000e+00> : vector<2x128xf32>
    %68 = tpu.matmul %64, %67, %cst_39 {dimension_numbers = #tpu.dot_dimension_numbers<[1], [0], [0], [1], [0, 0, 1, 1], [], []>} : vector<2x32xf32>, vector<32x128xf32>, vector<2x128xf32> -> vector<2x128xf32>
    %69 = vector.extract_strided_slice %66 {offsets = [32, 0], sizes = [32, 128], strides = [1, 1]} : vector<64x128xf32> to vector<32x128xf32>
    %cst_40 = arith.constant dense<0.000000e+00> : vector<2x128xf32>
    %70 = tpu.matmul %9, %69, %cst_40 {dimension_numbers = #tpu.dot_dimension_numbers<[1], [0], [0], [1], [0, 0, 1, 1], [], []>} : vector<2x32xf32>, vector<32x128xf32>, vector<2x128xf32> -> vector<2x128xf32>
    %71 = arith.addf %68, %70 : vector<2x128xf32>
    %c1_41 = arith.constant 1 : index
    %c0_42 = arith.constant 0 : index
    %c0_43 = arith.constant 0 : index
    %72 = vector.load %arg8[%c1_41, %c0_42, %c0_43] : memref<2x1x128xf32, #tpu.memory_space<vmem>>, vector<1x1x128xf32>
    %73 = vector.shape_cast %72 : vector<1x1x128xf32> to vector<1x128xf32>
    %74 = vector.broadcast %73 : vector<1x128xf32> to vector<2x128xf32>
    %75 = arith.addf %71, %74 : vector<2x128xf32>
    %76 = vector.extract_strided_slice %75 {offsets = [0, 0], sizes = [2, 96], strides = [1, 1]} : vector<2x128xf32> to vector<2x96xf32>
    %77 = arith.negf %76 : vector<2x96xf32>
    %78 = math.exp %77 : vector<2x96xf32>
    %cst_44 = arith.constant 1.000000e+00 : f32
    %79 = vector.broadcast %cst_44 : f32 to vector<2x96xf32>
    %80 = arith.addf %79, %78 : vector<2x96xf32>
    %81 = arith.divf %79, %80 : vector<2x96xf32>
    %82 = vector.extract_strided_slice %81 {offsets = [0, 0], sizes = [2, 32], strides = [1, 1]} : vector<2x96xf32> to vector<2x32xf32>
    %83 = vector.extract_strided_slice %81 {offsets = [0, 32], sizes = [2, 32], strides = [1, 1]} : vector<2x96xf32> to vector<2x32xf32>
    %84 = vector.extract_strided_slice %81 {offsets = [0, 64], sizes = [2, 32], strides = [1, 1]} : vector<2x96xf32> to vector<2x32xf32>
    %85 = vector.extract_strided_slice %75 {offsets = [0, 96], sizes = [2, 32], strides = [1, 1]} : vector<2x128xf32> to vector<2x32xf32>
    %86 = math.tanh %85 : vector<2x32xf32>
    %87 = arith.mulf %83, %13 : vector<2x32xf32>
    %88 = arith.mulf %82, %86 : vector<2x32xf32>
    %89 = arith.addf %87, %88 : vector<2x32xf32>
    %90 = math.tanh %89 : vector<2x32xf32>
    %91 = arith.mulf %84, %90 : vector<2x32xf32>
    %c0_45 = arith.constant 0 : index
    %c0_46 = arith.constant 0 : index
    %92 = vector.load %arg9[%c0_45, %c0_46] : memref<32x128xf32, #tpu.memory_space<vmem>>, vector<32x128xf32>
    %cst_47 = arith.constant dense<0.000000e+00> : vector<2x128xf32>
    %93 = tpu.matmul %91, %92, %cst_47 {dimension_numbers = #tpu.dot_dimension_numbers<[1], [0], [0], [1], [0, 0, 1, 1], [], []>} : vector<2x32xf32>, vector<32x128xf32>, vector<2x128xf32> -> vector<2x128xf32>
    %c0_48 = arith.constant 0 : index
    %c0_49 = arith.constant 0 : index
    %94 = vector.load %arg10[%c0_48, %c0_49] : memref<1x128xf32, #tpu.memory_space<vmem>>, vector<1x128xf32>
    %95 = vector.broadcast %94 : vector<1x128xf32> to vector<2x128xf32>
    %96 = arith.addf %93, %95 : vector<2x128xf32>
    %c0_50 = arith.constant 0 : index
    %c0_51 = arith.constant 0 : index
    %c0_52 = arith.constant 0 : index
    %97 = vector.load %arg11[%c0_50, %c0_51, %c0_52] : memref<4x2x128xf32, #tpu.memory_space<vmem>>, vector<1x2x128xf32>
    %98 = vector.shape_cast %97 : vector<1x2x128xf32> to vector<2x128xf32>
    %99 = vector.shape_cast %96 : vector<2x128xf32> to vector<1x2x128xf32>
    tpu.vector_store %arg11[%c0_50, %c0_51, %c0_52], %99 {strides = array<i32>} : memref<4x2x128xf32, #tpu.memory_space<vmem>>, vector<1x2x128xf32>,
    %100 = vector.broadcast %5 : vector<1x32xf32> to vector<2x32xf32>
    %101 = arith.mulf %91, %100 : vector<2x32xf32>
    %cst_53 = arith.constant dense<0.000000e+00> : vector<2xf32>
    %102 = vector.multi_reduction <add>, %101, %cst_53 [1] : vector<2x32xf32> to vector<2xf32>
    %103 = vector.shape_cast %102 : vector<2xf32> to vector<2x1xf32>
    %104 = vector.broadcast %103 : vector<2x1xf32> to vector<2x8xf32>
    %105 = arith.addf %104, %1 : vector<2x8xf32>
    %cst_54 = arith.constant -1.000000e+06 : f32
    %106 = vector.broadcast %cst_54 : f32 to vector<2x8xf32>
    %107 = arith.select %4, %105, %106 : vector<2x8xi1>, vector<2x8xf32>
    %cst_55 = arith.constant dense<0xFF800000> : vector<2xf32>
    %108 = vector.multi_reduction <maximumf>, %107, %cst_55 [1] : vector<2x8xf32> to vector<2xf32>
    %109 = vector.shape_cast %108 : vector<2xf32> to vector<2x1xf32>
    %110 = vector.broadcast %109 : vector<2x1xf32> to vector<2x8xf32>
    %111 = arith.subf %107, %110 : vector<2x8xf32>
    %112 = math.exp %111 : vector<2x8xf32>
    %cst_56 = arith.constant dense<0.000000e+00> : vector<2xf32>
    %113 = vector.multi_reduction <add>, %112, %cst_56 [1] : vector<2x8xf32> to vector<2xf32>
    %114 = vector.shape_cast %113 : vector<2xf32> to vector<2x1xf32>
    %115 = vector.broadcast %114 : vector<2x1xf32> to vector<2x8xf32>
    %116 = arith.divf %112, %115 : vector<2x8xf32>
    %117 = vector.shape_cast %116 : vector<2x8xf32> to vector<2x8x1xf32>
    %118 = vector.broadcast %117 : vector<2x8x1xf32> to vector<2x8x32xf32>
    %119 = arith.mulf %118, %0 : vector<2x8x32xf32>
    %cst_57 = arith.constant dense<0.000000e+00> : vector<2x32xf32>
    %120 = vector.multi_reduction <add>, %119, %cst_57 [1] : vector<2x8x32xf32> to vector<2x32xf32>
    %c0_58 = arith.constant 0 : index
    %c0_59 = arith.constant 0 : index
    %c0_60 = arith.constant 0 : index
    %121 = vector.load %arg7[%c0_58, %c0_59, %c0_60] : memref<2x64x128xf32, #tpu.memory_space<vmem>>, vector<1x64x128xf32>
    %122 = vector.shape_cast %121 : vector<1x64x128xf32> to vector<64x128xf32>
    %123 = vector.extract_strided_slice %122 {offsets = [0, 0], sizes = [32, 128], strides = [1, 1]} : vector<64x128xf32> to vector<32x128xf32>
    %cst_61 = arith.constant dense<0.000000e+00> : vector<2x128xf32>
    %124 = tpu.matmul %120, %123, %cst_61 {dimension_numbers = #tpu.dot_dimension_numbers<[1], [0], [0], [1], [0, 0, 1, 1], [], []>} : vector<2x32xf32>, vector<32x128xf32>, vector<2x128xf32> -> vector<2x128xf32>
    %125 = vector.extract_strided_slice %122 {offsets = [32, 0], sizes = [32, 128], strides = [1, 1]} : vector<64x128xf32> to vector<32x128xf32>
    %cst_62 = arith.constant dense<0.000000e+00> : vector<2x128xf32>
    %126 = tpu.matmul %64, %125, %cst_62 {dimension_numbers = #tpu.dot_dimension_numbers<[1], [0], [0], [1], [0, 0, 1, 1], [], []>} : vector<2x32xf32>, vector<32x128xf32>, vector<2x128xf32> -> vector<2x128xf32>
    %127 = arith.addf %124, %126 : vector<2x128xf32>
    %c0_63 = arith.constant 0 : index
    %c0_64 = arith.constant 0 : index
    %c0_65 = arith.constant 0 : index
    %128 = vector.load %arg8[%c0_63, %c0_64, %c0_65] : memref<2x1x128xf32, #tpu.memory_space<vmem>>, vector<1x1x128xf32>
    %129 = vector.shape_cast %128 : vector<1x1x128xf32> to vector<1x128xf32>
    %130 = vector.broadcast %129 : vector<1x128xf32> to vector<2x128xf32>
    %131 = arith.addf %127, %130 : vector<2x128xf32>
    %c1_66 = arith.constant 1 : index
    %c0_67 = arith.constant 0 : index
    %c0_68 = arith.constant 0 : index
    %132 = vector.load %arg0[%c1_66, %c0_67, %c0_68] : memref<4x2x128xf32, #tpu.memory_space<vmem>>, vector<1x2x128xf32>
    %133 = vector.shape_cast %132 : vector<1x2x128xf32> to vector<2x128xf32>
    %134 = arith.addf %131, %133 : vector<2x128xf32>
    %135 = vector.extract_strided_slice %134 {offsets = [0, 0], sizes = [2, 96], strides = [1, 1]} : vector<2x128xf32> to vector<2x96xf32>
    %136 = arith.negf %135 : vector<2x96xf32>
    %137 = math.exp %136 : vector<2x96xf32>
    %cst_69 = arith.constant 1.000000e+00 : f32
    %138 = vector.broadcast %cst_69 : f32 to vector<2x96xf32>
    %139 = arith.addf %138, %137 : vector<2x96xf32>
    %140 = arith.divf %138, %139 : vector<2x96xf32>
    %141 = vector.extract_strided_slice %140 {offsets = [0, 0], sizes = [2, 32], strides = [1, 1]} : vector<2x96xf32> to vector<2x32xf32>
    %142 = vector.extract_strided_slice %140 {offsets = [0, 32], sizes = [2, 32], strides = [1, 1]} : vector<2x96xf32> to vector<2x32xf32>
    %143 = vector.extract_strided_slice %140 {offsets = [0, 64], sizes = [2, 32], strides = [1, 1]} : vector<2x96xf32> to vector<2x32xf32>
    %144 = vector.extract_strided_slice %134 {offsets = [0, 96], sizes = [2, 32], strides = [1, 1]} : vector<2x128xf32> to vector<2x32xf32>
    %145 = math.tanh %144 : vector<2x32xf32>
    %146 = arith.mulf %142, %62 : vector<2x32xf32>
    %147 = arith.mulf %141, %145 : vector<2x32xf32>
    %148 = arith.addf %146, %147 : vector<2x32xf32>
    %149 = math.tanh %148 : vector<2x32xf32>
    %150 = arith.mulf %143, %149 : vector<2x32xf32>
    %c1_70 = arith.constant 1 : index
    %c0_71 = arith.constant 0 : index
    %c0_72 = arith.constant 0 : index
    %151 = vector.load %arg7[%c1_70, %c0_71, %c0_72] : memref<2x64x128xf32, #tpu.memory_space<vmem>>, vector<1x64x128xf32>
    %152 = vector.shape_cast %151 : vector<1x64x128xf32> to vector<64x128xf32>
    %153 = vector.extract_strided_slice %152 {offsets = [0, 0], sizes = [32, 128], strides = [1, 1]} : vector<64x128xf32> to vector<32x128xf32>
    %cst_73 = arith.constant dense<0.000000e+00> : vector<2x128xf32>
    %154 = tpu.matmul %150, %153, %cst_73 {dimension_numbers = #tpu.dot_dimension_numbers<[1], [0], [0], [1], [0, 0, 1, 1], [], []>} : vector<2x32xf32>, vector<32x128xf32>, vector<2x128xf32> -> vector<2x128xf32>
    %155 = vector.extract_strided_slice %152 {offsets = [32, 0], sizes = [32, 128], strides = [1, 1]} : vector<64x128xf32> to vector<32x128xf32>
    %cst_74 = arith.constant dense<0.000000e+00> : vector<2x128xf32>
    %156 = tpu.matmul %91, %155, %cst_74 {dimension_numbers = #tpu.dot_dimension_numbers<[1], [0], [0], [1], [0, 0, 1, 1], [], []>} : vector<2x32xf32>, vector<32x128xf32>, vector<2x128xf32> -> vector<2x128xf32>
    %157 = arith.addf %154, %156 : vector<2x128xf32>
    %c1_75 = arith.constant 1 : index
    %c0_76 = arith.constant 0 : index
    %c0_77 = arith.constant 0 : index
    %158 = vector.load %arg8[%c1_75, %c0_76, %c0_77] : memref<2x1x128xf32, #tpu.memory_space<vmem>>, vector<1x1x128xf32>
    %159 = vector.shape_cast %158 : vector<1x1x128xf32> to vector<1x128xf32>
    %160 = vector.broadcast %159 : vector<1x128xf32> to vector<2x128xf32>
    %161 = arith.addf %157, %160 : vector<2x128xf32>
    %162 = vector.extract_strided_slice %161 {offsets = [0, 0], sizes = [2, 96], strides = [1, 1]} : vector<2x128xf32> to vector<2x96xf32>
    %163 = arith.negf %162 : vector<2x96xf32>
    %164 = math.exp %163 : vector<2x96xf32>
    %cst_78 = arith.constant 1.000000e+00 : f32
    %165 = vector.broadcast %cst_78 : f32 to vector<2x96xf32>
    %166 = arith.addf %165, %164 : vector<2x96xf32>
    %167 = arith.divf %165, %166 : vector<2x96xf32>
    %168 = vector.extract_strided_slice %167 {offsets = [0, 0], sizes = [2, 32], strides = [1, 1]} : vector<2x96xf32> to vector<2x32xf32>
    %169 = vector.extract_strided_slice %167 {offsets = [0, 32], sizes = [2, 32], strides = [1, 1]} : vector<2x96xf32> to vector<2x32xf32>
    %170 = vector.extract_strided_slice %167 {offsets = [0, 64], sizes = [2, 32], strides = [1, 1]} : vector<2x96xf32> to vector<2x32xf32>
    %171 = vector.extract_strided_slice %161 {offsets = [0, 96], sizes = [2, 32], strides = [1, 1]} : vector<2x128xf32> to vector<2x32xf32>
    %172 = math.tanh %171 : vector<2x32xf32>
    %173 = arith.mulf %169, %89 : vector<2x32xf32>
    %174 = arith.mulf %168, %172 : vector<2x32xf32>
    %175 = arith.addf %173, %174 : vector<2x32xf32>
    %176 = math.tanh %175 : vector<2x32xf32>
    %177 = arith.mulf %170, %176 : vector<2x32xf32>
    %c0_79 = arith.constant 0 : index
    %c0_80 = arith.constant 0 : index
    %178 = vector.load %arg9[%c0_79, %c0_80] : memref<32x128xf32, #tpu.memory_space<vmem>>, vector<32x128xf32>
    %cst_81 = arith.constant dense<0.000000e+00> : vector<2x128xf32>
    %179 = tpu.matmul %177, %178, %cst_81 {dimension_numbers = #tpu.dot_dimension_numbers<[1], [0], [0], [1], [0, 0, 1, 1], [], []>} : vector<2x32xf32>, vector<32x128xf32>, vector<2x128xf32> -> vector<2x128xf32>
    %c0_82 = arith.constant 0 : index
    %c0_83 = arith.constant 0 : index
    %180 = vector.load %arg10[%c0_82, %c0_83] : memref<1x128xf32, #tpu.memory_space<vmem>>, vector<1x128xf32>
    %181 = vector.broadcast %180 : vector<1x128xf32> to vector<2x128xf32>
    %182 = arith.addf %179, %181 : vector<2x128xf32>
    %c1_84 = arith.constant 1 : index
    %c0_85 = arith.constant 0 : index
    %c0_86 = arith.constant 0 : index
    %183 = vector.load %arg11[%c1_84, %c0_85, %c0_86] : memref<4x2x128xf32, #tpu.memory_space<vmem>>, vector<1x2x128xf32>
    %184 = vector.shape_cast %183 : vector<1x2x128xf32> to vector<2x128xf32>
    %185 = vector.shape_cast %182 : vector<2x128xf32> to vector<1x2x128xf32>
    tpu.vector_store %arg11[%c1_84, %c0_85, %c0_86], %185 {strides = array<i32>} : memref<4x2x128xf32, #tpu.memory_space<vmem>>, vector<1x2x128xf32>,
    %186 = vector.broadcast %5 : vector<1x32xf32> to vector<2x32xf32>
    %187 = arith.mulf %177, %186 : vector<2x32xf32>
    %cst_87 = arith.constant dense<0.000000e+00> : vector<2xf32>
    %188 = vector.multi_reduction <add>, %187, %cst_87 [1] : vector<2x32xf32> to vector<2xf32>
    %189 = vector.shape_cast %188 : vector<2xf32> to vector<2x1xf32>
    %190 = vector.broadcast %189 : vector<2x1xf32> to vector<2x8xf32>
    %191 = arith.addf %190, %1 : vector<2x8xf32>
    %cst_88 = arith.constant -1.000000e+06 : f32
    %192 = vector.broadcast %cst_88 : f32 to vector<2x8xf32>
    %193 = arith.select %4, %191, %192 : vector<2x8xi1>, vector<2x8xf32>
    %cst_89 = arith.constant dense<0xFF800000> : vector<2xf32>
    %194 = vector.multi_reduction <maximumf>, %193, %cst_89 [1] : vector<2x8xf32> to vector<2xf32>
    %195 = vector.shape_cast %194 : vector<2xf32> to vector<2x1xf32>
    %196 = vector.broadcast %195 : vector<2x1xf32> to vector<2x8xf32>
    %197 = arith.subf %193, %196 : vector<2x8xf32>
    %198 = math.exp %197 : vector<2x8xf32>
    %cst_90 = arith.constant dense<0.000000e+00> : vector<2xf32>
    %199 = vector.multi_reduction <add>, %198, %cst_90 [1] : vector<2x8xf32> to vector<2xf32>
    %200 = vector.shape_cast %199 : vector<2xf32> to vector<2x1xf32>
    %201 = vector.broadcast %200 : vector<2x1xf32> to vector<2x8xf32>
    %202 = arith.divf %198, %201 : vector<2x8xf32>
    %203 = vector.shape_cast %202 : vector<2x8xf32> to vector<2x8x1xf32>
    %204 = vector.broadcast %203 : vector<2x8x1xf32> to vector<2x8x32xf32>
    %205 = arith.mulf %204, %0 : vector<2x8x32xf32>
    %cst_91 = arith.constant dense<0.000000e+00> : vector<2x32xf32>
    %206 = vector.multi_reduction <add>, %205, %cst_91 [1] : vector<2x8x32xf32> to vector<2x32xf32>
    %c0_92 = arith.constant 0 : index
    %c0_93 = arith.constant 0 : index
    %c0_94 = arith.constant 0 : index
    %207 = vector.load %arg7[%c0_92, %c0_93, %c0_94] : memref<2x64x128xf32, #tpu.memory_space<vmem>>, vector<1x64x128xf32>
    %208 = vector.shape_cast %207 : vector<1x64x128xf32> to vector<64x128xf32>
    %209 = vector.extract_strided_slice %208 {offsets = [0, 0], sizes = [32, 128], strides = [1, 1]} : vector<64x128xf32> to vector<32x128xf32>
    %cst_95 = arith.constant dense<0.000000e+00> : vector<2x128xf32>
    %210 = tpu.matmul %206, %209, %cst_95 {dimension_numbers = #tpu.dot_dimension_numbers<[1], [0], [0], [1], [0, 0, 1, 1], [], []>} : vector<2x32xf32>, vector<32x128xf32>, vector<2x128xf32> -> vector<2x128xf32>
    %211 = vector.extract_strided_slice %208 {offsets = [32, 0], sizes = [32, 128], strides = [1, 1]} : vector<64x128xf32> to vector<32x128xf32>
    %cst_96 = arith.constant dense<0.000000e+00> : vector<2x128xf32>
    %212 = tpu.matmul %150, %211, %cst_96 {dimension_numbers = #tpu.dot_dimension_numbers<[1], [0], [0], [1], [0, 0, 1, 1], [], []>} : vector<2x32xf32>, vector<32x128xf32>, vector<2x128xf32> -> vector<2x128xf32>
    %213 = arith.addf %210, %212 : vector<2x128xf32>
    %c0_97 = arith.constant 0 : index
    %c0_98 = arith.constant 0 : index
    %c0_99 = arith.constant 0 : index
    %214 = vector.load %arg8[%c0_97, %c0_98, %c0_99] : memref<2x1x128xf32, #tpu.memory_space<vmem>>, vector<1x1x128xf32>
    %215 = vector.shape_cast %214 : vector<1x1x128xf32> to vector<1x128xf32>
    %216 = vector.broadcast %215 : vector<1x128xf32> to vector<2x128xf32>
    %217 = arith.addf %213, %216 : vector<2x128xf32>
    %c2 = arith.constant 2 : index
    %c0_100 = arith.constant 0 : index
    %c0_101 = arith.constant 0 : index
    %218 = vector.load %arg0[%c2, %c0_100, %c0_101] : memref<4x2x128xf32, #tpu.memory_space<vmem>>, vector<1x2x128xf32>
    %219 = vector.shape_cast %218 : vector<1x2x128xf32> to vector<2x128xf32>
    %220 = arith.addf %217, %219 : vector<2x128xf32>
    %221 = vector.extract_strided_slice %220 {offsets = [0, 0], sizes = [2, 96], strides = [1, 1]} : vector<2x128xf32> to vector<2x96xf32>
    %222 = arith.negf %221 : vector<2x96xf32>
    %223 = math.exp %222 : vector<2x96xf32>
    %cst_102 = arith.constant 1.000000e+00 : f32
    %224 = vector.broadcast %cst_102 : f32 to vector<2x96xf32>
    %225 = arith.addf %224, %223 : vector<2x96xf32>
    %226 = arith.divf %224, %225 : vector<2x96xf32>
    %227 = vector.extract_strided_slice %226 {offsets = [0, 0], sizes = [2, 32], strides = [1, 1]} : vector<2x96xf32> to vector<2x32xf32>
    %228 = vector.extract_strided_slice %226 {offsets = [0, 32], sizes = [2, 32], strides = [1, 1]} : vector<2x96xf32> to vector<2x32xf32>
    %229 = vector.extract_strided_slice %226 {offsets = [0, 64], sizes = [2, 32], strides = [1, 1]} : vector<2x96xf32> to vector<2x32xf32>
    %230 = vector.extract_strided_slice %220 {offsets = [0, 96], sizes = [2, 32], strides = [1, 1]} : vector<2x128xf32> to vector<2x32xf32>
    %231 = math.tanh %230 : vector<2x32xf32>
    %232 = arith.mulf %228, %148 : vector<2x32xf32>
    %233 = arith.mulf %227, %231 : vector<2x32xf32>
    %234 = arith.addf %232, %233 : vector<2x32xf32>
    %235 = math.tanh %234 : vector<2x32xf32>
    %236 = arith.mulf %229, %235 : vector<2x32xf32>
    %c1_103 = arith.constant 1 : index
    %c0_104 = arith.constant 0 : index
    %c0_105 = arith.constant 0 : index
    %237 = vector.load %arg7[%c1_103, %c0_104, %c0_105] : memref<2x64x128xf32, #tpu.memory_space<vmem>>, vector<1x64x128xf32>
    %238 = vector.shape_cast %237 : vector<1x64x128xf32> to vector<64x128xf32>
    %239 = vector.extract_strided_slice %238 {offsets = [0, 0], sizes = [32, 128], strides = [1, 1]} : vector<64x128xf32> to vector<32x128xf32>
    %cst_106 = arith.constant dense<0.000000e+00> : vector<2x128xf32>
    %240 = tpu.matmul %236, %239, %cst_106 {dimension_numbers = #tpu.dot_dimension_numbers<[1], [0], [0], [1], [0, 0, 1, 1], [], []>} : vector<2x32xf32>, vector<32x128xf32>, vector<2x128xf32> -> vector<2x128xf32>
    %241 = vector.extract_strided_slice %238 {offsets = [32, 0], sizes = [32, 128], strides = [1, 1]} : vector<64x128xf32> to vector<32x128xf32>
    %cst_107 = arith.constant dense<0.000000e+00> : vector<2x128xf32>
    %242 = tpu.matmul %177, %241, %cst_107 {dimension_numbers = #tpu.dot_dimension_numbers<[1], [0], [0], [1], [0, 0, 1, 1], [], []>} : vector<2x32xf32>, vector<32x128xf32>, vector<2x128xf32> -> vector<2x128xf32>
    %243 = arith.addf %240, %242 : vector<2x128xf32>
    %c1_108 = arith.constant 1 : index
    %c0_109 = arith.constant 0 : index
    %c0_110 = arith.constant 0 : index
    %244 = vector.load %arg8[%c1_108, %c0_109, %c0_110] : memref<2x1x128xf32, #tpu.memory_space<vmem>>, vector<1x1x128xf32>
    %245 = vector.shape_cast %244 : vector<1x1x128xf32> to vector<1x128xf32>
    %246 = vector.broadcast %245 : vector<1x128xf32> to vector<2x128xf32>
    %247 = arith.addf %243, %246 : vector<2x128xf32>
    %248 = vector.extract_strided_slice %247 {offsets = [0, 0], sizes = [2, 96], strides = [1, 1]} : vector<2x128xf32> to vector<2x96xf32>
    %249 = arith.negf %248 : vector<2x96xf32>
    %250 = math.exp %249 : vector<2x96xf32>
    %cst_111 = arith.constant 1.000000e+00 : f32
    %251 = vector.broadcast %cst_111 : f32 to vector<2x96xf32>
    %252 = arith.addf %251, %250 : vector<2x96xf32>
    %253 = arith.divf %251, %252 : vector<2x96xf32>
    %254 = vector.extract_strided_slice %253 {offsets = [0, 0], sizes = [2, 32], strides = [1, 1]} : vector<2x96xf32> to vector<2x32xf32>
    %255 = vector.extract_strided_slice %253 {offsets = [0, 32], sizes = [2, 32], strides = [1, 1]} : vector<2x96xf32> to vector<2x32xf32>
    %256 = vector.extract_strided_slice %253 {offsets = [0, 64], sizes = [2, 32], strides = [1, 1]} : vector<2x96xf32> to vector<2x32xf32>
    %257 = vector.extract_strided_slice %247 {offsets = [0, 96], sizes = [2, 32], strides = [1, 1]} : vector<2x128xf32> to vector<2x32xf32>
    %258 = math.tanh %257 : vector<2x32xf32>
    %259 = arith.mulf %255, %175 : vector<2x32xf32>
    %260 = arith.mulf %254, %258 : vector<2x32xf32>
    %261 = arith.addf %259, %260 : vector<2x32xf32>
    %262 = math.tanh %261 : vector<2x32xf32>
    %263 = arith.mulf %256, %262 : vector<2x32xf32>
    %c0_112 = arith.constant 0 : index
    %c0_113 = arith.constant 0 : index
    %264 = vector.load %arg9[%c0_112, %c0_113] : memref<32x128xf32, #tpu.memory_space<vmem>>, vector<32x128xf32>
    %cst_114 = arith.constant dense<0.000000e+00> : vector<2x128xf32>
    %265 = tpu.matmul %263, %264, %cst_114 {dimension_numbers = #tpu.dot_dimension_numbers<[1], [0], [0], [1], [0, 0, 1, 1], [], []>} : vector<2x32xf32>, vector<32x128xf32>, vector<2x128xf32> -> vector<2x128xf32>
    %c0_115 = arith.constant 0 : index
    %c0_116 = arith.constant 0 : index
    %266 = vector.load %arg10[%c0_115, %c0_116] : memref<1x128xf32, #tpu.memory_space<vmem>>, vector<1x128xf32>
    %267 = vector.broadcast %266 : vector<1x128xf32> to vector<2x128xf32>
    %268 = arith.addf %265, %267 : vector<2x128xf32>
    %c2_117 = arith.constant 2 : index
    %c0_118 = arith.constant 0 : index
    %c0_119 = arith.constant 0 : index
    %269 = vector.load %arg11[%c2_117, %c0_118, %c0_119] : memref<4x2x128xf32, #tpu.memory_space<vmem>>, vector<1x2x128xf32>
    %270 = vector.shape_cast %269 : vector<1x2x128xf32> to vector<2x128xf32>
    %271 = vector.shape_cast %268 : vector<2x128xf32> to vector<1x2x128xf32>
    tpu.vector_store %arg11[%c2_117, %c0_118, %c0_119], %271 {strides = array<i32>} : memref<4x2x128xf32, #tpu.memory_space<vmem>>, vector<1x2x128xf32>,
    %272 = vector.broadcast %5 : vector<1x32xf32> to vector<2x32xf32>
    %273 = arith.mulf %263, %272 : vector<2x32xf32>
    %cst_120 = arith.constant dense<0.000000e+00> : vector<2xf32>
    %274 = vector.multi_reduction <add>, %273, %cst_120 [1] : vector<2x32xf32> to vector<2xf32>
    %275 = vector.shape_cast %274 : vector<2xf32> to vector<2x1xf32>
    %276 = vector.broadcast %275 : vector<2x1xf32> to vector<2x8xf32>
    %277 = arith.addf %276, %1 : vector<2x8xf32>
    %cst_121 = arith.constant -1.000000e+06 : f32
    %278 = vector.broadcast %cst_121 : f32 to vector<2x8xf32>
    %279 = arith.select %4, %277, %278 : vector<2x8xi1>, vector<2x8xf32>
    %cst_122 = arith.constant dense<0xFF800000> : vector<2xf32>
    %280 = vector.multi_reduction <maximumf>, %279, %cst_122 [1] : vector<2x8xf32> to vector<2xf32>
    %281 = vector.shape_cast %280 : vector<2xf32> to vector<2x1xf32>
    %282 = vector.broadcast %281 : vector<2x1xf32> to vector<2x8xf32>
    %283 = arith.subf %279, %282 : vector<2x8xf32>
    %284 = math.exp %283 : vector<2x8xf32>
    %cst_123 = arith.constant dense<0.000000e+00> : vector<2xf32>
    %285 = vector.multi_reduction <add>, %284, %cst_123 [1] : vector<2x8xf32> to vector<2xf32>
    %286 = vector.shape_cast %285 : vector<2xf32> to vector<2x1xf32>
    %287 = vector.broadcast %286 : vector<2x1xf32> to vector<2x8xf32>
    %288 = arith.divf %284, %287 : vector<2x8xf32>
    %289 = vector.shape_cast %288 : vector<2x8xf32> to vector<2x8x1xf32>
    %290 = vector.broadcast %289 : vector<2x8x1xf32> to vector<2x8x32xf32>
    %291 = arith.mulf %290, %0 : vector<2x8x32xf32>
    %cst_124 = arith.constant dense<0.000000e+00> : vector<2x32xf32>
    %292 = vector.multi_reduction <add>, %291, %cst_124 [1] : vector<2x8x32xf32> to vector<2x32xf32>
    %c0_125 = arith.constant 0 : index
    %c0_126 = arith.constant 0 : index
    %c0_127 = arith.constant 0 : index
    %293 = vector.load %arg7[%c0_125, %c0_126, %c0_127] : memref<2x64x128xf32, #tpu.memory_space<vmem>>, vector<1x64x128xf32>
    %294 = vector.shape_cast %293 : vector<1x64x128xf32> to vector<64x128xf32>
    %295 = vector.extract_strided_slice %294 {offsets = [0, 0], sizes = [32, 128], strides = [1, 1]} : vector<64x128xf32> to vector<32x128xf32>
    %cst_128 = arith.constant dense<0.000000e+00> : vector<2x128xf32>
    %296 = tpu.matmul %292, %295, %cst_128 {dimension_numbers = #tpu.dot_dimension_numbers<[1], [0], [0], [1], [0, 0, 1, 1], [], []>} : vector<2x32xf32>, vector<32x128xf32>, vector<2x128xf32> -> vector<2x128xf32>
    %297 = vector.extract_strided_slice %294 {offsets = [32, 0], sizes = [32, 128], strides = [1, 1]} : vector<64x128xf32> to vector<32x128xf32>
    %cst_129 = arith.constant dense<0.000000e+00> : vector<2x128xf32>
    %298 = tpu.matmul %236, %297, %cst_129 {dimension_numbers = #tpu.dot_dimension_numbers<[1], [0], [0], [1], [0, 0, 1, 1], [], []>} : vector<2x32xf32>, vector<32x128xf32>, vector<2x128xf32> -> vector<2x128xf32>
    %299 = arith.addf %296, %298 : vector<2x128xf32>
    %c0_130 = arith.constant 0 : index
    %c0_131 = arith.constant 0 : index
    %c0_132 = arith.constant 0 : index
    %300 = vector.load %arg8[%c0_130, %c0_131, %c0_132] : memref<2x1x128xf32, #tpu.memory_space<vmem>>, vector<1x1x128xf32>
    %301 = vector.shape_cast %300 : vector<1x1x128xf32> to vector<1x128xf32>
    %302 = vector.broadcast %301 : vector<1x128xf32> to vector<2x128xf32>
    %303 = arith.addf %299, %302 : vector<2x128xf32>
    %c3 = arith.constant 3 : index
    %c0_133 = arith.constant 0 : index
    %c0_134 = arith.constant 0 : index
    %304 = vector.load %arg0[%c3, %c0_133, %c0_134] : memref<4x2x128xf32, #tpu.memory_space<vmem>>, vector<1x2x128xf32>
    %305 = vector.shape_cast %304 : vector<1x2x128xf32> to vector<2x128xf32>
    %306 = arith.addf %303, %305 : vector<2x128xf32>
    %307 = vector.extract_strided_slice %306 {offsets = [0, 0], sizes = [2, 96], strides = [1, 1]} : vector<2x128xf32> to vector<2x96xf32>
    %308 = arith.negf %307 : vector<2x96xf32>
    %309 = math.exp %308 : vector<2x96xf32>
    %cst_135 = arith.constant 1.000000e+00 : f32
    %310 = vector.broadcast %cst_135 : f32 to vector<2x96xf32>
    %311 = arith.addf %310, %309 : vector<2x96xf32>
    %312 = arith.divf %310, %311 : vector<2x96xf32>
    %313 = vector.extract_strided_slice %312 {offsets = [0, 0], sizes = [2, 32], strides = [1, 1]} : vector<2x96xf32> to vector<2x32xf32>
    %314 = vector.extract_strided_slice %312 {offsets = [0, 32], sizes = [2, 32], strides = [1, 1]} : vector<2x96xf32> to vector<2x32xf32>
    %315 = vector.extract_strided_slice %312 {offsets = [0, 64], sizes = [2, 32], strides = [1, 1]} : vector<2x96xf32> to vector<2x32xf32>
    %316 = vector.extract_strided_slice %306 {offsets = [0, 96], sizes = [2, 32], strides = [1, 1]} : vector<2x128xf32> to vector<2x32xf32>
    %317 = math.tanh %316 : vector<2x32xf32>
    %318 = arith.mulf %314, %234 : vector<2x32xf32>
    %319 = arith.mulf %313, %317 : vector<2x32xf32>
    %320 = arith.addf %318, %319 : vector<2x32xf32>
    %321 = math.tanh %320 : vector<2x32xf32>
    %322 = arith.mulf %315, %321 : vector<2x32xf32>
    %c1_136 = arith.constant 1 : index
    %c0_137 = arith.constant 0 : index
    %c0_138 = arith.constant 0 : index
    %323 = vector.load %arg7[%c1_136, %c0_137, %c0_138] : memref<2x64x128xf32, #tpu.memory_space<vmem>>, vector<1x64x128xf32>
    %324 = vector.shape_cast %323 : vector<1x64x128xf32> to vector<64x128xf32>
    %325 = vector.extract_strided_slice %324 {offsets = [0, 0], sizes = [32, 128], strides = [1, 1]} : vector<64x128xf32> to vector<32x128xf32>
    %cst_139 = arith.constant dense<0.000000e+00> : vector<2x128xf32>
    %326 = tpu.matmul %322, %325, %cst_139 {dimension_numbers = #tpu.dot_dimension_numbers<[1], [0], [0], [1], [0, 0, 1, 1], [], []>} : vector<2x32xf32>, vector<32x128xf32>, vector<2x128xf32> -> vector<2x128xf32>
    %327 = vector.extract_strided_slice %324 {offsets = [32, 0], sizes = [32, 128], strides = [1, 1]} : vector<64x128xf32> to vector<32x128xf32>
    %cst_140 = arith.constant dense<0.000000e+00> : vector<2x128xf32>
    %328 = tpu.matmul %263, %327, %cst_140 {dimension_numbers = #tpu.dot_dimension_numbers<[1], [0], [0], [1], [0, 0, 1, 1], [], []>} : vector<2x32xf32>, vector<32x128xf32>, vector<2x128xf32> -> vector<2x128xf32>
    %329 = arith.addf %326, %328 : vector<2x128xf32>
    %c1_141 = arith.constant 1 : index
    %c0_142 = arith.constant 0 : index
    %c0_143 = arith.constant 0 : index
    %330 = vector.load %arg8[%c1_141, %c0_142, %c0_143] : memref<2x1x128xf32, #tpu.memory_space<vmem>>, vector<1x1x128xf32>
    %331 = vector.shape_cast %330 : vector<1x1x128xf32> to vector<1x128xf32>
    %332 = vector.broadcast %331 : vector<1x128xf32> to vector<2x128xf32>
    %333 = arith.addf %329, %332 : vector<2x128xf32>
    %334 = vector.extract_strided_slice %333 {offsets = [0, 0], sizes = [2, 96], strides = [1, 1]} : vector<2x128xf32> to vector<2x96xf32>
    %335 = arith.negf %334 : vector<2x96xf32>
    %336 = math.exp %335 : vector<2x96xf32>
    %cst_144 = arith.constant 1.000000e+00 : f32
    %337 = vector.broadcast %cst_144 : f32 to vector<2x96xf32>
    %338 = arith.addf %337, %336 : vector<2x96xf32>
    %339 = arith.divf %337, %338 : vector<2x96xf32>
    %340 = vector.extract_strided_slice %339 {offsets = [0, 0], sizes = [2, 32], strides = [1, 1]} : vector<2x96xf32> to vector<2x32xf32>
    %341 = vector.extract_strided_slice %339 {offsets = [0, 32], sizes = [2, 32], strides = [1, 1]} : vector<2x96xf32> to vector<2x32xf32>
    %342 = vector.extract_strided_slice %339 {offsets = [0, 64], sizes = [2, 32], strides = [1, 1]} : vector<2x96xf32> to vector<2x32xf32>
    %343 = vector.extract_strided_slice %333 {offsets = [0, 96], sizes = [2, 32], strides = [1, 1]} : vector<2x128xf32> to vector<2x32xf32>
    %344 = math.tanh %343 : vector<2x32xf32>
    %345 = arith.mulf %341, %261 : vector<2x32xf32>
    %346 = arith.mulf %340, %344 : vector<2x32xf32>
    %347 = arith.addf %345, %346 : vector<2x32xf32>
    %348 = math.tanh %347 : vector<2x32xf32>
    %349 = arith.mulf %342, %348 : vector<2x32xf32>
    %c0_145 = arith.constant 0 : index
    %c0_146 = arith.constant 0 : index
    %350 = vector.load %arg9[%c0_145, %c0_146] : memref<32x128xf32, #tpu.memory_space<vmem>>, vector<32x128xf32>
    %cst_147 = arith.constant dense<0.000000e+00> : vector<2x128xf32>
    %351 = tpu.matmul %349, %350, %cst_147 {dimension_numbers = #tpu.dot_dimension_numbers<[1], [0], [0], [1], [0, 0, 1, 1], [], []>} : vector<2x32xf32>, vector<32x128xf32>, vector<2x128xf32> -> vector<2x128xf32>
    %c0_148 = arith.constant 0 : index
    %c0_149 = arith.constant 0 : index
    %352 = vector.load %arg10[%c0_148, %c0_149] : memref<1x128xf32, #tpu.memory_space<vmem>>, vector<1x128xf32>
    %353 = vector.broadcast %352 : vector<1x128xf32> to vector<2x128xf32>
    %354 = arith.addf %351, %353 : vector<2x128xf32>
    %c3_150 = arith.constant 3 : index
    %c0_151 = arith.constant 0 : index
    %c0_152 = arith.constant 0 : index
    %355 = vector.load %arg11[%c3_150, %c0_151, %c0_152] : memref<4x2x128xf32, #tpu.memory_space<vmem>>, vector<1x2x128xf32>
    %356 = vector.shape_cast %355 : vector<1x2x128xf32> to vector<2x128xf32>
    %357 = vector.shape_cast %354 : vector<2x128xf32> to vector<1x2x128xf32>
    tpu.vector_store %arg11[%c3_150, %c0_151, %c0_152], %357 {strides = array<i32>} : memref<4x2x128xf32, #tpu.memory_space<vmem>>, vector<1x2x128xf32>,
    %c0_153 = arith.constant 0 : index
    %c0_154 = arith.constant 0 : index
    %c0_155 = arith.constant 0 : index
    %358 = vector.load %arg12[%c0_153, %c0_154, %c0_155] : memref<2x2x32xf32, #tpu.memory_space<vmem>>, vector<1x2x32xf32>
    %359 = vector.shape_cast %358 : vector<1x2x32xf32> to vector<2x32xf32>
    %360 = vector.shape_cast %322 : vector<2x32xf32> to vector<1x2x32xf32>
    tpu.vector_store %arg12[%c0_153, %c0_154, %c0_155], %360 {strides = array<i32>} : memref<2x2x32xf32, #tpu.memory_space<vmem>>, vector<1x2x32xf32>,
    %c0_156 = arith.constant 0 : index
    %c0_157 = arith.constant 0 : index
    %c0_158 = arith.constant 0 : index
    %361 = vector.load %arg13[%c0_156, %c0_157, %c0_158] : memref<2x2x32xf32, #tpu.memory_space<vmem>>, vector<1x2x32xf32>
    %362 = vector.shape_cast %361 : vector<1x2x32xf32> to vector<2x32xf32>
    %363 = vector.shape_cast %320 : vector<2x32xf32> to vector<1x2x32xf32>
    tpu.vector_store %arg13[%c0_156, %c0_157, %c0_158], %363 {strides = array<i32>} : memref<2x2x32xf32, #tpu.memory_space<vmem>>, vector<1x2x32xf32>,
    %c1_159 = arith.constant 1 : index
    %c0_160 = arith.constant 0 : index
    %c0_161 = arith.constant 0 : index
    %364 = vector.load %arg12[%c1_159, %c0_160, %c0_161] : memref<2x2x32xf32, #tpu.memory_space<vmem>>, vector<1x2x32xf32>
    %365 = vector.shape_cast %364 : vector<1x2x32xf32> to vector<2x32xf32>
    %366 = vector.shape_cast %349 : vector<2x32xf32> to vector<1x2x32xf32>
    tpu.vector_store %arg12[%c1_159, %c0_160, %c0_161], %366 {strides = array<i32>} : memref<2x2x32xf32, #tpu.memory_space<vmem>>, vector<1x2x32xf32>,
    %c1_162 = arith.constant 1 : index
    %c0_163 = arith.constant 0 : index
    %c0_164 = arith.constant 0 : index
    %367 = vector.load %arg13[%c1_162, %c0_163, %c0_164] : memref<2x2x32xf32, #tpu.memory_space<vmem>>, vector<1x2x32xf32>
    %368 = vector.shape_cast %367 : vector<1x2x32xf32> to vector<2x32xf32>
    %369 = vector.shape_cast %347 : vector<2x32xf32> to vector<1x2x32xf32>
    tpu.vector_store %arg13[%c1_162, %c0_163, %c0_164], %369 {strides = array<i32>} : memref<2x2x32xf32, #tpu.memory_space<vmem>>, vector<1x2x32xf32>,
    return
  }
}

</mosaic_0001>

<bundles_post_ra>
// kernel: tpu_custom_call.1
= control target key start
LH: loop header
LB: loop body
LE: loop exit
PB: predicated region body
PF: predicated region fallthrough
CT: control target
= control target key end

     0   :  { %19 = vsyncpa [#allocation3], 0  ;;  %s3183_s0 = inlined_call_operand.hbm [shape: f32[4,2,128], index: 0, kind: input, shape index: {}]   ;;  %s3184_s1 = inlined_call_operand.vmem [shape: f32[2,8], index: 1, kind: input, shape index: {}]   ;;  %s3185_s2 = inlined_call_operand.hbm [shape: f32[2,8], index: 2, kind: input, shape index: {}]   ;;  %s3186_s3 = inlined_call_operand.hbm [shape: f32[2,8,32], index: 3, kind: input, shape index: {}]   ;;  %s3187_s4 = inlined_call_operand.hbm [shape: f32[2,2,32], index: 4, kind: input, shape index: {}]   ;;  %s3188_s5 = inlined_call_operand.hbm [shape: f32[2,2,32], index: 5, kind: input, shape index: {}]   ;;  %s3189_s6 = inlined_call_operand.hbm [shape: f32[1,32], index: 6, kind: input, shape index: {}]   ;;  %s3190_s7 = inlined_call_operand.hbm [shape: f32[2,64,128], index: 7, kind: input, shape index: {}]   ;;  %s3191_s8 = inlined_call_operand.hbm [shape: f32[2,1,128], index: 8, kind: input, shape index: {}]   ;;  %s3192_s9 = inlined_call_operand.vmem [shape: f32[32,128], index: 9, kind: input, shape index: {}]   ;;  %s3193_s10 = inlined_call_operand.vmem [shape: f32[1,128], index: 10, kind: input, shape index: {}]   ;;  %s3194_s11 = inlined_call_operand.hbm [shape: f32[4,2,128], index: 11, kind: output, shape index: {0}]   ;;  %s3195_s12 = inlined_call_operand.hbm [shape: f32[2,2,32], index: 12, kind: output, shape index: {1}]   ;;  %s3196_s13 = inlined_call_operand.hbm [shape: f32[2,2,32], index: 13, kind: output, shape index: {2}]  }
   0x1   :  { %20 = vsyncpa [#allocation6], 0 }
   0x2   :  { %21 = vsyncpa [#allocation9], 0 }
   0x3   :  { %22 = vsyncpa [#allocation12], 0 }
   0x4   :  { %23 = vsyncpa [#allocation15], 0 }
   0x5   :  { %24 = vsyncpa [#allocation4], 0 }
   0x6   :  { %25 = vsyncpa [#allocation18], 0  ;;  %s2574_s25 = smov [#allocation5]   ;;  %s2318_s29 = scalar_lea.hbm %s3185_s2, 32 }
   0x7   :  { %s46_s26 = sshll.u32 %s2574_s25, 4  ;;  %p2319_p0 = scmp.ne.s32.totalorder %s3185_s2, %s2318_s29  ;;  %s47_s26 = int_to_ptr.vmem [resolvable:$true] %s46_s26 }
   0x8   :  { %p2322_p1 = scmp.lt.u32.totalorder %s2318_s29, %s3185_s2 }
   0xa   :  { %p2324_p2 = pnand %p2322_p1, %p2319_p0 }
   0xc   :  { %2327 = shalt.err (!%p2324_p2)
}
   0xd   :  { %s2328_s17 = scalar_lea.vmem %s47_s26, 32  ;;  %p2333_p4 = scmp.lt.s32.totalorder %s47_s26, %s47_s26 }
   0xe   :  { %p2329_p3 = scmp.ne.s32.totalorder %s47_s26, %s2328_s17  ;;  %p2334_p5 = scmp.lt.s32.totalorder %s2328_s17, %s2328_s17 }
  0x10   :  { %p2335_p6 = por %p2334_p5, %p2333_p4 }
  0x12   :  { %p2336_p7 = pnand %p2335_p6, %p2329_p3 }
  0x14   :  { %2339 = shalt.err (!%p2336_p7)
}
  0x15   :  { %49 = dma.hbm_to_vmem [thread:$0]  %s3185_s2, 32, %s47_s26, [#allocation6]  }
  0x16   :  { %s2575_s20 = smov [#allocation8]   ;;  %s2576_s22 = smov [#allocation11]  }
  0x17   :  { %s67_s21 = sshll.u32 %s2575_s20, 4  ;;  %s92_s23 = sshll.u32 %s2576_s22, 4  ;;  %s68_s21 = int_to_ptr.vmem [resolvable:$true] %s67_s21  ;;  %s93_s23 = int_to_ptr.vmem [resolvable:$true] %s92_s23 }
  0x18   :  { %s2340_s27 = scalar_lea.hbm %s3187_s4, 64 }
  0x19   :  { %p2341_p8 = scmp.ne.s32.totalorder %s3187_s4, %s2340_s27  ;;  %p2344_p9 = scmp.lt.u32.totalorder %s2340_s27, %s3187_s4 }
  0x1b   :  { %p2346_p10 = pnand %p2344_p9, %p2341_p8 }
  0x1d   :  { %2349 = shalt.err (!%p2346_p10)
}
  0x1e   :  { %s2350_s2 = scalar_lea.vmem %s68_s21, 64  ;;  %p2355_p12 = scmp.lt.s32.totalorder %s68_s21, %s68_s21 }
  0x1f   :  { %p2351_p11 = scmp.ne.s32.totalorder %s68_s21, %s2350_s2  ;;  %p2356_p13 = scmp.lt.s32.totalorder %s2350_s2, %s2350_s2 }
  0x21   :  { %p2357_p0 = por %p2356_p13, %p2355_p12 }
  0x23   :  { %p2358_p1 = pnand %p2357_p0, %p2351_p11 }
  0x25   :  { %2361 = shalt.err (!%p2358_p1)
}
  0x26   :  { %s2577_s26 = smov 32   ;;  %s2578_s15 = smov 2  }
  0x27   :  { %73 = dma.hbm_to_vmem [thread:$0]  %s3187_s4, 64, %s68_s21, [#allocation9], %s2577_s26, %s2577_s26, %s2578_s15  }
  0x28   :  { %s2362_s20 = scalar_lea.hbm %s3189_s6, 16 }
  0x29   :  { %p2363_p2 = scmp.ne.s32.totalorder %s3189_s6, %s2362_s20  ;;  %p2366_p3 = scmp.lt.u32.totalorder %s2362_s20, %s3189_s6 }
  0x2b   :  { %p2368_p4 = pnand %p2366_p3, %p2363_p2 }
  0x2d   :  { %2371 = shalt.err (!%p2368_p4)
}
  0x2e   :  { %s2372_s28 = scalar_lea.vmem %s93_s23, 16  ;;  %s2376_s29 = scalar_lea.vmem %s93_s23, 32 }
  0x2f   :  { %p2373_p5 = scmp.ne.s32.totalorder %s93_s23, %s2372_s28  ;;  %p2377_p6 = scmp.lt.s32.totalorder %s93_s23, %s93_s23 }
  0x30   :  { %p2378_p7 = scmp.lt.s32.totalorder %s2376_s29, %s2372_s28 }
  0x32   :  { %p2379_p8 = por %p2378_p7, %p2377_p6 }
  0x34   :  { %p2380_p9 = pnand %p2379_p8, %p2373_p5 }
  0x36   :  { %2383 = shalt.err (!%p2380_p9)
}
  0x37   :  { %95 = dma.hbm_to_vmem [thread:$0]  %s3189_s6, 16, %s93_s23, [#allocation12]  }
  0x38   :  { %s2579_s30 = smov [#allocation2]   ;;  %s2580_s2 = smov [#allocation7]  }
  0x39   :  { %s31_s14 = sshll.u32 %s2579_s30, 4  ;;  %s55_s16 = sshll.u32 %s2580_s2, 4  ;;  %s32_s14 = int_to_ptr.vmem [resolvable:$true] %s31_s14  ;;  %s56_s16 = int_to_ptr.vmem [resolvable:$true] %s55_s16 }
  0x3a   :  { %s2384_s19 = scalar_lea.hbm %s3183_s0, 128 }
  0x3b   :  { %p2385_p10 = scmp.ne.s32.totalorder %s3183_s0, %s2384_s19  ;;  %p2388_p11 = scmp.lt.u32.totalorder %s2384_s19, %s3183_s0 }
  0x3d   :  { %p2390_p12 = pnand %p2388_p11, %p2385_p10 }
  0x3f   :  { %2393 = shalt.err (!%p2390_p12)
}
  0x40   :  { %s2394_s6 = scalar_lea.vmem %s32_s14, 128  ;;  %p2399_p0 = scmp.lt.s32.totalorder %s32_s14, %s32_s14 }
  0x41   :  { %p2395_p13 = scmp.ne.s32.totalorder %s32_s14, %s2394_s6  ;;  %p2400_p1 = scmp.lt.s32.totalorder %s2394_s6, %s2394_s6 }
  0x43   :  { %p2401_p2 = por %p2400_p1, %p2399_p0 }
  0x45   :  { %p2402_p3 = pnand %p2401_p2, %p2395_p13 }
  0x47   :  { %2405 = shalt.err (!%p2402_p3)
}
  0x48   :  { %37 = dma.hbm_to_vmem [thread:$0]  %s3183_s0, 128, %s32_s14, [#allocation3], %s2577_s26, %s2577_s26, %s2578_s15  }
  0x49   :  { %s2406_s4 = scalar_lea.hbm %s3186_s3, 256 }
  0x4a   :  { %p2407_p4 = scmp.ne.s32.totalorder %s3186_s3, %s2406_s4  ;;  %p2410_p5 = scmp.lt.u32.totalorder %s2406_s4, %s3186_s3 }
  0x4c   :  { %p2412_p6 = pnand %p2410_p5, %p2407_p4 }
  0x4e   :  { %2415 = shalt.err (!%p2412_p6)
}
  0x4f   :  { %s2416_s18 = scalar_lea.vmem %s56_s16, 256  ;;  %p2421_p8 = scmp.lt.s32.totalorder %s56_s16, %s56_s16 }
  0x50   :  { %p2417_p7 = scmp.ne.s32.totalorder %s56_s16, %s2416_s18  ;;  %p2422_p9 = scmp.lt.s32.totalorder %s2416_s18, %s2416_s18 }
  0x52   :  { %p2423_p10 = por %p2422_p9, %p2421_p8 }
  0x54   :  { %p2424_p11 = pnand %p2423_p10, %p2417_p7 }
  0x56   :  { %2427 = shalt.err (!%p2424_p11)
}
  0x57   :  { %s2581_s0 = smov 128   ;;  %s2582_s14 = smov 8  }
  0x58   :  { %61 = dma.hbm_to_vmem [thread:$0]  %s3186_s3, 256, %s56_s16, [#allocation6], %s2581_s0, %s2581_s0, %s2582_s14  }
  0x59   :  { %s2583_s22 = smov [#allocation10]   ;;  %s2584_s25 = smov [#allocation13]  }
  0x5a   :  { %s79_s24 = sshll.u32 %s2583_s22, 4  ;;  %s101_s6 = sshll.u32 %s2584_s25, 4  ;;  %s80_s24 = int_to_ptr.vmem [resolvable:$true] %s79_s24  ;;  %s102_s6 = int_to_ptr.vmem [resolvable:$true] %s101_s6 }
  0x5b   :  { %s2428_s28 = scalar_lea.hbm %s3188_s5, 64 }
  0x5c   :  { %p2429_p12 = scmp.ne.s32.totalorder %s3188_s5, %s2428_s28  ;;  %p2432_p13 = scmp.lt.u32.totalorder %s2428_s28, %s3188_s5 }
  0x5e   :  { %p2434_p0 = pnand %p2432_p13, %p2429_p12 }
  0x60   :  { %2437 = shalt.err (!%p2434_p0)
}
  0x61   :  { %s2438_s3 = scalar_lea.vmem %s80_s24, 64  ;;  %p2443_p2 = scmp.lt.s32.totalorder %s80_s24, %s80_s24 }
  0x62   :  { %p2439_p1 = scmp.ne.s32.totalorder %s80_s24, %s2438_s3  ;;  %p2444_p3 = scmp.lt.s32.totalorder %s2438_s3, %s2438_s3 }
  0x64   :  { %p2445_p4 = por %p2444_p3, %p2443_p2 }
  0x66   :  { %p2446_p5 = pnand %p2445_p4, %p2439_p1 }
  0x68   :  { %2449 = shalt.err (!%p2446_p5)
}
  0x69   :  { %85 = dma.hbm_to_vmem [thread:$0]  %s3188_s5, 64, %s80_s24, [#allocation9], %s2577_s26, %s2577_s26, %s2578_s15  }
  0x6a   :  { %s2450_s19 = scalar_lea.hbm %s3190_s7, 2048 }
  0x6b   :  { %p2451_p6 = scmp.ne.s32.totalorder %s3190_s7, %s2450_s19  ;;  %p2454_p7 = scmp.lt.u32.totalorder %s2450_s19, %s3190_s7 }
  0x6d   :  { %p2456_p8 = pnand %p2454_p7, %p2451_p6 }
  0x6f   :  { %2459 = shalt.err (!%p2456_p8)
}
  0x70   :  { %s2460_s27 = scalar_lea.vmem %s102_s6, 2048  ;;  %p2465_p10 = scmp.lt.s32.totalorder %s102_s6, %s102_s6 }
  0x71   :  { %p2461_p9 = scmp.ne.s32.totalorder %s102_s6, %s2460_s27  ;;  %p2466_p11 = scmp.lt.s32.totalorder %s2460_s27, %s2460_s27 }
  0x73   :  { %p2467_p12 = por %p2466_p11, %p2465_p10 }
  0x75   :  { %p2468_p13 = pnand %p2467_p12, %p2461_p9 }
  0x77   :  { %2471 = shalt.err (!%p2468_p13)
}
  0x78   :  { %107 = dma.hbm_to_vmem [thread:$0]  %s3190_s7, 2048, %s102_s6, [#allocation12], %s2581_s0, %s2581_s0, %s2582_s14  }
  0x79   :  { %s2585_s28 = smov [#allocation14]   ;;  %s2472_s30 = scalar_lea.hbm %s3191_s8, 32 }
  0x7a   :  { %s113_s29 = sshll.u32 %s2585_s28, 4  ;;  %p2473_p0 = scmp.ne.s32.totalorder %s3191_s8, %s2472_s30  ;;  %s114_s29 = int_to_ptr.vmem [resolvable:$true] %s113_s29 }
  0x7b   :  { %p2476_p1 = scmp.lt.u32.totalorder %s2472_s30, %s3191_s8 }
  0x7d   :  { %p2478_p2 = pnand %p2476_p1, %p2473_p0 }
  0x7f   :  { %2481 = shalt.err (!%p2478_p2)
}
  0x80   :  { %s2482_s18 = scalar_lea.vmem %s114_s29, 32  ;;  %p2487_p4 = scmp.lt.s32.totalorder %s114_s29, %s114_s29 }
  0x81   :  { %p2483_p3 = scmp.ne.s32.totalorder %s114_s29, %s2482_s18  ;;  %p2488_p5 = scmp.lt.s32.totalorder %s2482_s18, %s2482_s18 }
  0x83   :  { %p2489_p6 = por %p2488_p5, %p2487_p4 }
  0x85   :  { %p2490_p7 = pnand %p2489_p6, %p2483_p3 }
  0x87   :  { %2493 = shalt.err (!%p2490_p7)
}
  0x88   :  { %s2586_s7 = smov 16   ;;  %s2587_s0 = smov 1  }
  0x89   :  { %119 = dma.hbm_to_vmem [thread:$0]  %s3191_s8, 32, %s114_s29, [#allocation15], %s2586_s7, %s2586_s7, %s2587_s0  }
  0x8a   :  { %2560 = dma.done.wait [#allocation3], 128  }
  0x8b   :  { %2561 = vsyncadd [#allocation3], 4294967168 }
  0x8c   :  { %2562 = dma.done.wait [#allocation6], 288  }
  0x8d   :  { %2563 = vsyncadd [#allocation6], 4294967008 }
  0x8e   :  { %2564 = dma.done.wait [#allocation9], 128  }
  0x8f   :  { %2565 = vsyncadd [#allocation9], 4294967168 }
  0x90   :  { %2566 = dma.done.wait [#allocation12], 2064  }
  0x91   :  { %2567 = vsyncadd [#allocation12], 4294965232 }
  0x92   :  { %2568 = dma.done.wait [#allocation15], 32  }
  0x93   :  { %2569 = vsyncadd [#allocation15], 4294967264  ;;  %v2777_v0 = vld [vmem:[#allocation11] ss:$0 sm:$0xff]  ;;  %v2779_v1 = vld [vmem:[#allocation8 + $0x2] sm:$0x3]  ;;  %v185_v16 = vlaneseq }
  0x94   :  { %vm167_vm0 = vcmask 254976   ;;  %v166_v2 = vmul.f32 %v2777_v0, %v2779_v1  ;;  %v2784_v4 = vld [vmem:[#allocation5] sm:$0x3]  ;;  %v2789_v5 = vld [vmem:[%s3184_s1] sm:$0x3]  ;;  %vm173_vm2 = vcmask 58368  }
  0x95   :  { %vm152_vm1 = vcmp.gt.f32.partialorder %v2784_v4, 0.5  ;;  %v226_v17 = vld [vmem:[#allocation13] sm:$0xff]  ;;  %v227_v18 = vld [vmem:[#allocation13 + $0x8] sm:$0xff]  ;;  %v2588_v19 = vmov 0.0|0.0   ;;  %v186_v21 = vshrl.u32 %v185_v16, 7  ;;  %v228_v22 = vld [vmem:[#allocation13 + $0x10] sm:$0xff] }
  0x96   :  { %v168_v3 = vsel %vm167_vm0, %v166_v2, 0.0  ;;  %2096 = vmatprep.subr.bf16.mxu0 %v2588_v19  ;;  %v2798_v20 = vpack.c.bf16 %v227_v18, %v226_v17  ;;  %2108 = vmatprep.subr.bf16.mxu1 %v2588_v19  ;;  %v229_v23 = vld [vmem:[#allocation13 + $0x18] sm:$0xff]  ;;  %v230_v27 = vld [vmem:[#allocation13 + $0x20] sm:$0xff]  ;;  %v231_v28 = vld [vmem:[#allocation13 + $0x28] sm:$0xff]  ;;  %vm2589_vm3 = vmmov 0   ;;  %v2590_v38 = vmov 0.0  }
  0x97   :  { %169 = vadd.xlane.f32.xlu0 %v168_v3  ;;  %v2803_v24 = vpack.c.bf16 %v229_v23, %v228_v22  ;;  %v2805_v25 = vsub.s32 1, %v186_v21  ;;  %v2807_v26 = vsub.s32 0, %v186_v21  ;;  %v2811_v30 = vpack.c.bf16 %v231_v28, %v230_v27  ;;  %v232_v34 = vld [vmem:[#allocation13 + $0x30] sm:$0xff]  ;;  %v233_v35 = vld [vmem:[#allocation13 + $0x38] sm:$0xff]  ;;  %1916 = vmatprep.mubr.msk.f32.mxu0 %vm2589_vm3, %v2590_v38  ;;  %v2828_v40 = vld [vmem:[#allocation7] sm:$0xff]  ;;  %s2591_s1 = smov 64  }
  0x98   :  { %2098 = vmatpush3.bf16.msra.mxu0 %v2798_v20  ;;  %v2817_v36 = vpack.c.bf16 %v233_v35, %v232_v34  ;;  %v154_v37 = vld [vmem:[#allocation8] sm:$0x3]  ;;  %1935 = vmatprep.mubr.msk.f32.mxu1 %vm2589_vm3, %v2590_v38  ;;  %v2826_v39 = vld [vmem:[#allocation7 + $0x8] sm:$0xff]  ;;  %vm201_vm4 = vcmask 261120   ;;  %vm218_vm5 = vcmask 1041409   ;;  %vm241_vm6 = vcmask 523264  }
  0x99   :  { %2099 = vmatprep.subr.bf16.mxu0 %v2588_v19  ;;  %v2839_v62 = vld [vmem:[#allocation14] ss:$0 sm:$0xff]  ;;  %v315_v2 = vld [vmem:[#allocation2] sm:$0x3]  ;;  %v356_v23 = vld [vmem:[#allocation13 + $0x48] sm:$0xff]  ;;  %s2592_s20 = smov 96  }
  0x9a   :  { %v355_v22 = vld [vmem:[#allocation13 + $0x40] sm:$0xff]  ;;  %v357_v27 = vld [vmem:[#allocation13 + $0x50] sm:$0xff] }
  0x9b   :  { %v2848_v28 = vpack.c.bf16 %v356_v23, %v355_v22  ;;  %v361_v35 = vld [vmem:[#allocation13 + $0x70] sm:$0xff] }
  0x9c   :  { %2101 = vmatpush3.bf16.msra.mxu0 %v2803_v24 }
  0x9d   :  { %2102 = vmatprep.subr.bf16.mxu0 %v2588_v19  ;;  %2110 = vmatpush3.bf16.msra.mxu1 %v2848_v28 }
  0x9e   :  { %2111 = vmatprep.subr.bf16.mxu1 %v2588_v19 }
  0xa0   :  { %2104 = vmatpush3.bf16.msra.mxu0 %v2811_v30 }
  0xa1   :  { %2105 = vmatprep.subr.bf16.mxu0 %v2588_v19 }
  0xa4   :  { %2107 = vmatpush3.bf16.msra.mxu0 %v2817_v36 }
  0xa5   :  { %2120 = vmatprep.subr.bf16.mxu0 %v2588_v19 }
 0x124   :  { %v170_v6 = vpop.xlane.xlu0 %169 }
 0x125   :  { %v171_v7 = vadd.f32 %v170_v6, %v2789_v5 }
 0x127   :  { %v172_v8 = vsel %vm152_vm1, %v171_v7, -1000000.0 }
 0x128   :  { %v174_v9 = vsel %vm173_vm2, %v172_v8, -inf }
 0x129   :  { %175 = vmax.xlane.f32.xlu0 %v174_v9  ;;  %v157_v9 = vld [vmem:[#allocation10] sm:$0x3] }
 0x1b6   :  { %v176_v10 = vpop.xlane.xlu0 %175 }
 0x1b7   :  { %v177_v11 = vsub.f32 %v172_v8, %v176_v10 }
 0x1b9   :  { %v178_v12 = vmul.f32 1.442695, %v177_v11 }
 0x1bb   :  { %2238 = vpow2.f32 %v178_v12 }
 0x1c5   :  { %v2239_v13 = vpop.eup %2238 }
 0x1c6   :  { %v180_v14 = vsel %vm173_vm2, %v2239_v13, 0.0 }
 0x1c7   :  { %181 = vadd.xlane.f32.xlu1 %v180_v14 }
 0x254   :  { %v182_v15 = vpop.xlane.xlu1 %181 }
 0x255   :  { %2240 = vrcp.f32 %v182_v15 }
 0x25f   :  { %v2241_v29 = vpop.eup %2240 }
 0x260   :  { %v184_v31 = vmul.f32 %v2241_v29, %v2239_v13  ;;  %v358_v29 = vld [vmem:[#allocation13 + $0x58] sm:$0xff] }
 0x262   :  { %v195_v32 = vrot.slane %v184_v31, %v2805_v25  ;;  %v188_v33 = vrot.slane %v184_v31, %v2807_v26  ;;  %v2851_v31 = vpack.c.bf16 %v358_v29, %v357_v27 }
 0x264   :  { %197 = vbcast.lane.b32.xlu0 %v195_v32, 256  ;;  %190 = vbcast.lane.b32.xlu1 %v188_v33, 256  ;;  %v359_v32 = vld [vmem:[#allocation13 + $0x60] sm:$0xff]  ;;  %v360_v33 = vld [vmem:[#allocation13 + $0x68] sm:$0xff] }
 0x265   :  { %2113 = vmatpush3.bf16.msra.mxu1 %v2851_v31  ;;  %v2855_v34 = vpack.c.bf16 %v360_v33, %v359_v32 }
 0x266   :  { %2114 = vmatprep.subr.bf16.mxu1 %v2588_v19 }
 0x268   :  { %222 = vrot.lane.b32.xlu1 %v154_v37, %s2577_s26  ;;  %v362_v37 = vld [vmem:[#allocation13 + $0x78] sm:$0xff] }
 0x269   :  { %2116 = vmatpush3.bf16.msra.mxu1 %v2855_v34 }
 0x26a   :  { %2117 = vmatprep.subr.bf16.mxu1 %v2588_v19 }
 0x2d6   :  { %v198_v41 = vpop.permute.xlu0 %197  ;;  %v191_v42 = vpop.permute.xlu1 %190 }
 0x2d7   :  { %v200_v43 = vmul.f32 %v198_v41, %v2826_v39  ;;  %v199_v44 = vmul.f32 %v191_v42, %v2828_v40  ;;  %v2860_v42 = vpack.c.bf16 %v362_v37, %v361_v35 }
 0x2d9   :  { %v209_v45 = vsel %vm201_vm4, %v200_v43, 0.0  ;;  %v202_v46 = vsel %vm201_vm4, %v199_v44, 0.0  ;;  %2119 = vmatpush3.bf16.msra.mxu1 %v2860_v42  ;;  %v159_v43 = vld [vmem:[#allocation10 + $0x2] sm:$0x3] }
 0x2da   :  { %v210_v47 = vrot.slane %v209_v45, 4  ;;  %v203_v48 = vrot.slane %v202_v46, 4  ;;  %v223_v59 = vpop.permute.xlu1 %222  ;;  %2126 = vmatprep.subr.bf16.mxu1 %v2588_v19 }
 0x2dc   :  { %v211_v49 = vadd.f32 %v210_v47, %v209_v45  ;;  %v204_v50 = vadd.f32 %v203_v48, %v202_v46 }
 0x2de   :  { %v212_v51 = vrot.slane %v211_v49, 2  ;;  %v205_v52 = vrot.slane %v204_v50, 2 }
 0x2e0   :  { %v213_v53 = vadd.f32 %v212_v51, %v211_v49  ;;  %v206_v54 = vadd.f32 %v205_v52, %v204_v50 }
 0x2e2   :  { %v214_v55 = vrot.slane %v213_v53, 1  ;;  %v207_v56 = vrot.slane %v206_v54, 1 }
 0x2e4   :  { %v215_v57 = vadd.f32 %v214_v55, %v213_v53  ;;  %v208_v58 = vadd.f32 %v207_v56, %v206_v54 }
 0x2e6   :  { %v219_v60 = vsel %vm218_vm5, %v215_v57, %v208_v58 }
 0x2e7   :  { %v225_v61 = vsel %vm201_vm4, %v219_v60, %v223_v59 }
 0x2e8   :  { %1917 = vmatmul.mubr.msk.f32.vlgmr.msra.gmra.mrb[0].mxu0 %vm241_vm6, %v225_v61 }
 0x2e9   :  { %1946 = vmatprep.mubr.msk.f32.mxu0 %vm2589_vm3, %v2590_v38 }
 0x3bb   :  { %v311_v63 = vpop.f32.mrb[0].mxu0 }
 0x3bc   :  { %v312_v3 = vadd.f32 %v2839_v62, %v311_v63  ;;  %v1918_v6 = vpop.f32.mrb[1].mxu0 }
 0x3be   :  { %v316_v7 = vadd.f32 %v315_v2, %v312_v3 }
 0x3c0   :  { %2242 = vtanh.f32 %v316_v7  ;;  %v1778_v10 = vmul.f32 -1.442695, %v316_v7 }
 0x3c2   :  { %2244 = vpow2.f32 %v1778_v10 }
 0x3ca   :  { %v2243_v8 = vpop.eup %2242 }
 0x3cb   :  { %330 = vrot.lane.b32.xlu1 %v2243_v8, %s2577_s26 }
 0x3cc   :  { %v2245_v11 = vpop.eup %2244 }
 0x3cd   :  { %v320_v12 = vadd.f32 1.0, %v2245_v11 }
 0x3cf   :  { %325 = vrot.lane.b32.xlu1 %v157_v9, %s2577_s26  ;;  %2246 = vrcp.f32 %v320_v12 }
 0x3d9   :  { %v2247_v13 = vpop.eup %2246 }
 0x43d   :  { %v331_v14 = vpop.permute.xlu1 %330 }
 0x43e   :  { %v333_v15 = vmul.f32 %v2247_v13, %v331_v14 }
 0x440   :  { %335 = vrot.lane.b32.xlu0 %v333_v15, %s2577_s26 }
 0x441   :  { %v326_v16 = vpop.permute.xlu1 %325 }
 0x442   :  { %v328_v17 = vmul.f32 %v2247_v13, %v326_v16 }
 0x4b2   :  { %v336_v18 = vpop.permute.xlu0 %335 }
 0x4b3   :  { %v2845_v21 = vadd.f32 %v336_v18, %v328_v17 }
 0x4b5   :  { %2248 = vtanh.f32 %v2845_v21 }
 0x4bf   :  { %v2249_v41 = vpop.eup %2248 }
 0x4c0   :  { %341 = vrot.lane.b32.xlu1 %v2249_v41, %s2577_s26 }
 0x4c4   :  { %350 = vrot.lane.b32.xlu1 %v2779_v1, %s2577_s26  ;;  %v2884_v1 = vld [vmem:[#allocation14 + $0x1] ss:$0 sm:$0xff] }
 0x4c8   :  { %452 = vrot.lane.b32.xlu1 %v159_v43, %s2577_s26 }
 0x532   :  { %v342_v44 = vpop.permute.xlu1 %341 }
 0x533   :  { %v2868_v45 = vmul.f32 %v2247_v13, %v342_v44 }
 0x535   :  { %346 = vrot.lane.b32.xlu0 %v2868_v45, %s2591_s1 }
 0x536   :  { %v351_v46 = vpop.permute.xlu1 %350 }
 0x53a   :  { %v453_v59 = vpop.permute.xlu1 %452 }
 0x5a7   :  { %v347_v47 = vpop.permute.xlu0 %346 }
 0x5a8   :  { %v353_v48 = vsel %vm201_vm4, %v347_v47, %v351_v46 }
 0x5a9   :  { %1936 = vmatmul.mubr.msk.f32.vlgmr.msra.gmra.mrb[0].mxu1 %vm241_vm6, %v353_v48 }
 0x5aa   :  { %2128 = vmatpush3.bf16.msra.mxu1 %v2798_v20  ;;  %1965 = vmatprep.mubr.msk.f32.mxu1 %vm2589_vm3, %v2590_v38 }
 0x5ab   :  { %2129 = vmatprep.subr.bf16.mxu1 %v2588_v19 }
 0x5ae   :  { %2131 = vmatpush3.bf16.msra.mxu1 %v2803_v24 }
 0x5af   :  { %2132 = vmatprep.subr.bf16.mxu1 %v2588_v19 }
 0x5b2   :  { %2134 = vmatpush3.bf16.msra.mxu1 %v2811_v30 }
 0x5b3   :  { %2135 = vmatprep.subr.bf16.mxu1 %v2588_v19 }
 0x5b6   :  { %2137 = vmatpush3.bf16.msra.mxu1 %v2817_v36 }
 0x5b7   :  { %2150 = vmatprep.subr.bf16.mxu1 %v2588_v19 }
 0x67c   :  { %v440_v49 = vpop.f32.mrb[0].mxu1 }
 0x67d   :  { %v441_v50 = vadd.f32 %v2884_v1, %v440_v49  ;;  %v1937_v51 = vpop.f32.mrb[1].mxu1 }
 0x67f   :  { %2250 = vtanh.f32 %v441_v50  ;;  %v1781_v53 = vmul.f32 -1.442695, %v441_v50 }
 0x681   :  { %2252 = vpow2.f32 %v1781_v53 }
 0x689   :  { %v2251_v52 = vpop.eup %2250 }
 0x68a   :  { %457 = vrot.lane.b32.xlu0 %v2251_v52, %s2577_s26 }
 0x68b   :  { %v2253_v54 = vpop.eup %2252 }
 0x68c   :  { %v447_v55 = vadd.f32 1.0, %v2253_v54 }
 0x68e   :  { %2254 = vrcp.f32 %v447_v55 }
 0x698   :  { %v2255_v56 = vpop.eup %2254 }
 0x699   :  { %v455_v60 = vmul.f32 %v2255_v56, %v453_v59 }
 0x6fc   :  { %v458_v57 = vpop.permute.xlu0 %457 }
 0x6fd   :  { %v460_v58 = vmul.f32 %v2255_v56, %v458_v57 }
 0x6ff   :  { %462 = vrot.lane.b32.xlu0 %v460_v58, %s2577_s26 }
 0x703   :  { %559 = vrot.lane.b32.xlu0 %v2777_v0, %s2591_s1 }
 0x771   :  { %v463_v61 = vpop.permute.xlu0 %462 }
 0x772   :  { %v2891_v63 = vadd.f32 %v463_v61, %v455_v60  ;;  %v710_v61 = vld [vmem:[#allocation2 + $0x2] sm:$0x3] }
 0x774   :  { %2256 = vtanh.f32 %v2891_v63 }
 0x775   :  { %v2895_v6 = vpop.permute.xlu0 %559 }
 0x77e   :  { %v2257_v2 = vpop.eup %2256 }
 0x77f   :  { %468 = vrot.lane.b32.xlu1 %v2257_v2, %s2577_s26 }
 0x7f1   :  { %v469_v3 = vpop.permute.xlu1 %468 }
 0x7f2   :  { %v2897_v7 = vmul.f32 %v2255_v56, %v469_v3 }
 0x7f4   :  { %v562_v8 = vmul.f32 %v2895_v6, %v2897_v7 }
 0x7f6   :  { %564 = vrot.lane.b32.xlu1 %v562_v8, %s2591_s1 }
 0x868   :  { %v565_v0 = vpop.permute.xlu1 %564 }
 0x869   :  { %v567_v9 = vsel %vm167_vm0, %v565_v0, 0.0  ;;  %v472_v0 = vld [vmem:[%s3192_s9] sm:$0xff] }
 0x86a   :  { %568 = vadd.xlane.f32.xlu0 %v567_v9  ;;  %v473_v9 = vld [vmem:[%s3192_s9 + $0x8] sm:$0xff] }
 0x8f7   :  { %v569_v10 = vpop.xlane.xlu0 %568 }
 0x8f8   :  { %v570_v11 = vadd.f32 %v569_v10, %v2789_v5  ;;  %v2928_v10 = vpack.c.bf16 %v473_v9, %v472_v0 }
 0x8fa   :  { %v571_v12 = vsel %vm152_vm1, %v570_v11, -1000000.0  ;;  %2122 = vmatpush3.bf16.msra.mxu0 %v2928_v10 }
 0x8fb   :  { %v572_v13 = vsel %vm173_vm2, %v571_v12, -inf  ;;  %2123 = vmatprep.subr.bf16.mxu0 %v2588_v19 }
 0x8fc   :  { %573 = vmax.xlane.f32.xlu1 %v572_v13 }
 0x989   :  { %v574_v14 = vpop.xlane.xlu1 %573 }
 0x98a   :  { %v575_v15 = vsub.f32 %v571_v12, %v574_v14 }
 0x98c   :  { %v576_v16 = vmul.f32 1.442695, %v575_v15  ;;  %v474_v15 = vld [vmem:[%s3192_s9 + $0x10] sm:$0xff] }
 0x98e   :  { %2258 = vpow2.f32 %v576_v16  ;;  %v475_v16 = vld [vmem:[%s3192_s9 + $0x18] sm:$0xff] }
 0x998   :  { %v2259_v17 = vpop.eup %2258 }
 0x999   :  { %v578_v18 = vsel %vm173_vm2, %v2259_v17, 0.0 }
 0x99a   :  { %579 = vadd.xlane.f32.xlu0 %v578_v18 }
 0xa27   :  { %v580_v22 = vpop.xlane.xlu0 %579 }
 0xa28   :  { %2260 = vrcp.f32 %v580_v22 }
 0xa32   :  { %v2261_v23 = vpop.eup %2260 }
 0xa33   :  { %v582_v27 = vmul.f32 %v2261_v23, %v2259_v17  ;;  %v2941_v17 = vpack.c.bf16 %v475_v16, %v474_v15 }
 0xa35   :  { %v593_v29 = vrot.slane %v582_v27, %v2805_v25  ;;  %v586_v32 = vrot.slane %v582_v27, %v2807_v26  ;;  %2125 = vmatpush3.bf16.msra.mxu0 %v2941_v17 }
 0xa36   :  { %2138 = vmatprep.subr.bf16.mxu0 %v2588_v19 }
 0xa37   :  { %595 = vbcast.lane.b32.xlu1 %v593_v29, 256  ;;  %588 = vbcast.lane.b32.xlu0 %v586_v32, 256 }
 0xa3b   :  { %617 = vrot.lane.b32.xlu1 %v2868_v45, %s2592_s20 }
 0xaa9   :  { %v596_v33 = vpop.permute.xlu1 %595  ;;  %v589_v35 = vpop.permute.xlu0 %588 }
 0xaaa   :  { %v598_v37 = vmul.f32 %v596_v33, %v2826_v39  ;;  %v597_v41 = vmul.f32 %v589_v35, %v2828_v40 }
 0xaac   :  { %v606_v43 = vsel %vm201_vm4, %v598_v37, 0.0  ;;  %v599_v44 = vsel %vm201_vm4, %v597_v41, 0.0  ;;  %v2975_v37 = vld [vmem:[%s3193_s10] ss:$0 sm:$0xff]  ;;  %s2593_s10 = smov [#allocation17]  }
 0xaad   :  { %v607_v46 = vrot.slane %v606_v43, 4  ;;  %v600_v47 = vrot.slane %v599_v44, 4  ;;  %v618_v57 = vpop.permute.xlu1 %617  ;;  %s1740_s21 = sshll.u32 %s2593_s10, 4  ;;  %s1741_s21 = int_to_ptr.vmem [resolvable:$true] %s1740_s21 }
 0xaae   :  { %s2494_s30 = scalar_lea.vmem %s1741_s21, 64  ;;  %p2499_p9 = scmp.lt.s32.totalorder %s1741_s21, %s1741_s21 }
 0xaaf   :  { %v608_v48 = vadd.f32 %v607_v46, %v606_v43  ;;  %v601_v49 = vadd.f32 %v600_v47, %v599_v44  ;;  %p2495_p8 = scmp.ne.s32.totalorder %s1741_s21, %s2494_s30  ;;  %p2500_p10 = scmp.lt.s32.totalorder %s2494_s30, %s2494_s30 }
 0xab1   :  { %v609_v50 = vrot.slane %v608_v48, 2  ;;  %v602_v51 = vrot.slane %v601_v49, 2  ;;  %p2501_p11 = por %p2500_p10, %p2499_p9 }
 0xab3   :  { %v610_v52 = vadd.f32 %v609_v50, %v608_v48  ;;  %v603_v53 = vadd.f32 %v602_v51, %v601_v49  ;;  %p2502_p12 = pnand %p2501_p11, %p2495_p8 }
 0xab5   :  { %v611_v54 = vrot.slane %v610_v52, 1  ;;  %v604_v45 = vrot.slane %v603_v53, 1 }
 0xab7   :  { %v612_v55 = vadd.f32 %v611_v54, %v610_v52  ;;  %v605_v56 = vadd.f32 %v604_v45, %v603_v53 }
 0xab9   :  { %v615_v58 = vsel %vm218_vm5, %v612_v55, %v605_v56 }
 0xaba   :  { %v620_v59 = vsel %vm201_vm4, %v615_v58, %v618_v57 }
 0xabb   :  { %1966 = vmatmul.mubr.msk.f32.vlgmr.msra.gmra.mrb[2].mxu1 %vm241_vm6, %v620_v59 }
 0xabc   :  { %1995 = vmatprep.mubr.msk.f32.mxu1 %vm2589_vm3, %v2590_v38  ;;  %2152 = vmatpush3.bf16.msra.mxu1 %v2928_v10 }
 0xabd   :  { %2153 = vmatprep.subr.bf16.mxu1 %v2588_v19 }
 0xac0   :  { %2155 = vmatpush3.bf16.msra.mxu1 %v2941_v17 }
 0xac1   :  { %2168 = vmatprep.subr.bf16.mxu1 %v2588_v19 }
 0xb8e   :  { %v705_v60 = vpop.f32.mrb[2].mxu1 }
 0xb8f   :  { %v706_v2 = vadd.f32 %v2839_v62, %v705_v60  ;;  %v1967_v3 = vpop.f32.mrb[3].mxu1 }
 0xb91   :  { %v711_v8 = vadd.f32 %v710_v61, %v706_v2 }
 0xb93   :  { %2262 = vtanh.f32 %v711_v8  ;;  %v1786_v12 = vmul.f32 -1.442695, %v711_v8 }
 0xb95   :  { %2264 = vpow2.f32 %v1786_v12 }
 0xb9d   :  { %v2263_v11 = vpop.eup %2262 }
 0xb9e   :  { %721 = vrot.lane.b32.xlu0 %v2263_v11, %s2577_s26 }
 0xb9f   :  { %v2265_v13 = vpop.eup %2264 }
 0xba0   :  { %v715_v14 = vadd.f32 1.0, %v2265_v13 }
 0xba2   :  { %2266 = vrcp.f32 %v715_v14 }
 0xbac   :  { %v2267_v18 = vpop.eup %2266 }
 0xbad   :  { %v719_v27 = vmul.f32 %v2267_v18, %v2845_v21 }
 0xc10   :  { %v722_v22 = vpop.permute.xlu0 %721 }
 0xc11   :  { %v724_v23 = vmul.f32 %v2267_v18, %v722_v22 }
 0xc13   :  { %726 = vrot.lane.b32.xlu1 %v724_v23, %s2577_s26 }
 0xc17   :  { %484 = vrot.lane.b32.xlu1 %v2897_v7, %s2591_s1 }
 0xc1b   :  { %740 = vrot.lane.b32.xlu1 %v2897_v7, %s2592_s20 }
 0xc85   :  { %v727_v29 = vpop.permute.xlu1 %726 }
 0xc86   :  { %v2953_v32 = vadd.f32 %v727_v29, %v719_v27 }
 0xc88   :  { %2268 = vtanh.f32 %v2953_v32 }
 0xc89   :  { %v485_v33 = vpop.permute.xlu1 %484 }
 0xc8a   :  { %1947 = vmatmul.mubr.msk.f32.vlgmr.msra.gmra.mrb[2].mxu0 %vm201_vm4, %v485_v33 }
 0xc8b   :  { %2140 = vmatpush3.bf16.msra.mxu0 %v2848_v28  ;;  %1984 = vmatprep.mubr.msk.f32.mxu0 %vm2589_vm3, %v2590_v38 }
 0xc8c   :  { %2141 = vmatprep.subr.bf16.mxu0 %v2588_v19 }
 0xc8d   :  { %v741_v46 = vpop.permute.xlu1 %740 }
 0xc8f   :  { %2143 = vmatpush3.bf16.msra.mxu0 %v2851_v31 }
 0xc90   :  { %2144 = vmatprep.subr.bf16.mxu0 %v2588_v19 }
 0xc92   :  { %v2269_v21 = vpop.eup %2268 }
 0xc93   :  { %732 = vrot.lane.b32.xlu0 %v2269_v21, %s2577_s26  ;;  %2146 = vmatpush3.bf16.msra.mxu0 %v2855_v34 }
 0xc94   :  { %2147 = vmatprep.subr.bf16.mxu0 %v2588_v19 }
 0xc97   :  { %2149 = vmatpush3.bf16.msra.mxu0 %v2860_v42 }
 0xc98   :  { %2156 = vmatprep.subr.bf16.mxu0 %v2588_v19 }
 0xd05   :  { %v733_v7 = vpop.permute.xlu0 %732 }
 0xd06   :  { %v2968_v35 = vmul.f32 %v2267_v18, %v733_v7 }
 0xd08   :  { %737 = vrot.lane.b32.xlu0 %v2968_v35, %s2591_s1 }
 0xd5d   :  { %v554_v41 = vpop.f32.mrb[2].mxu0 }
 0xd5e   :  { %v555_v43 = vadd.f32 %v2975_v37, %v554_v41  ;;  %v1948_v44 = vpop.f32.mrb[3].mxu0 }
 0xd60   :  { %558 = vst [vmem:[#allocation16] sm:$0x3] %v555_v43 }
 0xd7a   :  { %v738_v47 = vpop.permute.xlu0 %737 }
 0xd7b   :  { %v743_v48 = vsel %vm201_vm4, %v738_v47, %v741_v46 }
 0xd7c   :  { %1985 = vmatmul.mubr.msk.f32.vlgmr.msra.gmra.mrb[4].mxu0 %vm241_vm6, %v743_v48 }
 0xd7d   :  { %2158 = vmatpush3.bf16.msra.mxu0 %v2798_v20  ;;  %2014 = vmatprep.mubr.msk.f32.mxu0 %vm2589_vm3, %v2590_v38 }
 0xd7e   :  { %2159 = vmatprep.subr.bf16.mxu0 %v2588_v19 }
 0xd81   :  { %2161 = vmatpush3.bf16.msra.mxu0 %v2803_v24 }
 0xd82   :  { %2162 = vmatprep.subr.bf16.mxu0 %v2588_v19 }
 0xd85   :  { %2164 = vmatpush3.bf16.msra.mxu0 %v2811_v30 }
 0xd86   :  { %2165 = vmatprep.subr.bf16.mxu0 %v2588_v19 }
 0xd89   :  { %2167 = vmatpush3.bf16.msra.mxu0 %v2817_v36 }
 0xd8a   :  { %2180 = vmatprep.subr.bf16.mxu0 %v2588_v19 }
 0xe4f   :  { %v828_v49 = vpop.f32.mrb[4].mxu0 }
 0xe50   :  { %v829_v50 = vadd.f32 %v2884_v1, %v828_v49  ;;  %v1986_v51 = vpop.f32.mrb[5].mxu0 }
 0xe52   :  { %2270 = vtanh.f32 %v829_v50  ;;  %v1789_v53 = vmul.f32 -1.442695, %v829_v50 }
 0xe54   :  { %2272 = vpow2.f32 %v1789_v53 }
 0xe5c   :  { %v2271_v52 = vpop.eup %2270 }
 0xe5d   :  { %841 = vrot.lane.b32.xlu0 %v2271_v52, %s2577_s26 }
 0xe5e   :  { %v2273_v54 = vpop.eup %2272 }
 0xe5f   :  { %v835_v45 = vadd.f32 1.0, %v2273_v54 }
 0xe61   :  { %2274 = vrcp.f32 %v835_v45 }
 0xe6b   :  { %v2275_v55 = vpop.eup %2274 }
 0xe6c   :  { %v839_v58 = vmul.f32 %v2275_v55, %v2891_v63 }
 0xecf   :  { %v842_v56 = vpop.permute.xlu0 %841 }
 0xed0   :  { %v844_v57 = vmul.f32 %v2275_v55, %v842_v56 }
 0xed2   :  { %846 = vrot.lane.b32.xlu1 %v844_v57, %s2577_s26 }
 0xf44   :  { %v847_v59 = vpop.permute.xlu1 %846 }
 0xf45   :  { %v2994_v60 = vadd.f32 %v847_v59, %v839_v58 }
 0xf47   :  { %2276 = vtanh.f32 %v2994_v60 }
 0xf51   :  { %v2277_v61 = vpop.eup %2276 }
 0xf52   :  { %852 = vrot.lane.b32.xlu0 %v2277_v61, %s2577_s26 }
 0xfc4   :  { %v853_v2 = vpop.permute.xlu0 %852 }
 0xfc5   :  { %v2998_v3 = vmul.f32 %v2275_v55, %v853_v2 }
 0xfc7   :  { %v944_v8 = vmul.f32 %v2998_v3, %v2895_v6 }
 0xfc9   :  { %946 = vrot.lane.b32.xlu1 %v944_v8, %s2591_s1  ;;  %v1092_v8 = vld [vmem:[#allocation2 + $0x4] sm:$0x3] }
0x103b   :  { %v947_v0 = vpop.permute.xlu1 %946 }
0x103c   :  { %v949_v9 = vsel %vm167_vm0, %v947_v0, 0.0 }
0x103d   :  { %950 = vadd.xlane.f32.xlu0 %v949_v9 }
0x10ca   :  { %v951_v63 = vpop.xlane.xlu0 %950 }
0x10cb   :  { %v952_v11 = vadd.f32 %v951_v63, %v2789_v5 }
0x10cd   :  { %v953_v12 = vsel %vm152_vm1, %v952_v11, -1000000.0 }
0x10ce   :  { %v954_v13 = vsel %vm173_vm2, %v953_v12, -inf }
0x10cf   :  { %955 = vmax.xlane.f32.xlu1 %v954_v13 }
0x115c   :  { %v956_v14 = vpop.xlane.xlu1 %955 }
0x115d   :  { %v957_v15 = vsub.f32 %v953_v12, %v956_v14 }
0x115f   :  { %v958_v16 = vmul.f32 1.442695, %v957_v15 }
0x1161   :  { %2278 = vpow2.f32 %v958_v16 }
0x116b   :  { %v2279_v18 = vpop.eup %2278 }
0x116c   :  { %v960_v22 = vsel %vm173_vm2, %v2279_v18, 0.0 }
0x116d   :  { %961 = vadd.xlane.f32.xlu0 %v960_v22 }
0x11fa   :  { %v962_v23 = vpop.xlane.xlu0 %961 }
0x11fb   :  { %2280 = vrcp.f32 %v962_v23 }
0x1205   :  { %v2281_v27 = vpop.eup %2280 }
0x1206   :  { %v964_v29 = vmul.f32 %v2281_v27, %v2279_v18 }
0x1208   :  { %v975_v33 = vrot.slane %v964_v29, %v2805_v25  ;;  %v968_v21 = vrot.slane %v964_v29, %v2807_v26 }
0x120a   :  { %977 = vbcast.lane.b32.xlu1 %v975_v33, 256  ;;  %970 = vbcast.lane.b32.xlu0 %v968_v21, 256 }
0x120e   :  { %999 = vrot.lane.b32.xlu1 %v2968_v35, %s2592_s20 }
0x127c   :  { %v978_v7 = vpop.permute.xlu1 %977  ;;  %v971_v41 = vpop.permute.xlu0 %970 }
0x127d   :  { %v980_v43 = vmul.f32 %v978_v7, %v2826_v39  ;;  %v979_v44 = vmul.f32 %v971_v41, %v2828_v40 }
0x127f   :  { %v988_v46 = vsel %vm201_vm4, %v980_v43, 0.0  ;;  %v981_v47 = vsel %vm201_vm4, %v979_v44, 0.0 }
0x1280   :  { %v989_v48 = vrot.slane %v988_v46, 4  ;;  %v982_v49 = vrot.slane %v981_v47, 4  ;;  %v1000_v58 = vpop.permute.xlu1 %999 }
0x1282   :  { %v990_v50 = vadd.f32 %v989_v48, %v988_v46  ;;  %v983_v51 = vadd.f32 %v982_v49, %v981_v47 }
0x1284   :  { %v991_v52 = vrot.slane %v990_v50, 2  ;;  %v984_v53 = vrot.slane %v983_v51, 2 }
0x1286   :  { %v992_v54 = vadd.f32 %v991_v52, %v990_v50  ;;  %v985_v45 = vadd.f32 %v984_v53, %v983_v51 }
0x1288   :  { %v993_v55 = vrot.slane %v992_v54, 1  ;;  %v986_v35 = vrot.slane %v985_v45, 1 }
0x128a   :  { %v994_v56 = vadd.f32 %v993_v55, %v992_v54  ;;  %v987_v57 = vadd.f32 %v986_v35, %v985_v45 }
0x128c   :  { %v997_v59 = vsel %vm218_vm5, %v994_v56, %v987_v57 }
0x128d   :  { %v1002_v61 = vsel %vm201_vm4, %v997_v59, %v1000_v58 }
0x128e   :  { %2015 = vmatmul.mubr.msk.f32.vlgmr.msra.gmra.mrb[6].mxu0 %vm241_vm6, %v1002_v61 }
0x128f   :  { %2182 = vmatpush3.bf16.msra.mxu0 %v2928_v10  ;;  %2044 = vmatprep.mubr.msk.f32.mxu0 %vm2589_vm3, %v2590_v38 }
0x1290   :  { %2183 = vmatprep.subr.bf16.mxu0 %v2588_v19 }
0x1293   :  { %2185 = vmatpush3.bf16.msra.mxu0 %v2941_v17 }
0x1294   :  { %2198 = vmatprep.subr.bf16.mxu0 %v2588_v19 }
0x1361   :  { %v1087_v2 = vpop.f32.mrb[6].mxu0 }
0x1362   :  { %v1088_v0 = vadd.f32 %v2839_v62, %v1087_v2  ;;  %v2016_v9 = vpop.f32.mrb[7].mxu0 }
0x1364   :  { %v1093_v63 = vadd.f32 %v1092_v8, %v1088_v0 }
0x1366   :  { %2282 = vtanh.f32 %v1093_v63  ;;  %v1794_v12 = vmul.f32 -1.442695, %v1093_v63 }
0x1368   :  { %2284 = vpow2.f32 %v1794_v12 }
0x1370   :  { %v2283_v11 = vpop.eup %2282 }
0x1371   :  { %1103 = vrot.lane.b32.xlu0 %v2283_v11, %s2577_s26 }
0x1372   :  { %v2285_v13 = vpop.eup %2284 }
0x1373   :  { %v1097_v14 = vadd.f32 1.0, %v2285_v13 }
0x1375   :  { %2286 = vrcp.f32 %v1097_v14 }
0x137f   :  { %v2287_v15 = vpop.eup %2286 }
0x1380   :  { %v1101_v22 = vmul.f32 %v2287_v15, %v2953_v32 }
0x13e3   :  { %v1104_v16 = vpop.permute.xlu0 %1103 }
0x13e4   :  { %v1106_v18 = vmul.f32 %v2287_v15, %v1104_v16 }
0x13e6   :  { %1108 = vrot.lane.b32.xlu1 %v1106_v18, %s2577_s26 }
0x13ea   :  { %868 = vrot.lane.b32.xlu1 %v2998_v3, %s2591_s1 }
0x13ee   :  { %1122 = vrot.lane.b32.xlu1 %v2998_v3, %s2592_s20 }
0x1458   :  { %v1109_v23 = vpop.permute.xlu1 %1108 }
0x1459   :  { %v3034_v27 = vadd.f32 %v1109_v23, %v1101_v22 }
0x145b   :  { %2288 = vtanh.f32 %v3034_v27 }
0x145c   :  { %v869_v29 = vpop.permute.xlu1 %868 }
0x145d   :  { %1996 = vmatmul.mubr.msk.f32.vlgmr.msra.gmra.mrb[4].mxu1 %vm201_vm4, %v869_v29 }
0x145e   :  { %2170 = vmatpush3.bf16.msra.mxu1 %v2848_v28  ;;  %2033 = vmatprep.mubr.msk.f32.mxu1 %vm2589_vm3, %v2590_v38 }
0x145f   :  { %2171 = vmatprep.subr.bf16.mxu1 %v2588_v19 }
0x1460   :  { %v1123_v43 = vpop.permute.xlu1 %1122 }
0x1462   :  { %2173 = vmatpush3.bf16.msra.mxu1 %v2851_v31 }
0x1463   :  { %2174 = vmatprep.subr.bf16.mxu1 %v2588_v19 }
0x1465   :  { %v2289_v32 = vpop.eup %2288 }
0x1466   :  { %1114 = vrot.lane.b32.xlu0 %v2289_v32, %s2577_s26  ;;  %2176 = vmatpush3.bf16.msra.mxu1 %v2855_v34 }
0x1467   :  { %2177 = vmatprep.subr.bf16.mxu1 %v2588_v19 }
0x146a   :  { %2179 = vmatpush3.bf16.msra.mxu1 %v2860_v42 }
0x146b   :  { %2186 = vmatprep.subr.bf16.mxu1 %v2588_v19 }
0x14d8   :  { %v1115_v3 = vpop.permute.xlu0 %1114 }
0x14d9   :  { %v3049_v33 = vmul.f32 %v2287_v15, %v1115_v3 }
0x14db   :  { %1119 = vrot.lane.b32.xlu0 %v3049_v33, %s2591_s1 }
0x1530   :  { %v938_v21 = vpop.f32.mrb[4].mxu1 }
0x1531   :  { %v939_v7 = vadd.f32 %v2975_v37, %v938_v21  ;;  %v1997_v41 = vpop.f32.mrb[5].mxu1 }
0x1533   :  { %943 = vst [vmem:[#allocation16 + $0x2] sm:$0x3] %v939_v7 }
0x154d   :  { %v1120_v44 = vpop.permute.xlu0 %1119 }
0x154e   :  { %v1125_v46 = vsel %vm201_vm4, %v1120_v44, %v1123_v43 }
0x154f   :  { %2034 = vmatmul.mubr.msk.f32.vlgmr.msra.gmra.mrb[6].mxu1 %vm241_vm6, %v1125_v46 }
0x1550   :  { %2188 = vmatpush3.bf16.msra.mxu1 %v2798_v20  ;;  %2063 = vmatprep.mubr.msk.f32.mxu1 %vm2589_vm3, %v2590_v38 }
0x1551   :  { %2189 = vmatprep.subr.bf16.mxu1 %v2588_v19 }
0x1554   :  { %2191 = vmatpush3.bf16.msra.mxu1 %v2803_v24 }
0x1555   :  { %2192 = vmatprep.subr.bf16.mxu1 %v2588_v19 }
0x1558   :  { %2194 = vmatpush3.bf16.msra.mxu1 %v2811_v30 }
0x1559   :  { %2195 = vmatprep.subr.bf16.mxu1 %v2588_v19 }
0x155c   :  { %2197 = vmatpush3.bf16.msra.mxu1 %v2817_v36 }
0x155d   :  { %2210 = vmatprep.subr.bf16.mxu1 %v2588_v19 }
0x1622   :  { %v1210_v47 = vpop.f32.mrb[6].mxu1 }
0x1623   :  { %v1211_v20 = vadd.f32 %v2884_v1, %v1210_v47  ;;  %v2035_v48 = vpop.f32.mrb[7].mxu1 }
0x1625   :  { %2290 = vtanh.f32 %v1211_v20  ;;  %v1797_v50 = vmul.f32 -1.442695, %v1211_v20 }
0x1627   :  { %2292 = vpow2.f32 %v1797_v50 }
0x162f   :  { %v2291_v49 = vpop.eup %2290 }
0x1630   :  { %1223 = vrot.lane.b32.xlu0 %v2291_v49, %s2577_s26  ;;  %v1474_v49 = vld [vmem:[#allocation2 + $0x6] sm:$0x3] }
0x1631   :  { %v2293_v24 = vpop.eup %2292 }
0x1632   :  { %v1217_v51 = vadd.f32 1.0, %v2293_v24 }
0x1634   :  { %2294 = vrcp.f32 %v1217_v51 }
0x163e   :  { %v2295_v30 = vpop.eup %2294 }
0x163f   :  { %v1221_v36 = vmul.f32 %v2295_v30, %v2994_v60 }
0x16a2   :  { %v1224_v52 = vpop.permute.xlu0 %1223 }
0x16a3   :  { %v1226_v53 = vmul.f32 %v2295_v30, %v1224_v52 }
0x16a5   :  { %1228 = vrot.lane.b32.xlu1 %v1226_v53, %s2577_s26 }
0x1717   :  { %v1229_v54 = vpop.permute.xlu1 %1228 }
0x1718   :  { %v3070_v45 = vadd.f32 %v1229_v54, %v1221_v36 }
0x171a   :  { %2296 = vtanh.f32 %v3070_v45 }
0x1724   :  { %v2297_v55 = vpop.eup %2296 }
0x1725   :  { %1234 = vrot.lane.b32.xlu0 %v2297_v55, %s2577_s26 }
0x1797   :  { %v1235_v35 = vpop.permute.xlu0 %1234 }
0x1798   :  { %v3074_v56 = vmul.f32 %v2295_v30, %v1235_v35 }
0x179a   :  { %v1326_v57 = vmul.f32 %v3074_v56, %v2895_v6 }
0x179c   :  { %1328 = vrot.lane.b32.xlu1 %v1326_v57, %s2591_s1 }
0x180e   :  { %v1329_v58 = vpop.permute.xlu1 %1328 }
0x180f   :  { %v1331_v59 = vsel %vm167_vm0, %v1329_v58, 0.0 }
0x1810   :  { %1332 = vadd.xlane.f32.xlu0 %v1331_v59 }
0x189d   :  { %v1333_v60 = vpop.xlane.xlu0 %1332 }
0x189e   :  { %v1334_v61 = vadd.f32 %v1333_v60, %v2789_v5 }
0x18a0   :  { %v1335_v2 = vsel %vm152_vm1, %v1334_v61, -1000000.0 }
0x18a1   :  { %v1336_v8 = vsel %vm173_vm2, %v1335_v2, -inf }
0x18a2   :  { %1337 = vmax.xlane.f32.xlu1 %v1336_v8 }
0x192f   :  { %v1338_v0 = vpop.xlane.xlu1 %1337 }
0x1930   :  { %v1339_v9 = vsub.f32 %v1335_v2, %v1338_v0 }
0x1932   :  { %v1340_v63 = vmul.f32 1.442695, %v1339_v9 }
0x1934   :  { %2298 = vpow2.f32 %v1340_v63 }
0x193e   :  { %v2299_v6 = vpop.eup %2298 }
0x193f   :  { %v1342_v11 = vsel %vm173_vm2, %v2299_v6, 0.0 }
0x1940   :  { %1343 = vadd.xlane.f32.xlu0 %v1342_v11 }
0x19cd   :  { %v1344_v12 = vpop.xlane.xlu0 %1343 }
0x19ce   :  { %2300 = vrcp.f32 %v1344_v12 }
0x19d8   :  { %v2301_v13 = vpop.eup %2300 }
0x19d9   :  { %v1346_v14 = vmul.f32 %v2301_v13, %v2299_v6 }
0x19db   :  { %v1357_v5 = vrot.slane %v1346_v14, %v2805_v25  ;;  %v1350_v4 = vrot.slane %v1346_v14, %v2807_v26 }
0x19dd   :  { %1359 = vbcast.lane.b32.xlu1 %v1357_v5, 256  ;;  %1352 = vbcast.lane.b32.xlu0 %v1350_v4, 256 }
0x19e1   :  { %1381 = vrot.lane.b32.xlu1 %v3049_v33, %s2592_s20 }
0x1a4f   :  { %v1360_v15 = vpop.permute.xlu1 %1359  ;;  %v1353_v16 = vpop.permute.xlu0 %1352 }
0x1a50   :  { %v1362_v18 = vmul.f32 %v1360_v15, %v2826_v39  ;;  %v1361_v22 = vmul.f32 %v1353_v16, %v2828_v40 }
0x1a52   :  { %v1370_v23 = vsel %vm201_vm4, %v1362_v18, 0.0  ;;  %v1363_v29 = vsel %vm201_vm4, %v1361_v22, 0.0 }
0x1a53   :  { %v1371_v32 = vrot.slane %v1370_v23, 4  ;;  %v1364_v3 = vrot.slane %v1363_v29, 4  ;;  %v1382_v20 = vpop.permute.xlu1 %1381 }
0x1a55   :  { %v1372_v25 = vadd.f32 %v1371_v32, %v1370_v23  ;;  %v1365_v21 = vadd.f32 %v1364_v3, %v1363_v29 }
0x1a57   :  { %v1373_v26 = vrot.slane %v1372_v25, 2  ;;  %v1366_v7 = vrot.slane %v1365_v21, 2 }
0x1a59   :  { %v1374_v41 = vadd.f32 %v1373_v26, %v1372_v25  ;;  %v1367_v43 = vadd.f32 %v1366_v7, %v1365_v21 }
0x1a5b   :  { %v1375_v44 = vrot.slane %v1374_v41, 1  ;;  %v1368_v33 = vrot.slane %v1367_v43, 1 }
0x1a5d   :  { %v1376_v46 = vadd.f32 %v1375_v44, %v1374_v41  ;;  %v1369_v47 = vadd.f32 %v1368_v33, %v1367_v43 }
0x1a5f   :  { %v1379_v39 = vsel %vm218_vm5, %v1376_v46, %v1369_v47 }
0x1a60   :  { %v1384_v40 = vsel %vm201_vm4, %v1379_v39, %v1382_v20 }
0x1a61   :  { %2064 = vmatmul.mubr.msk.f32.vlgmr.msra.gmra.mrb[8].mxu1 %vm241_vm6, %v1384_v40 }
0x1a62   :  { %2212 = vmatpush3.bf16.msra.mxu1 %v2928_v10  ;;  %2093 = vmatprep.mubr.msk.f32.mxu1 %vm2589_vm3, %v2590_v38 }
0x1a63   :  { %2213 = vmatprep.subr.bf16.mxu1 %v2588_v19 }
0x1a66   :  { %2215 = vmatpush3.bf16.msra.mxu1 %v2941_v17 }
0x1b34   :  { %v1469_v48 = vpop.f32.mrb[8].mxu1 }
0x1b35   :  { %v1470_v50 = vadd.f32 %v2839_v62, %v1469_v48  ;;  %v2065_v24 = vpop.f32.mrb[9].mxu1 }
0x1b37   :  { %v1475_v51 = vadd.f32 %v1474_v49, %v1470_v50 }
0x1b39   :  { %2302 = vtanh.f32 %v1475_v51  ;;  %v1802_v52 = vmul.f32 -1.442695, %v1475_v51 }
0x1b3b   :  { %2304 = vpow2.f32 %v1802_v52 }
0x1b43   :  { %v2303_v30 = vpop.eup %2302 }
0x1b44   :  { %1485 = vrot.lane.b32.xlu0 %v2303_v30, %s2577_s26 }
0x1b45   :  { %v2305_v10 = vpop.eup %2304 }
0x1b46   :  { %v1479_v53 = vadd.f32 1.0, %v2305_v10 }
0x1b48   :  { %2306 = vrcp.f32 %v1479_v53 }
0x1b52   :  { %v2307_v36 = vpop.eup %2306 }
0x1b53   :  { %v1483_v62 = vmul.f32 %v2307_v36, %v3034_v27 }
0x1bb6   :  { %v1486_v54 = vpop.permute.xlu0 %1485 }
0x1bb7   :  { %v1488_v55 = vmul.f32 %v2307_v36, %v1486_v54 }
0x1bb9   :  { %1490 = vrot.lane.b32.xlu1 %v1488_v55, %s2577_s26 }
0x1bbd   :  { %1250 = vrot.lane.b32.xlu1 %v3074_v56, %s2591_s1 }
0x1bc1   :  { %1504 = vrot.lane.b32.xlu1 %v3074_v56, %s2592_s20 }
0x1c2b   :  { %v1491_v17 = vpop.permute.xlu1 %1490 }
0x1c2c   :  { %v1493_v35 = vadd.f32 %v1491_v17, %v1483_v62 }
0x1c2e   :  { %2308 = vtanh.f32 %v1493_v35 }
0x1c2f   :  { %v1251_v57 = vpop.permute.xlu1 %1250 }
0x1c30   :  { %2045 = vmatmul.mubr.msk.f32.vlgmr.msra.gmra.mrb[8].mxu0 %vm201_vm4, %v1251_v57 }
0x1c31   :  { %2200 = vmatpush3.bf16.msra.mxu0 %v2848_v28  ;;  %2082 = vmatprep.mubr.msk.f32.mxu0 %vm2589_vm3, %v2590_v38 }
0x1c32   :  { %2201 = vmatprep.subr.bf16.mxu0 %v2588_v19 }
0x1c35   :  { %2203 = vmatpush3.bf16.msra.mxu0 %v2851_v31  ;;  %v1505_v31 = vpop.permute.xlu1 %1504 }
0x1c36   :  { %2204 = vmatprep.subr.bf16.mxu0 %v2588_v19 }
0x1c38   :  { %v2309_v56 = vpop.eup %2308 }
0x1c39   :  { %1496 = vrot.lane.b32.xlu0 %v2309_v56, %s2577_s26  ;;  %2206 = vmatpush3.bf16.msra.mxu0 %v2855_v34 }
0x1c3a   :  { %2207 = vmatprep.subr.bf16.mxu0 %v2588_v19 }
0x1c3d   :  { %2209 = vmatpush3.bf16.msra.mxu0 %v2860_v42 }
0x1cab   :  { %v1497_v27 = vpop.permute.xlu0 %1496 }
0x1cac   :  { %v1499_v28 = vmul.f32 %v2307_v36, %v1497_v27 }
0x1cae   :  { %1501 = vrot.lane.b32.xlu0 %v1499_v28, %s2591_s1 }
0x1d03   :  { %v1320_v38 = vpop.f32.mrb[8].mxu0 }
0x1d04   :  { %v1321_v58 = vadd.f32 %v2975_v37, %v1320_v38  ;;  %v2046_v59 = vpop.f32.mrb[9].mxu0 }
0x1d06   :  { %1325 = vst [vmem:[#allocation16 + $0x4] sm:$0x3] %v1321_v58 }
0x1d20   :  { %v1502_v60 = vpop.permute.xlu0 %1501 }
0x1d21   :  { %v1507_v61 = vsel %vm201_vm4, %v1502_v60, %v1505_v31  ;;  %1708 = vst.msk [vmem:[#allocation17] sm:$0x3] %vm167_vm0, %v1502_v60 }
0x1d22   :  { %2083 = vmatmul.mubr.msk.f32.vlgmr.msra.gmra.mrb[10].mxu0 %vm241_vm6, %v1507_v61 }
0x1df5   :  { %v1592_v19 = vpop.f32.mrb[10].mxu0 }
0x1df6   :  { %v1593_v34 = vadd.f32 %v2884_v1, %v1592_v19  ;;  %v2084_v42 = vpop.f32.mrb[11].mxu0 }
0x1df8   :  { %2310 = vtanh.f32 %v1593_v34  ;;  %v1805_v8 = vmul.f32 -1.442695, %v1593_v34 }
0x1dfa   :  { %2312 = vpow2.f32 %v1805_v8 }
0x1e02   :  { %v2311_v2 = vpop.eup %2310 }
0x1e03   :  { %1605 = vrot.lane.b32.xlu0 %v2311_v2, %s2577_s26 }
0x1e04   :  { %v2313_v0 = vpop.eup %2312 }
0x1e05   :  { %v1599_v9 = vadd.f32 1.0, %v2313_v0 }
0x1e07   :  { %2314 = vrcp.f32 %v1599_v9 }
0x1e11   :  { %v2315_v63 = vpop.eup %2314 }
0x1e12   :  { %v1603_v12 = vmul.f32 %v2315_v63, %v3070_v45 }
0x1e75   :  { %v1606_v6 = vpop.permute.xlu0 %1605 }
0x1e76   :  { %v1608_v11 = vmul.f32 %v2315_v63, %v1606_v6 }
0x1e78   :  { %1610 = vrot.lane.b32.xlu1 %v1608_v11, %s2577_s26 }
0x1eea   :  { %v1611_v13 = vpop.permute.xlu1 %1610 }
0x1eeb   :  { %v1613_v14 = vadd.f32 %v1611_v13, %v1603_v12 }
0x1eed   :  { %2316 = vtanh.f32 %v1613_v14 }
0x1ef7   :  { %v2317_v1 = vpop.eup %2316 }
0x1ef8   :  { %1616 = vrot.lane.b32.xlu0 %v2317_v1, %s2577_s26 }
0x1efc   :  { %1710 = vrot.lane.b32.xlu0 %v1493_v35, %s2592_s20 }
0x1f6a   :  { %v1617_v5 = vpop.permute.xlu0 %1616 }
0x1f6b   :  { %v1619_v4 = vmul.f32 %v2315_v63, %v1617_v5 }
0x1f6d   :  { %1632 = vrot.lane.b32.xlu1 %v1619_v4, %s2591_s1 }
0x1f6e   :  { %v1711_v15 = vpop.permute.xlu0 %1710 }
0x1f6f   :  { %1713 = vst.msk [vmem:[#allocation19] sm:$0x3] %vm167_vm0, %v1711_v15 }
0x1f71   :  { %1718 = vrot.lane.b32.xlu1 %v1613_v14, %s2592_s20 }
0x1fdf   :  { %v1633_v16 = vpop.permute.xlu1 %1632 }
0x1fe0   :  { %1716 = vst.msk [vmem:[#allocation17 + $0x2] sm:$0x3] %vm167_vm0, %v1633_v16  ;;  %2094 = vmatmul.mubr.msk.f32.vlgmr.msra.gmra.mrb[10].mxu1 %vm201_vm4, %v1633_v16 }
0x1fe3   :  { %v1719_v45 = vpop.permute.xlu1 %1718 }
0x1fe4   :  { %1722 = vst.msk [vmem:[#allocation19 + $0x2] sm:$0x3] %vm167_vm0, %v1719_v45 }
0x1fe5   :  { %2505 = shalt.err (!%p2502_p12)
}
0x1fe6   :  { %s2506_s2 = scalar_lea.hbm %s3195_s12, 64 }
0x1fe7   :  { %p2507_p13 = scmp.ne.s32.totalorder %s3195_s12, %s2506_s2  ;;  %p2510_p0 = scmp.lt.u32.totalorder %s2506_s2, %s3195_s12 }
0x1fe9   :  { %p2512_p1 = pnand %p2510_p0, %p2507_p13 }
0x1feb   :  { %2515 = shalt.err (!%p2512_p1)
}
0x1fec   :  { %1746 = dma.vmem_to_hbm [thread:$0]  %s1741_s21, 64, %s3195_s12, [#allocation18], %s2577_s26, %s2577_s26, %s2578_s15  }
0x1fed   :  { %s2594_s8 = smov [#allocation19]  }
0x1fee   :  { %s1752_s19 = sshll.u32 %s2594_s8, 4  ;;  %s1753_s19 = int_to_ptr.vmem [resolvable:$true] %s1752_s19 }
0x1fef   :  { %s2516_s1 = scalar_lea.vmem %s1753_s19, 64  ;;  %p2521_p3 = scmp.lt.s32.totalorder %s1753_s19, %s1753_s19 }
0x1ff0   :  { %p2517_p2 = scmp.ne.s32.totalorder %s1753_s19, %s2516_s1  ;;  %p2522_p4 = scmp.lt.s32.totalorder %s2516_s1, %s2516_s1 }
0x1ff2   :  { %p2523_p5 = por %p2522_p4, %p2521_p3 }
0x1ff4   :  { %p2524_p6 = pnand %p2523_p5, %p2517_p2 }
0x1ff6   :  { %2527 = shalt.err (!%p2524_p6)
}
0x1ff7   :  { %s2528_s25 = scalar_lea.hbm %s3196_s13, 64 }
0x1ff8   :  { %p2529_p7 = scmp.ne.s32.totalorder %s3196_s13, %s2528_s25  ;;  %p2532_p8 = scmp.lt.u32.totalorder %s2528_s25, %s3196_s13 }
0x1ffa   :  { %p2534_p9 = pnand %p2532_p8, %p2529_p7 }
0x1ffc   :  { %2537 = shalt.err (!%p2534_p9)
}
0x1ffd   :  { %1758 = dma.vmem_to_hbm [thread:$0]  %s1753_s19, 64, %s3196_s13, [#allocation18], %s2577_s26, %s2577_s26, %s2578_s15  }
0x1ffe   :  { %s2595_s29 = smov [#allocation16]  }
0x1fff   :  { %s1728_s9 = sshll.u32 %s2595_s29, 4  ;;  %s1729_s9 = int_to_ptr.vmem [resolvable:$true] %s1728_s9 }
0x2000   :  { %s2538_s4 = scalar_lea.vmem %s1729_s9, 128  ;;  %p2543_p11 = scmp.lt.s32.totalorder %s1729_s9, %s1729_s9 }
0x2001   :  { %p2539_p10 = scmp.ne.s32.totalorder %s1729_s9, %s2538_s4  ;;  %p2544_p12 = scmp.lt.s32.totalorder %s2538_s4, %s2538_s4 }
0x2003   :  { %p2545_p13 = por %p2544_p12, %p2543_p11 }
0x2005   :  { %p2546_p0 = pnand %p2545_p13, %p2539_p10 }
0x20b3   :  { %v1702_v18 = vpop.f32.mrb[10].mxu1 }
0x20b4   :  { %v1703_v22 = vadd.f32 %v2975_v37, %v1702_v18  ;;  %v2095_v23 = vpop.f32.mrb[11].mxu1 }
0x20b6   :  { %1707 = vst [vmem:[#allocation16 + $0x6] sm:$0x3] %v1703_v22 }
0x20b7   :  { %2549 = shalt.err (!%p2546_p0)
}
0x20b8   :  { %s2550_s30 = scalar_lea.hbm %s3194_s11, 128 }
0x20b9   :  { %p2551_p1 = scmp.ne.s32.totalorder %s3194_s11, %s2550_s30  ;;  %p2554_p2 = scmp.lt.u32.totalorder %s2550_s30, %s3194_s11 }
0x20bb   :  { %p2556_p3 = pnand %p2554_p2, %p2551_p1 }
0x20bd   :  { %2559 = shalt.err (!%p2556_p3)
}
0x20be   :  { %1734 = dma.vmem_to_hbm [thread:$0]  %s1729_s9, 128, %s3194_s11, [#allocation4], %s2577_s26, %s2577_s26, %s2578_s15  }
0x20bf   :  { %2570 = dma.done.wait [#allocation4], 128  }
0x20c0   :  { %2571 = vsyncadd [#allocation4], 4294967168 }
0x20c1   :  { %2572 = dma.done.wait [#allocation18], 128  }
0x20c2   :  { %2573 = vsyncadd [#allocation18], 4294967168 }
0x20c3   :  { %1768 = vsyncpa [#allocation3], 1 }
0x20c4   :  { %1769 = vsyncpa [#allocation6], 1 }
0x20c5   :  { %1770 = vsyncpa [#allocation9], 1 }
0x20c6   :  { %1771 = vsyncpa [#allocation12], 1 }
0x20c7   :  { %1772 = vsyncpa [#allocation15], 1 }
0x20c8   :  { %1773 = vsyncpa [#allocation4], 1 }
0x20c9   :  { %1774 = vsyncpa [#allocation18], 1 }

// kernel: tpu_custom_call.1
= control target key start
LH: loop header
LB: loop body
LE: loop exit
PB: predicated region body
PF: predicated region fallthrough
CT: control target
= control target key end

     0   :  { %19 = vsyncpa [#allocation3], 0  ;;  %s3735_s0 = inlined_call_operand.hbm [shape: f32[4,2,128], index: 0, kind: input, shape index: {}]   ;;  %s3736_s1 = inlined_call_operand.vmem [shape: f32[2,8], index: 1, kind: input, shape index: {}]   ;;  %s3737_s2 = inlined_call_operand.hbm [shape: f32[2,8], index: 2, kind: input, shape index: {}]   ;;  %s3738_s3 = inlined_call_operand.hbm [shape: f32[2,8,32], index: 3, kind: input, shape index: {}]   ;;  %s3739_s4 = inlined_call_operand.hbm [shape: f32[2,2,32], index: 4, kind: input, shape index: {}]   ;;  %s3740_s5 = inlined_call_operand.hbm [shape: f32[2,2,32], index: 5, kind: input, shape index: {}]   ;;  %s3741_s6 = inlined_call_operand.hbm [shape: f32[1,32], index: 6, kind: input, shape index: {}]   ;;  %s3742_s7 = inlined_call_operand.hbm [shape: f32[2,64,128], index: 7, kind: input, shape index: {}]   ;;  %s3743_s8 = inlined_call_operand.hbm [shape: f32[2,1,128], index: 8, kind: input, shape index: {}]   ;;  %s3744_s9 = inlined_call_operand.vmem [shape: f32[32,128], index: 9, kind: input, shape index: {}]   ;;  %s3745_s10 = inlined_call_operand.vmem [shape: f32[1,128], index: 10, kind: input, shape index: {}]   ;;  %s3746_s11 = inlined_call_operand.hbm [shape: f32[4,2,128], index: 11, kind: output, shape index: {0}]   ;;  %s3747_s12 = inlined_call_operand.hbm [shape: f32[2,2,32], index: 12, kind: output, shape index: {1}]   ;;  %s3748_s13 = inlined_call_operand.hbm [shape: f32[2,2,32], index: 13, kind: output, shape index: {2}]  }
   0x1   :  { %20 = vsyncpa [#allocation6], 0 }
   0x2   :  { %21 = vsyncpa [#allocation9], 0 }
   0x3   :  { %22 = vsyncpa [#allocation12], 0 }
   0x4   :  { %23 = vsyncpa [#allocation15], 0 }
   0x5   :  { %24 = vsyncpa [#allocation4], 0 }
   0x6   :  { %25 = vsyncpa [#allocation18], 0  ;;  %s3138_s25 = smov [#allocation5]   ;;  %s2882_s29 = scalar_lea.hbm %s3737_s2, 32 }
   0x7   :  { %s46_s26 = sshll.u32 %s3138_s25, 4  ;;  %p2883_p0 = scmp.ne.s32.totalorder %s3737_s2, %s2882_s29  ;;  %s47_s26 = int_to_ptr.vmem [resolvable:$true] %s46_s26 }
   0x8   :  { %p2886_p1 = scmp.lt.u32.totalorder %s2882_s29, %s3737_s2 }
   0xa   :  { %p2888_p2 = pnand %p2886_p1, %p2883_p0 }
   0xc   :  { %2891 = shalt.err (!%p2888_p2)
}
   0xd   :  { %s2892_s17 = scalar_lea.vmem %s47_s26, 32  ;;  %p2897_p4 = scmp.lt.s32.totalorder %s47_s26, %s47_s26 }
   0xe   :  { %p2893_p3 = scmp.ne.s32.totalorder %s47_s26, %s2892_s17  ;;  %p2898_p5 = scmp.lt.s32.totalorder %s2892_s17, %s2892_s17 }
  0x10   :  { %p2899_p6 = por %p2898_p5, %p2897_p4 }
  0x12   :  { %p2900_p7 = pnand %p2899_p6, %p2893_p3 }
  0x14   :  { %2903 = shalt.err (!%p2900_p7)
}
  0x15   :  { %49 = dma.hbm_to_vmem [thread:$0]  %s3737_s2, 32, %s47_s26, [#allocation6]  }
  0x16   :  { %s3139_s20 = smov [#allocation8]   ;;  %s3140_s22 = smov [#allocation11]  }
  0x17   :  { %s67_s21 = sshll.u32 %s3139_s20, 4  ;;  %s92_s23 = sshll.u32 %s3140_s22, 4  ;;  %s68_s21 = int_to_ptr.vmem [resolvable:$true] %s67_s21  ;;  %s93_s23 = int_to_ptr.vmem [resolvable:$true] %s92_s23 }
  0x18   :  { %s2904_s27 = scalar_lea.hbm %s3739_s4, 64 }
  0x19   :  { %p2905_p8 = scmp.ne.s32.totalorder %s3739_s4, %s2904_s27  ;;  %p2908_p9 = scmp.lt.u32.totalorder %s2904_s27, %s3739_s4 }
  0x1b   :  { %p2910_p10 = pnand %p2908_p9, %p2905_p8 }
  0x1d   :  { %2913 = shalt.err (!%p2910_p10)
}
  0x1e   :  { %s2914_s2 = scalar_lea.vmem %s68_s21, 64  ;;  %p2919_p12 = scmp.lt.s32.totalorder %s68_s21, %s68_s21 }
  0x1f   :  { %p2915_p11 = scmp.ne.s32.totalorder %s68_s21, %s2914_s2  ;;  %p2920_p13 = scmp.lt.s32.totalorder %s2914_s2, %s2914_s2 }
  0x21   :  { %p2921_p0 = por %p2920_p13, %p2919_p12 }
  0x23   :  { %p2922_p1 = pnand %p2921_p0, %p2915_p11 }
  0x25   :  { %2925 = shalt.err (!%p2922_p1)
}
  0x26   :  { %s3141_s26 = smov 32   ;;  %s3142_s15 = smov 2  }
  0x27   :  { %73 = dma.hbm_to_vmem [thread:$0]  %s3739_s4, 64, %s68_s21, [#allocation9], %s3141_s26, %s3141_s26, %s3142_s15  }
  0x28   :  { %s2926_s20 = scalar_lea.hbm %s3741_s6, 16 }
  0x29   :  { %p2927_p2 = scmp.ne.s32.totalorder %s3741_s6, %s2926_s20  ;;  %p2930_p3 = scmp.lt.u32.totalorder %s2926_s20, %s3741_s6 }
  0x2b   :  { %p2932_p4 = pnand %p2930_p3, %p2927_p2 }
  0x2d   :  { %2935 = shalt.err (!%p2932_p4)
}
  0x2e   :  { %s2936_s28 = scalar_lea.vmem %s93_s23, 16  ;;  %s2940_s29 = scalar_lea.vmem %s93_s23, 32 }
  0x2f   :  { %p2937_p5 = scmp.ne.s32.totalorder %s93_s23, %s2936_s28  ;;  %p2941_p6 = scmp.lt.s32.totalorder %s93_s23, %s93_s23 }
  0x30   :  { %p2942_p7 = scmp.lt.s32.totalorder %s2940_s29, %s2936_s28 }
  0x32   :  { %p2943_p8 = por %p2942_p7, %p2941_p6 }
  0x34   :  { %p2944_p9 = pnand %p2943_p8, %p2937_p5 }
  0x36   :  { %2947 = shalt.err (!%p2944_p9)
}
  0x37   :  { %95 = dma.hbm_to_vmem [thread:$0]  %s3741_s6, 16, %s93_s23, [#allocation12]  }
  0x38   :  { %s3143_s30 = smov [#allocation2]   ;;  %s3144_s2 = smov [#allocation7]  }
  0x39   :  { %s31_s14 = sshll.u32 %s3143_s30, 4  ;;  %s55_s16 = sshll.u32 %s3144_s2, 4  ;;  %s32_s14 = int_to_ptr.vmem [resolvable:$true] %s31_s14  ;;  %s56_s16 = int_to_ptr.vmem [resolvable:$true] %s55_s16 }
  0x3a   :  { %s2948_s19 = scalar_lea.hbm %s3735_s0, 128 }
  0x3b   :  { %p2949_p10 = scmp.ne.s32.totalorder %s3735_s0, %s2948_s19  ;;  %p2952_p11 = scmp.lt.u32.totalorder %s2948_s19, %s3735_s0 }
  0x3d   :  { %p2954_p12 = pnand %p2952_p11, %p2949_p10 }
  0x3f   :  { %2957 = shalt.err (!%p2954_p12)
}
  0x40   :  { %s2958_s6 = scalar_lea.vmem %s32_s14, 128  ;;  %p2963_p0 = scmp.lt.s32.totalorder %s32_s14, %s32_s14 }
  0x41   :  { %p2959_p13 = scmp.ne.s32.totalorder %s32_s14, %s2958_s6  ;;  %p2964_p1 = scmp.lt.s32.totalorder %s2958_s6, %s2958_s6 }
  0x43   :  { %p2965_p2 = por %p2964_p1, %p2963_p0 }
  0x45   :  { %p2966_p3 = pnand %p2965_p2, %p2959_p13 }
  0x47   :  { %2969 = shalt.err (!%p2966_p3)
}
  0x48   :  { %37 = dma.hbm_to_vmem [thread:$0]  %s3735_s0, 128, %s32_s14, [#allocation3], %s3141_s26, %s3141_s26, %s3142_s15  }
  0x49   :  { %s2970_s4 = scalar_lea.hbm %s3738_s3, 256 }
  0x4a   :  { %p2971_p4 = scmp.ne.s32.totalorder %s3738_s3, %s2970_s4  ;;  %p2974_p5 = scmp.lt.u32.totalorder %s2970_s4, %s3738_s3 }
  0x4c   :  { %p2976_p6 = pnand %p2974_p5, %p2971_p4 }
  0x4e   :  { %2979 = shalt.err (!%p2976_p6)
}
  0x4f   :  { %s2980_s18 = scalar_lea.vmem %s56_s16, 256  ;;  %p2985_p8 = scmp.lt.s32.totalorder %s56_s16, %s56_s16 }
  0x50   :  { %p2981_p7 = scmp.ne.s32.totalorder %s56_s16, %s2980_s18  ;;  %p2986_p9 = scmp.lt.s32.totalorder %s2980_s18, %s2980_s18 }
  0x52   :  { %p2987_p10 = por %p2986_p9, %p2985_p8 }
  0x54   :  { %p2988_p11 = pnand %p2987_p10, %p2981_p7 }
  0x56   :  { %2991 = shalt.err (!%p2988_p11)
}
  0x57   :  { %s3145_s0 = smov 128   ;;  %s3146_s14 = smov 8  }
  0x58   :  { %61 = dma.hbm_to_vmem [thread:$0]  %s3738_s3, 256, %s56_s16, [#allocation6], %s3145_s0, %s3145_s0, %s3146_s14  }
  0x59   :  { %s3147_s22 = smov [#allocation10]   ;;  %s3148_s25 = smov [#allocation13]  }
  0x5a   :  { %s79_s24 = sshll.u32 %s3147_s22, 4  ;;  %s101_s6 = sshll.u32 %s3148_s25, 4  ;;  %s80_s24 = int_to_ptr.vmem [resolvable:$true] %s79_s24  ;;  %s102_s6 = int_to_ptr.vmem [resolvable:$true] %s101_s6 }
  0x5b   :  { %s2992_s28 = scalar_lea.hbm %s3740_s5, 64 }
  0x5c   :  { %p2993_p12 = scmp.ne.s32.totalorder %s3740_s5, %s2992_s28  ;;  %p2996_p13 = scmp.lt.u32.totalorder %s2992_s28, %s3740_s5 }
  0x5e   :  { %p2998_p0 = pnand %p2996_p13, %p2993_p12 }
  0x60   :  { %3001 = shalt.err (!%p2998_p0)
}
  0x61   :  { %s3002_s3 = scalar_lea.vmem %s80_s24, 64  ;;  %p3007_p2 = scmp.lt.s32.totalorder %s80_s24, %s80_s24 }
  0x62   :  { %p3003_p1 = scmp.ne.s32.totalorder %s80_s24, %s3002_s3  ;;  %p3008_p3 = scmp.lt.s32.totalorder %s3002_s3, %s3002_s3 }
  0x64   :  { %p3009_p4 = por %p3008_p3, %p3007_p2 }
  0x66   :  { %p3010_p5 = pnand %p3009_p4, %p3003_p1 }
  0x68   :  { %3013 = shalt.err (!%p3010_p5)
}
  0x69   :  { %85 = dma.hbm_to_vmem [thread:$0]  %s3740_s5, 64, %s80_s24, [#allocation9], %s3141_s26, %s3141_s26, %s3142_s15  }
  0x6a   :  { %s3014_s19 = scalar_lea.hbm %s3742_s7, 2048 }
  0x6b   :  { %p3015_p6 = scmp.ne.s32.totalorder %s3742_s7, %s3014_s19  ;;  %p3018_p7 = scmp.lt.u32.totalorder %s3014_s19, %s3742_s7 }
  0x6d   :  { %p3020_p8 = pnand %p3018_p7, %p3015_p6 }
  0x6f   :  { %3023 = shalt.err (!%p3020_p8)
}
  0x70   :  { %s3024_s27 = scalar_lea.vmem %s102_s6, 2048  ;;  %p3029_p10 = scmp.lt.s32.totalorder %s102_s6, %s102_s6 }
  0x71   :  { %p3025_p9 = scmp.ne.s32.totalorder %s102_s6, %s3024_s27  ;;  %p3030_p11 = scmp.lt.s32.totalorder %s3024_s27, %s3024_s27 }
  0x73   :  { %p3031_p12 = por %p3030_p11, %p3029_p10 }
  0x75   :  { %p3032_p13 = pnand %p3031_p12, %p3025_p9 }
  0x77   :  { %3035 = shalt.err (!%p3032_p13)
}
  0x78   :  { %107 = dma.hbm_to_vmem [thread:$0]  %s3742_s7, 2048, %s102_s6, [#allocation12], %s3145_s0, %s3145_s0, %s3146_s14  }
  0x79   :  { %s3149_s28 = smov [#allocation14]   ;;  %s3036_s30 = scalar_lea.hbm %s3743_s8, 32 }
  0x7a   :  { %s113_s29 = sshll.u32 %s3149_s28, 4  ;;  %p3037_p0 = scmp.ne.s32.totalorder %s3743_s8, %s3036_s30  ;;  %s114_s29 = int_to_ptr.vmem [resolvable:$true] %s113_s29 }
  0x7b   :  { %p3040_p1 = scmp.lt.u32.totalorder %s3036_s30, %s3743_s8 }
  0x7d   :  { %p3042_p2 = pnand %p3040_p1, %p3037_p0 }
  0x7f   :  { %3045 = shalt.err (!%p3042_p2)
}
  0x80   :  { %s3046_s18 = scalar_lea.vmem %s114_s29, 32  ;;  %p3051_p4 = scmp.lt.s32.totalorder %s114_s29, %s114_s29 }
  0x81   :  { %p3047_p3 = scmp.ne.s32.totalorder %s114_s29, %s3046_s18  ;;  %p3052_p5 = scmp.lt.s32.totalorder %s3046_s18, %s3046_s18 }
  0x83   :  { %p3053_p6 = por %p3052_p5, %p3051_p4 }
  0x85   :  { %p3054_p7 = pnand %p3053_p6, %p3047_p3 }
  0x87   :  { %3057 = shalt.err (!%p3054_p7)
}
  0x88   :  { %s3150_s7 = smov 16   ;;  %s3151_s0 = smov 1  }
  0x89   :  { %119 = dma.hbm_to_vmem [thread:$0]  %s3743_s8, 32, %s114_s29, [#allocation15], %s3150_s7, %s3150_s7, %s3151_s0  }
  0x8a   :  { %3124 = dma.done.wait [#allocation3], 128  }
  0x8b   :  { %3125 = vsyncadd [#allocation3], 4294967168 }
  0x8c   :  { %3126 = dma.done.wait [#allocation6], 288  }
  0x8d   :  { %3127 = vsyncadd [#allocation6], 4294967008 }
  0x8e   :  { %3128 = dma.done.wait [#allocation9], 128  }
  0x8f   :  { %3129 = vsyncadd [#allocation9], 4294967168 }
  0x90   :  { %3130 = dma.done.wait [#allocation12], 2064  }
  0x91   :  { %3131 = vsyncadd [#allocation12], 4294965232 }
  0x92   :  { %3132 = dma.done.wait [#allocation15], 32  }
  0x93   :  { %3133 = vsyncadd [#allocation15], 4294967264  ;;  %v3341_v0 = vld [vmem:[#allocation11] ss:$0 sm:$0xff]  ;;  %v3343_v1 = vld [vmem:[#allocation8 + $0x2] sm:$0x3]  ;;  %v185_v16 = vlaneseq }
  0x94   :  { %vm167_vm0 = vcmask 254976   ;;  %v166_v2 = vmul.f32 %v3341_v0, %v3343_v1  ;;  %v3348_v4 = vld [vmem:[#allocation5] sm:$0x3]  ;;  %v3353_v5 = vld [vmem:[%s3736_s1] sm:$0x3]  ;;  %vm173_vm2 = vcmask 58368  }
  0x95   :  { %vm152_vm1 = vcmp.gt.f32.partialorder %v3348_v4, 0.5  ;;  %v186_v17 = vshrl.u32 %v185_v16, 7  ;;  %v220_v18 = vld [vmem:[#allocation13 + $0x20] sm:$0xff]  ;;  %v221_v19 = vld [vmem:[#allocation13 + $0x28] sm:$0xff]  ;;  %v3152_v25 = vmov 0.0|0.0   ;;  %v222_v29 = vld [vmem:[#allocation13 + $0x30] sm:$0xff] }
  0x96   :  { %v168_v3 = vsel %vm167_vm0, %v166_v2, 0.0  ;;  %v3361_v20 = vpack.c.bf16 %v221_v19, %v220_v18  ;;  %v216_v21 = vld [vmem:[#allocation13] sm:$0xff]  ;;  %v217_v22 = vld [vmem:[#allocation13 + $0x8] sm:$0xff]  ;;  %2660 = vmatprep.subr.bf16.mxu0 %v3152_v25  ;;  %2666 = vmatprep.subr.bf16.mxu1 %v3152_v25  ;;  %v223_v30 = vld [vmem:[#allocation13 + $0x38] sm:$0xff]  ;;  %vm201_vm3 = vcmask 261120   ;;  %vm3153_vm4 = vmmov 0  }
  0x97   :  { %169 = vadd.xlane.f32.xlu0 %v168_v3  ;;  %v3363_v23 = vsub.s32 1, %v186_v17  ;;  %v3365_v24 = vsub.s32 0, %v186_v17  ;;  %v3369_v26 = vpack.c.bf16 %v217_v22, %v216_v21  ;;  %v3374_v31 = vpack.c.bf16 %v223_v30, %v222_v29  ;;  %v218_v32 = vld [vmem:[#allocation13 + $0x10] sm:$0xff]  ;;  %v219_v33 = vld [vmem:[#allocation13 + $0x18] sm:$0xff]  ;;  %v3394_v40 = vld [vmem:[#allocation7] sm:$0xff]  ;;  %s3155_s1 = smov 64  }
  0x98   :  { %2662 = vmatpush3.bf16.msra.mxu0 %v3361_v20  ;;  %v3379_v36 = vpack.c.bf16 %v219_v33, %v218_v32  ;;  %v154_v37 = vld [vmem:[#allocation8] sm:$0x3]  ;;  %v3154_v38 = vmov 0.0   ;;  %v3392_v39 = vld [vmem:[#allocation7 + $0x8] sm:$0xff]  ;;  %vm299_vm5 = vcmask 1041409   ;;  %v416_v22 = vld [vmem:[#allocation13 + $0x60] sm:$0xff] }
  0x99   :  { %2668 = vmatpush3.bf16.msra.mxu1 %v3369_v26  ;;  %2663 = vmatprep.subr.bf16.mxu0 %v3152_v25  ;;  %v3404_v63 = vld [vmem:[#allocation14] ss:$0 sm:$0xff]  ;;  %v413_v30 = vld [vmem:[#allocation13 + $0x48] sm:$0xff]  ;;  %v418_v32 = vld [vmem:[#allocation13 + $0x70] sm:$0xff]  ;;  %s3157_s4 = smov [#allocation17]  }
  0x9a   :  { %2669 = vmatprep.subr.bf16.mxu1 %v3152_v25  ;;  %2448 = vmatprep.mubr.msk.f32.mxu0 %vm3153_vm4, %v3154_v38  ;;  %v419_v33 = vld [vmem:[#allocation13 + $0x78] sm:$0xff]  ;;  %s2264_s21 = sshll.u32 %s3157_s4, 4  ;;  %s2265_s21 = int_to_ptr.vmem [resolvable:$true] %s2264_s21 }
  0x9b   :  { %2459 = vmatprep.mubr.msk.f32.mxu1 %vm3153_vm4, %v3154_v38  ;;  %s3058_s30 = scalar_lea.vmem %s2265_s21, 64  ;;  %p3063_p9 = scmp.lt.s32.totalorder %s2265_s21, %s2265_s21 }
  0x9c   :  { %2665 = vmatpush3.bf16.msra.mxu0 %v3374_v31  ;;  %p3059_p8 = scmp.ne.s32.totalorder %s2265_s21, %s3058_s30  ;;  %p3064_p10 = scmp.lt.s32.totalorder %s3058_s30, %s3058_s30 }
  0x9d   :  { %2671 = vmatpush3.bf16.msra.mxu1 %v3379_v36  ;;  %2672 = vmatprep.subr.bf16.mxu0 %v3152_v25 }
  0x9e   :  { %2678 = vmatprep.subr.bf16.mxu1 %v3152_v25  ;;  %p3065_p11 = por %p3064_p10, %p3063_p9 }
  0x9f   :  { %2449 = vmatmul.mubr.msk.f32.vlgmr.msra.gmra.mrb[0].mxu0 %vm201_vm3, %v154_v37  ;;  %v415_v37 = vld [vmem:[#allocation13 + $0x58] sm:$0xff] }
  0xa0   :  { %2470 = vmatprep.mubr.msk.f32.mxu0 %vm3153_vm4, %v3154_v38  ;;  %p3066_p12 = pnand %p3065_p11, %p3059_p8 }
 0x124   :  { %v170_v6 = vpop.xlane.xlu0 %169 }
 0x125   :  { %v171_v7 = vadd.f32 %v170_v6, %v3353_v5  ;;  %v381_v6 = vld [vmem:[#allocation2] sm:$0x3] }
 0x127   :  { %v172_v8 = vsel %vm152_vm1, %v171_v7, -1000000.0 }
 0x128   :  { %v174_v9 = vsel %vm173_vm2, %v172_v8, -inf }
 0x129   :  { %175 = vmax.xlane.f32.xlu0 %v174_v9 }
 0x172   :  { %v293_v60 = vpop.f32.mrb[0].mxu0 }
 0x173   :  { %v2450_v61 = vpop.f32.mrb[1].mxu0 }
 0x1b6   :  { %v176_v10 = vpop.xlane.xlu0 %175 }
 0x1b7   :  { %v177_v11 = vsub.f32 %v172_v8, %v176_v10  ;;  %v157_v10 = vld [vmem:[#allocation10] sm:$0x3] }
 0x1b9   :  { %v178_v12 = vmul.f32 1.442695, %v177_v11 }
 0x1bb   :  { %2802 = vpow2.f32 %v178_v12 }
 0x1c5   :  { %v2803_v13 = vpop.eup %2802 }
 0x1c6   :  { %v180_v14 = vsel %vm173_vm2, %v2803_v13, 0.0 }
 0x1c7   :  { %181 = vadd.xlane.f32.xlu1 %v180_v14 }
 0x254   :  { %v182_v15 = vpop.xlane.xlu1 %181 }
 0x255   :  { %2804 = vrcp.f32 %v182_v15 }
 0x25f   :  { %v2805_v27 = vpop.eup %2804 }
 0x260   :  { %v184_v28 = vmul.f32 %v2805_v27, %v2803_v13  ;;  %v417_v27 = vld [vmem:[#allocation13 + $0x68] sm:$0xff] }
 0x261   :  { %v3413_v29 = vpack.c.bf16 %v417_v27, %v416_v22 }
 0x262   :  { %v195_v34 = vrot.slane %v184_v28, %v3363_v23  ;;  %v188_v35 = vrot.slane %v184_v28, %v3365_v24  ;;  %v412_v28 = vld [vmem:[#allocation13 + $0x40] sm:$0xff] }
 0x263   :  { %2674 = vmatpush3.bf16.msra.mxu0 %v3413_v29 }
 0x264   :  { %197 = vbcast.lane.b32.xlu0 %v195_v34, 256  ;;  %190 = vbcast.lane.b32.xlu1 %v188_v35, 256  ;;  %v3415_v34 = vpack.c.bf16 %v413_v30, %v412_v28  ;;  %v414_v35 = vld [vmem:[#allocation13 + $0x50] sm:$0xff]  ;;  %v605_v30 = vld [vmem:[%s3744_s9] sm:$0xff] }
 0x265   :  { %2675 = vmatprep.subr.bf16.mxu0 %v3152_v25 }
 0x2d6   :  { %v198_v41 = vpop.permute.xlu0 %197  ;;  %v191_v42 = vpop.permute.xlu1 %190 }
 0x2d7   :  { %v200_v43 = vmul.f32 %v198_v41, %v3392_v39  ;;  %v199_v44 = vmul.f32 %v191_v42, %v3394_v40  ;;  %v3418_v41 = vpack.c.bf16 %v419_v33, %v418_v32  ;;  %v3422_v42 = vpack.c.bf16 %v415_v37, %v414_v35  ;;  %v606_v32 = vld [vmem:[%s3744_s9 + $0x8] sm:$0xff]  ;;  %v607_v37 = vld [vmem:[%s3744_s9 + $0x10] sm:$0xff] }
 0x2d8   :  { %v3479_v33 = vpack.c.bf16 %v606_v32, %v605_v30 }
 0x2d9   :  { %v209_v45 = vsel %vm201_vm3, %v200_v43, 0.0  ;;  %v202_v46 = vsel %vm201_vm3, %v199_v44, 0.0  ;;  %2677 = vmatpush3.bf16.msra.mxu0 %v3418_v41 }
 0x2da   :  { %v210_v47 = vrot.slane %v209_v45, 4  ;;  %v203_v48 = vrot.slane %v202_v46, 4  ;;  %2684 = vmatprep.subr.bf16.mxu0 %v3152_v25 }
 0x2dc   :  { %v211_v49 = vadd.f32 %v210_v47, %v209_v45  ;;  %v204_v50 = vadd.f32 %v203_v48, %v202_v46  ;;  %2471 = vmatmul.mubr.msk.f32.vlgmr.msra.gmra.mrb[2].mxu0 %vm201_vm3, %v3343_v1  ;;  %v159_v46 = vld [vmem:[#allocation10 + $0x2] sm:$0x3] }
 0x2dd   :  { %2492 = vmatprep.mubr.msk.f32.mxu0 %vm3153_vm4, %v3154_v38  ;;  %2686 = vmatpush3.bf16.msra.mxu0 %v3479_v33 }
 0x2de   :  { %v212_v51 = vrot.slane %v211_v49, 2  ;;  %v205_v52 = vrot.slane %v204_v50, 2  ;;  %2687 = vmatprep.subr.bf16.mxu0 %v3152_v25 }
 0x2e0   :  { %v213_v53 = vadd.f32 %v212_v51, %v211_v49  ;;  %v206_v54 = vadd.f32 %v205_v52, %v204_v50  ;;  %v3450_v50 = vld [vmem:[#allocation14 + $0x1] ss:$0 sm:$0xff] }
 0x2e2   :  { %v214_v55 = vrot.slane %v213_v53, 1  ;;  %v207_v56 = vrot.slane %v206_v54, 1 }
 0x2e4   :  { %v215_v57 = vadd.f32 %v214_v55, %v213_v53  ;;  %v208_v58 = vadd.f32 %v207_v56, %v206_v54 }
 0x2e6   :  { %v300_v59 = vsel %vm299_vm5, %v215_v57, %v208_v58 }
 0x2e7   :  { %2460 = vmatmul.mubr.msk.f32.vlgmr.msra.gmra.mrb[0].mxu1 %vm201_vm3, %v300_v59 }
 0x2e8   :  { %2481 = vmatprep.mubr.msk.f32.mxu1 %vm3153_vm4, %v3154_v38  ;;  %2680 = vmatpush3.bf16.msra.mxu1 %v3415_v34 }
 0x2e9   :  { %2681 = vmatprep.subr.bf16.mxu1 %v3152_v25 }
 0x2ec   :  { %2683 = vmatpush3.bf16.msra.mxu1 %v3422_v42 }
 0x2ed   :  { %2690 = vmatprep.subr.bf16.mxu1 %v3152_v25 }
 0x3af   :  { %v489_v47 = vpop.f32.mrb[2].mxu0 }
 0x3b0   :  { %v2472_v48 = vpop.f32.mrb[3].mxu0 }
 0x3ba   :  { %v369_v62 = vpop.f32.mrb[0].mxu1 }
 0x3bb   :  { %v370_v2 = vadd.f32 %v369_v62, %v293_v60  ;;  %v2461_v3 = vpop.f32.mrb[1].mxu1 }
 0x3bd   :  { %v380_v7 = vadd.f32 %v3404_v63, %v370_v2 }
 0x3bf   :  { %v382_v8 = vadd.f32 %v381_v6, %v380_v7 }
 0x3c1   :  { %2806 = vtanh.f32 %v382_v8  ;;  %v2303_v11 = vmul.f32 -1.442695, %v382_v8 }
 0x3c3   :  { %2808 = vpow2.f32 %v2303_v11 }
 0x3cb   :  { %v2807_v9 = vpop.eup %2806 }
 0x3cc   :  { %396 = vrot.lane.b32.xlu1 %v2807_v9, %s3141_s26 }
 0x3cd   :  { %v2809_v12 = vpop.eup %2808 }
 0x3ce   :  { %v386_v13 = vadd.f32 1.0, %v2809_v12 }
 0x3d0   :  { %391 = vrot.lane.b32.xlu1 %v157_v10, %s3141_s26  ;;  %2810 = vrcp.f32 %v386_v13 }
 0x3da   :  { %v2811_v14 = vpop.eup %2810 }
 0x43e   :  { %v397_v15 = vpop.permute.xlu1 %396 }
 0x43f   :  { %v399_v16 = vmul.f32 %v2811_v14, %v397_v15 }
 0x441   :  { %401 = vrot.lane.b32.xlu1 %v399_v16, %s3141_s26 }
 0x442   :  { %v392_v17 = vpop.permute.xlu1 %391 }
 0x443   :  { %v394_v18 = vmul.f32 %v2811_v14, %v392_v17 }
 0x4b3   :  { %v402_v19 = vpop.permute.xlu1 %401 }
 0x4b4   :  { %v3410_v21 = vadd.f32 %v402_v19, %v394_v18 }
 0x4b6   :  { %2812 = vtanh.f32 %v3410_v21 }
 0x4c0   :  { %v2813_v43 = vpop.eup %2812 }
 0x4c1   :  { %407 = vrot.lane.b32.xlu0 %v2813_v43, %s3141_s26  ;;  %v608_v43 = vld [vmem:[%s3744_s9 + $0x18] sm:$0xff] }
 0x533   :  { %v408_v44 = vpop.permute.xlu0 %407 }
 0x534   :  { %v410_v45 = vmul.f32 %v2811_v14, %v408_v44  ;;  %v3489_v44 = vpack.c.bf16 %v608_v43, %v607_v37 }
 0x536   :  { %494 = vrot.lane.b32.xlu1 %v410_v45, %s3155_s1  ;;  %2689 = vmatpush3.bf16.msra.mxu0 %v3489_v44 }
 0x537   :  { %2696 = vmatprep.subr.bf16.mxu0 %v3152_v25 }
 0x53a   :  { %585 = vrot.lane.b32.xlu1 %v159_v46, %s3141_s26 }
 0x5a8   :  { %v495_v49 = vpop.permute.xlu1 %494 }
 0x5a9   :  { %2482 = vmatmul.mubr.msk.f32.vlgmr.msra.gmra.mrb[2].mxu1 %vm201_vm3, %v495_v49 }
 0x5aa   :  { %2692 = vmatpush3.bf16.msra.mxu1 %v3361_v20  ;;  %2503 = vmatprep.mubr.msk.f32.mxu1 %vm3153_vm4, %v3154_v38 }
 0x5ab   :  { %2693 = vmatprep.subr.bf16.mxu1 %v3152_v25 }
 0x5ac   :  { %v586_v2 = vpop.permute.xlu1 %585 }
 0x5ae   :  { %2695 = vmatpush3.bf16.msra.mxu1 %v3374_v31 }
 0x5af   :  { %2702 = vmatprep.subr.bf16.mxu1 %v3152_v25 }
 0x5b1   :  { %2504 = vmatmul.mubr.msk.f32.vlgmr.msra.gmra.mrb[4].mxu1 %vm201_vm3, %v495_v49 }
 0x5b2   :  { %2704 = vmatpush3.bf16.msra.mxu1 %v3413_v29  ;;  %2525 = vmatprep.mubr.msk.f32.mxu1 %vm3153_vm4, %v3154_v38 }
 0x5b3   :  { %2705 = vmatprep.subr.bf16.mxu1 %v3152_v25 }
 0x5b6   :  { %2707 = vmatpush3.bf16.msra.mxu1 %v3418_v41 }
 0x5b7   :  { %2714 = vmatprep.subr.bf16.mxu1 %v3152_v25 }
 0x67c   :  { %v564_v1 = vpop.f32.mrb[2].mxu1 }
 0x67d   :  { %v565_v51 = vadd.f32 %v564_v1, %v489_v47  ;;  %v2483_v52 = vpop.f32.mrb[3].mxu1 }
 0x67f   :  { %v576_v53 = vadd.f32 %v3450_v50, %v565_v51 }
 0x681   :  { %2814 = vtanh.f32 %v576_v53  ;;  %v2307_v57 = vmul.f32 -1.442695, %v576_v53 }
 0x683   :  { %2816 = vpow2.f32 %v2307_v57 }
 0x684   :  { %v3453_v54 = vpop.f32.mrb[4].mxu1 }
 0x685   :  { %v2505_v55 = vpop.f32.mrb[5].mxu1 }
 0x68b   :  { %v2815_v56 = vpop.eup %2814 }
 0x68c   :  { %590 = vrot.lane.b32.xlu0 %v2815_v56, %s3141_s26 }
 0x68d   :  { %v2817_v58 = vpop.eup %2816 }
 0x68e   :  { %v580_v59 = vadd.f32 1.0, %v2817_v58 }
 0x690   :  { %2818 = vrcp.f32 %v580_v59 }
 0x69a   :  { %v2819_v60 = vpop.eup %2818 }
 0x69b   :  { %v588_v3 = vmul.f32 %v2819_v60, %v586_v2 }
 0x6fe   :  { %v591_v61 = vpop.permute.xlu0 %590 }
 0x6ff   :  { %v593_v62 = vmul.f32 %v2819_v60, %v591_v61 }
 0x701   :  { %595 = vrot.lane.b32.xlu0 %v593_v62, %s3141_s26 }
 0x705   :  { %692 = vrot.lane.b32.xlu0 %v3341_v0, %s3155_s1 }
 0x773   :  { %v596_v6 = vpop.permute.xlu0 %595 }
 0x774   :  { %v3459_v7 = vadd.f32 %v596_v6, %v588_v3 }
 0x776   :  { %2820 = vtanh.f32 %v3459_v7 }
 0x777   :  { %v3463_v10 = vpop.permute.xlu0 %692 }
 0x780   :  { %v2821_v8 = vpop.eup %2820 }
 0x781   :  { %601 = vrot.lane.b32.xlu1 %v2821_v8, %s3141_s26 }
 0x7f3   :  { %v602_v9 = vpop.permute.xlu1 %601 }
 0x7f4   :  { %v604_v11 = vmul.f32 %v2819_v60, %v602_v9 }
 0x7f6   :  { %v695_v12 = vmul.f32 %v3463_v10, %v604_v11 }
 0x7f8   :  { %697 = vrot.lane.b32.xlu1 %v695_v12, %s3155_s1 }
 0x86a   :  { %v698_v13 = vpop.permute.xlu1 %697 }
 0x86b   :  { %v700_v0 = vsel %vm167_vm0, %v698_v13, 0.0  ;;  %v3525_v13 = vld [vmem:[%s3745_s10] ss:$0 sm:$0xff]  ;;  %s3156_s10 = smov 96  }
 0x86c   :  { %701 = vadd.xlane.f32.xlu0 %v700_v0 }
 0x8f9   :  { %v702_v14 = vpop.xlane.xlu0 %701 }
 0x8fa   :  { %v703_v15 = vadd.f32 %v702_v14, %v3353_v5 }
 0x8fc   :  { %v704_v16 = vsel %vm152_vm1, %v703_v15, -1000000.0 }
 0x8fd   :  { %v705_v17 = vsel %vm173_vm2, %v704_v16, -inf }
 0x8fe   :  { %706 = vmax.xlane.f32.xlu1 %v705_v17 }
 0x98b   :  { %v707_v18 = vpop.xlane.xlu1 %706 }
 0x98c   :  { %v708_v19 = vsub.f32 %v704_v16, %v707_v18 }
 0x98e   :  { %v709_v22 = vmul.f32 1.442695, %v708_v19 }
 0x990   :  { %2822 = vpow2.f32 %v709_v22 }
 0x99a   :  { %v2823_v27 = vpop.eup %2822 }
 0x99b   :  { %v711_v28 = vsel %vm173_vm2, %v2823_v27, 0.0 }
 0x99c   :  { %712 = vadd.xlane.f32.xlu0 %v711_v28 }
 0xa29   :  { %v713_v35 = vpop.xlane.xlu0 %712 }
 0xa2a   :  { %2824 = vrcp.f32 %v713_v35 }
 0xa34   :  { %v2825_v45 = vpop.eup %2824 }
 0xa35   :  { %v715_v46 = vmul.f32 %v2825_v45, %v2823_v27  ;;  %v908_v27 = vld [vmem:[#allocation2 + $0x2] sm:$0x3] }
 0xa37   :  { %v726_v47 = vrot.slane %v715_v46, %v3363_v23  ;;  %v719_v48 = vrot.slane %v715_v46, %v3365_v24 }
 0xa39   :  { %728 = vbcast.lane.b32.xlu1 %v726_v47, 256  ;;  %721 = vbcast.lane.b32.xlu0 %v719_v48, 256 }
 0xa3d   :  { %617 = vrot.lane.b32.xlu1 %v604_v11, %s3155_s1 }
 0xaab   :  { %v729_v49 = vpop.permute.xlu1 %728  ;;  %v722_v1 = vpop.permute.xlu0 %721 }
 0xaac   :  { %v731_v51 = vmul.f32 %v729_v49, %v3392_v39  ;;  %v730_v52 = vmul.f32 %v722_v1, %v3394_v40 }
 0xaae   :  { %v739_v53 = vsel %vm201_vm3, %v731_v51, 0.0  ;;  %v732_v55 = vsel %vm201_vm3, %v730_v52, 0.0 }
 0xaaf   :  { %v740_v56 = vrot.slane %v739_v53, 4  ;;  %v733_v57 = vrot.slane %v732_v55, 4  ;;  %v618_v58 = vpop.permute.xlu1 %617 }
 0xab0   :  { %2493 = vmatmul.mubr.msk.f32.vlgmr.msra.gmra.mrb[4].mxu0 %vm201_vm3, %v618_v58  ;;  %2526 = vmatmul.mubr.msk.f32.vlgmr.msra.gmra.mrb[6].mxu1 %vm201_vm3, %v618_v58 }
 0xab1   :  { %v741_v59 = vadd.f32 %v740_v56, %v739_v53  ;;  %v734_v60 = vadd.f32 %v733_v57, %v732_v55  ;;  %2698 = vmatpush3.bf16.msra.mxu0 %v3369_v26  ;;  %2514 = vmatprep.mubr.msk.f32.mxu0 %vm3153_vm4, %v3154_v38 }
 0xab2   :  { %2699 = vmatprep.subr.bf16.mxu0 %v3152_v25  ;;  %2716 = vmatpush3.bf16.msra.mxu1 %v3479_v33 }
 0xab3   :  { %v742_v61 = vrot.slane %v741_v59, 2  ;;  %v735_v62 = vrot.slane %v734_v60, 2  ;;  %2717 = vmatprep.subr.bf16.mxu1 %v3152_v25  ;;  %2547 = vmatprep.mubr.msk.f32.mxu1 %vm3153_vm4, %v3154_v38 }
 0xab5   :  { %v743_v2 = vadd.f32 %v742_v61, %v741_v59  ;;  %v736_v3 = vadd.f32 %v735_v62, %v734_v60  ;;  %2701 = vmatpush3.bf16.msra.mxu0 %v3379_v36 }
 0xab6   :  { %2708 = vmatprep.subr.bf16.mxu0 %v3152_v25  ;;  %2719 = vmatpush3.bf16.msra.mxu1 %v3489_v44 }
 0xab7   :  { %v744_v6 = vrot.slane %v743_v2, 1  ;;  %v737_v8 = vrot.slane %v736_v3, 1  ;;  %2726 = vmatprep.subr.bf16.mxu1 %v3152_v25 }
 0xab9   :  { %v745_v9 = vadd.f32 %v744_v6, %v743_v2  ;;  %v738_v11 = vadd.f32 %v737_v8, %v736_v3 }
 0xabb   :  { %v826_v12 = vsel %vm299_vm5, %v745_v9, %v738_v11 }
 0xabc   :  { %2515 = vmatmul.mubr.msk.f32.vlgmr.msra.gmra.mrb[6].mxu0 %vm201_vm3, %v826_v12 }
 0xabd   :  { %2710 = vmatpush3.bf16.msra.mxu0 %v3415_v34  ;;  %2536 = vmatprep.mubr.msk.f32.mxu0 %vm3153_vm4, %v3154_v38 }
 0xabe   :  { %2711 = vmatprep.subr.bf16.mxu0 %v3152_v25 }
 0xac1   :  { %2713 = vmatpush3.bf16.msra.mxu0 %v3422_v42 }
 0xac2   :  { %2720 = vmatprep.subr.bf16.mxu0 %v3152_v25 }
 0xb83   :  { %v687_v0 = vpop.f32.mrb[4].mxu0  ;;  %v1008_v14 = vpop.f32.mrb[6].mxu1 }
 0xb84   :  { %v688_v15 = vadd.f32 %v3525_v13, %v687_v0  ;;  %v2494_v16 = vpop.f32.mrb[5].mxu0  ;;  %v2527_v17 = vpop.f32.mrb[7].mxu1 }
 0xb86   :  { %691 = vst [vmem:[#allocation16] sm:$0x3] %v688_v15 }
 0xb8f   :  { %v895_v18 = vpop.f32.mrb[6].mxu0 }
 0xb90   :  { %v896_v19 = vadd.f32 %v895_v18, %v3453_v54  ;;  %v2516_v22 = vpop.f32.mrb[7].mxu0 }
 0xb92   :  { %v906_v28 = vadd.f32 %v3404_v63, %v896_v19 }
 0xb94   :  { %v909_v30 = vadd.f32 %v908_v27, %v906_v28 }
 0xb96   :  { %2826 = vtanh.f32 %v909_v30  ;;  %v2313_v35 = vmul.f32 -1.442695, %v909_v30 }
 0xb98   :  { %2828 = vpow2.f32 %v2313_v35 }
 0xba0   :  { %v2827_v32 = vpop.eup %2826 }
 0xba1   :  { %919 = vrot.lane.b32.xlu0 %v2827_v32, %s3141_s26 }
 0xba2   :  { %v2829_v37 = vpop.eup %2828 }
 0xba3   :  { %v913_v43 = vadd.f32 1.0, %v2829_v37 }
 0xba5   :  { %2830 = vrcp.f32 %v913_v43 }
 0xbaf   :  { %v2831_v45 = vpop.eup %2830 }
 0xbb0   :  { %v917_v54 = vmul.f32 %v2831_v45, %v3410_v21 }
 0xc13   :  { %v920_v46 = vpop.permute.xlu0 %919 }
 0xc14   :  { %v922_v47 = vmul.f32 %v2831_v45, %v920_v46 }
 0xc16   :  { %924 = vrot.lane.b32.xlu1 %v922_v47, %s3141_s26 }
 0xc88   :  { %v925_v48 = vpop.permute.xlu1 %924 }
 0xc89   :  { %v3533_v49 = vadd.f32 %v925_v48, %v917_v54 }
 0xc8b   :  { %2832 = vtanh.f32 %v3533_v49 }
 0xc95   :  { %v2833_v1 = vpop.eup %2832 }
 0xc96   :  { %930 = vrot.lane.b32.xlu0 %v2833_v1, %s3141_s26 }
 0xd08   :  { %v931_v51 = vpop.permute.xlu0 %930 }
 0xd09   :  { %v933_v52 = vmul.f32 %v2831_v45, %v931_v51 }
 0xd0b   :  { %1013 = vrot.lane.b32.xlu1 %v933_v52, %s3155_s1 }
 0xd7d   :  { %v1014_v53 = vpop.permute.xlu1 %1013 }
 0xd7e   :  { %2537 = vmatmul.mubr.msk.f32.vlgmr.msra.gmra.mrb[8].mxu0 %vm201_vm3, %v1014_v53 }
 0xd7f   :  { %2722 = vmatpush3.bf16.msra.mxu0 %v3361_v20  ;;  %2558 = vmatprep.mubr.msk.f32.mxu0 %vm3153_vm4, %v3154_v38 }
 0xd80   :  { %2723 = vmatprep.subr.bf16.mxu0 %v3152_v25 }
 0xd83   :  { %2725 = vmatpush3.bf16.msra.mxu0 %v3374_v31 }
 0xd84   :  { %2732 = vmatprep.subr.bf16.mxu0 %v3152_v25 }
 0xd86   :  { %2559 = vmatmul.mubr.msk.f32.vlgmr.msra.gmra.mrb[10].mxu0 %vm201_vm3, %v1014_v53 }
 0xd87   :  { %2734 = vmatpush3.bf16.msra.mxu0 %v3413_v29  ;;  %2580 = vmatprep.mubr.msk.f32.mxu0 %vm3153_vm4, %v3154_v38 }
 0xd88   :  { %2735 = vmatprep.subr.bf16.mxu0 %v3152_v25 }
 0xd8b   :  { %2737 = vmatpush3.bf16.msra.mxu0 %v3418_v41 }
 0xd8c   :  { %2744 = vmatprep.subr.bf16.mxu0 %v3152_v25 }
 0xe51   :  { %v1083_v21 = vpop.f32.mrb[8].mxu0 }
 0xe52   :  { %v1084_v55 = vadd.f32 %v1083_v21, %v1008_v14  ;;  %v2538_v56 = vpop.f32.mrb[9].mxu0 }
 0xe54   :  { %v1094_v57 = vadd.f32 %v3450_v50, %v1084_v55 }
 0xe56   :  { %2834 = vtanh.f32 %v1094_v57  ;;  %v2317_v61 = vmul.f32 -1.442695, %v1094_v57 }
 0xe58   :  { %2836 = vpow2.f32 %v2317_v61 }
 0xe59   :  { %v3553_v58 = vpop.f32.mrb[10].mxu0 }
 0xe5a   :  { %v2560_v59 = vpop.f32.mrb[11].mxu0 }
 0xe60   :  { %v2835_v60 = vpop.eup %2834 }
 0xe61   :  { %1104 = vrot.lane.b32.xlu0 %v2835_v60, %s3141_s26 }
 0xe62   :  { %v2837_v62 = vpop.eup %2836 }
 0xe63   :  { %v1098_v2 = vadd.f32 1.0, %v2837_v62 }
 0xe65   :  { %2838 = vrcp.f32 %v1098_v2 }
 0xe6f   :  { %v2839_v3 = vpop.eup %2838 }
 0xe70   :  { %v1102_v9 = vmul.f32 %v2839_v3, %v3459_v7 }
 0xed3   :  { %v1105_v6 = vpop.permute.xlu0 %1104 }
 0xed4   :  { %v1107_v8 = vmul.f32 %v2839_v3, %v1105_v6 }
 0xed6   :  { %1109 = vrot.lane.b32.xlu1 %v1107_v8, %s3141_s26 }
 0xf48   :  { %v1110_v11 = vpop.permute.xlu1 %1109 }
 0xf49   :  { %v3558_v12 = vadd.f32 %v1110_v11, %v1102_v9 }
 0xf4b   :  { %2840 = vtanh.f32 %v3558_v12 }
 0xf55   :  { %v2841_v0 = vpop.eup %2840 }
 0xf56   :  { %1115 = vrot.lane.b32.xlu0 %v2841_v0, %s3141_s26 }
 0xfc8   :  { %v1116_v14 = vpop.permute.xlu0 %1115 }
 0xfc9   :  { %v1118_v15 = vmul.f32 %v2839_v3, %v1116_v14 }
 0xfcb   :  { %v1207_v16 = vmul.f32 %v1118_v15, %v3463_v10 }
 0xfcd   :  { %1209 = vrot.lane.b32.xlu1 %v1207_v16, %s3155_s1 }
0x103f   :  { %v1210_v17 = vpop.permute.xlu1 %1209 }
0x1040   :  { %v1212_v18 = vsel %vm167_vm0, %v1210_v17, 0.0 }
0x1041   :  { %1213 = vadd.xlane.f32.xlu0 %v1212_v18 }
0x10ce   :  { %v1214_v19 = vpop.xlane.xlu0 %1213 }
0x10cf   :  { %v1215_v7 = vadd.f32 %v1214_v19, %v3353_v5 }
0x10d1   :  { %v1216_v22 = vsel %vm152_vm1, %v1215_v7, -1000000.0 }
0x10d2   :  { %v1217_v27 = vsel %vm173_vm2, %v1216_v22, -inf }
0x10d3   :  { %1218 = vmax.xlane.f32.xlu1 %v1217_v27  ;;  %v1420_v27 = vld [vmem:[#allocation2 + $0x4] sm:$0x3] }
0x1160   :  { %v1219_v28 = vpop.xlane.xlu1 %1218 }
0x1161   :  { %v1220_v30 = vsub.f32 %v1216_v22, %v1219_v28 }
0x1163   :  { %v1221_v32 = vmul.f32 1.442695, %v1220_v30 }
0x1165   :  { %2842 = vpow2.f32 %v1221_v32 }
0x116f   :  { %v2843_v35 = vpop.eup %2842 }
0x1170   :  { %v1223_v37 = vsel %vm173_vm2, %v2843_v35, 0.0 }
0x1171   :  { %1224 = vadd.xlane.f32.xlu0 %v1223_v37 }
0x11fe   :  { %v1225_v43 = vpop.xlane.xlu0 %1224 }
0x11ff   :  { %2844 = vrcp.f32 %v1225_v43 }
0x1209   :  { %v2845_v45 = vpop.eup %2844 }
0x120a   :  { %v1227_v46 = vmul.f32 %v2845_v45, %v2843_v35 }
0x120c   :  { %v1238_v47 = vrot.slane %v1227_v46, %v3363_v23  ;;  %v1231_v54 = vrot.slane %v1227_v46, %v3365_v24 }
0x120e   :  { %1240 = vbcast.lane.b32.xlu1 %v1238_v47, 256  ;;  %1233 = vbcast.lane.b32.xlu0 %v1231_v54, 256 }
0x1212   :  { %1131 = vrot.lane.b32.xlu1 %v1118_v15, %s3155_s1 }
0x1280   :  { %v1241_v48 = vpop.permute.xlu1 %1240  ;;  %v1234_v1 = vpop.permute.xlu0 %1233 }
0x1281   :  { %v1243_v51 = vmul.f32 %v1241_v48, %v3392_v39  ;;  %v1242_v52 = vmul.f32 %v1234_v1, %v3394_v40 }
0x1283   :  { %v1251_v53 = vsel %vm201_vm3, %v1243_v51, 0.0  ;;  %v1244_v21 = vsel %vm201_vm3, %v1242_v52, 0.0 }
0x1284   :  { %v1252_v55 = vrot.slane %v1251_v53, 4  ;;  %v1245_v56 = vrot.slane %v1244_v21, 4  ;;  %v1132_v57 = vpop.permute.xlu1 %1131 }
0x1285   :  { %2548 = vmatmul.mubr.msk.f32.vlgmr.msra.gmra.mrb[8].mxu1 %vm201_vm3, %v1132_v57  ;;  %2581 = vmatmul.mubr.msk.f32.vlgmr.msra.gmra.mrb[12].mxu0 %vm201_vm3, %v1132_v57 }
0x1286   :  { %v1253_v59 = vadd.f32 %v1252_v55, %v1251_v53  ;;  %v1246_v60 = vadd.f32 %v1245_v56, %v1244_v21  ;;  %2728 = vmatpush3.bf16.msra.mxu1 %v3369_v26  ;;  %2569 = vmatprep.mubr.msk.f32.mxu1 %vm3153_vm4, %v3154_v38 }
0x1287   :  { %2729 = vmatprep.subr.bf16.mxu1 %v3152_v25  ;;  %2746 = vmatpush3.bf16.msra.mxu0 %v3479_v33 }
0x1288   :  { %v1254_v61 = vrot.slane %v1253_v59, 2  ;;  %v1247_v62 = vrot.slane %v1246_v60, 2  ;;  %2747 = vmatprep.subr.bf16.mxu0 %v3152_v25  ;;  %2602 = vmatprep.mubr.msk.f32.mxu0 %vm3153_vm4, %v3154_v38 }
0x128a   :  { %v1255_v2 = vadd.f32 %v1254_v61, %v1253_v59  ;;  %v1248_v3 = vadd.f32 %v1247_v62, %v1246_v60  ;;  %2731 = vmatpush3.bf16.msra.mxu1 %v3379_v36 }
0x128b   :  { %2738 = vmatprep.subr.bf16.mxu1 %v3152_v25  ;;  %2749 = vmatpush3.bf16.msra.mxu0 %v3489_v44 }
0x128c   :  { %v1256_v6 = vrot.slane %v1255_v2, 1  ;;  %v1249_v8 = vrot.slane %v1248_v3, 1  ;;  %2756 = vmatprep.subr.bf16.mxu0 %v3152_v25 }
0x128e   :  { %v1257_v9 = vadd.f32 %v1256_v6, %v1255_v2  ;;  %v1250_v11 = vadd.f32 %v1249_v8, %v1248_v3 }
0x1290   :  { %v1338_v0 = vsel %vm299_vm5, %v1257_v9, %v1250_v11 }
0x1291   :  { %2570 = vmatmul.mubr.msk.f32.vlgmr.msra.gmra.mrb[10].mxu1 %vm201_vm3, %v1338_v0 }
0x1292   :  { %2740 = vmatpush3.bf16.msra.mxu1 %v3415_v34  ;;  %2591 = vmatprep.mubr.msk.f32.mxu1 %vm3153_vm4, %v3154_v38 }
0x1293   :  { %2741 = vmatprep.subr.bf16.mxu1 %v3152_v25 }
0x1296   :  { %2743 = vmatpush3.bf16.msra.mxu1 %v3422_v42 }
0x1297   :  { %2750 = vmatprep.subr.bf16.mxu1 %v3152_v25 }
0x1358   :  { %v1201_v14 = vpop.f32.mrb[8].mxu1  ;;  %v1520_v15 = vpop.f32.mrb[12].mxu0 }
0x1359   :  { %v1202_v16 = vadd.f32 %v3525_v13, %v1201_v14  ;;  %v2549_v17 = vpop.f32.mrb[9].mxu1  ;;  %v2582_v18 = vpop.f32.mrb[13].mxu0 }
0x135b   :  { %1206 = vst [vmem:[#allocation16 + $0x2] sm:$0x3] %v1202_v16 }
0x1364   :  { %v1407_v19 = vpop.f32.mrb[10].mxu1 }
0x1365   :  { %v1408_v7 = vadd.f32 %v1407_v19, %v3553_v58  ;;  %v2571_v22 = vpop.f32.mrb[11].mxu1 }
0x1367   :  { %v1418_v28 = vadd.f32 %v3404_v63, %v1408_v7 }
0x1369   :  { %v1421_v30 = vadd.f32 %v1420_v27, %v1418_v28 }
0x136b   :  { %2846 = vtanh.f32 %v1421_v30  ;;  %v2323_v35 = vmul.f32 -1.442695, %v1421_v30 }
0x136d   :  { %2848 = vpow2.f32 %v2323_v35 }
0x1375   :  { %v2847_v32 = vpop.eup %2846 }
0x1376   :  { %1431 = vrot.lane.b32.xlu0 %v2847_v32, %s3141_s26 }
0x1377   :  { %v2849_v37 = vpop.eup %2848 }
0x1378   :  { %v1425_v43 = vadd.f32 1.0, %v2849_v37 }
0x137a   :  { %2850 = vrcp.f32 %v1425_v43 }
0x1384   :  { %v2851_v45 = vpop.eup %2850 }
0x1385   :  { %v1429_v58 = vmul.f32 %v2851_v45, %v3533_v49 }
0x13e8   :  { %v1432_v46 = vpop.permute.xlu0 %1431 }
0x13e9   :  { %v1434_v47 = vmul.f32 %v2851_v45, %v1432_v46 }
0x13eb   :  { %1436 = vrot.lane.b32.xlu1 %v1434_v47, %s3141_s26 }
0x145d   :  { %v1437_v54 = vpop.permute.xlu1 %1436 }
0x145e   :  { %v3605_v48 = vadd.f32 %v1437_v54, %v1429_v58 }
0x1460   :  { %2852 = vtanh.f32 %v3605_v48 }
0x146a   :  { %v2853_v1 = vpop.eup %2852 }
0x146b   :  { %1442 = vrot.lane.b32.xlu0 %v2853_v1, %s3141_s26 }
0x14dd   :  { %v1443_v51 = vpop.permute.xlu0 %1442 }
0x14de   :  { %v1445_v52 = vmul.f32 %v2851_v45, %v1443_v51 }
0x14e0   :  { %1525 = vrot.lane.b32.xlu1 %v1445_v52, %s3155_s1 }
0x1552   :  { %v1526_v53 = vpop.permute.xlu1 %1525 }
0x1553   :  { %2592 = vmatmul.mubr.msk.f32.vlgmr.msra.gmra.mrb[12].mxu1 %vm201_vm3, %v1526_v53 }
0x1554   :  { %2752 = vmatpush3.bf16.msra.mxu1 %v3361_v20  ;;  %2613 = vmatprep.mubr.msk.f32.mxu1 %vm3153_vm4, %v3154_v38 }
0x1555   :  { %2753 = vmatprep.subr.bf16.mxu1 %v3152_v25 }
0x1558   :  { %2755 = vmatpush3.bf16.msra.mxu1 %v3374_v31 }
0x1559   :  { %2762 = vmatprep.subr.bf16.mxu1 %v3152_v25 }
0x155b   :  { %2614 = vmatmul.mubr.msk.f32.vlgmr.msra.gmra.mrb[14].mxu1 %vm201_vm3, %v1526_v53 }
0x155c   :  { %2764 = vmatpush3.bf16.msra.mxu1 %v3413_v29  ;;  %2635 = vmatprep.mubr.msk.f32.mxu1 %vm3153_vm4, %v3154_v38 }
0x155d   :  { %2765 = vmatprep.subr.bf16.mxu1 %v3152_v25 }
0x1560   :  { %2767 = vmatpush3.bf16.msra.mxu1 %v3418_v41 }
0x1561   :  { %2774 = vmatprep.subr.bf16.mxu1 %v3152_v25 }
0x1626   :  { %v1595_v20 = vpop.f32.mrb[12].mxu1 }
0x1627   :  { %v1596_v49 = vadd.f32 %v1595_v20, %v1520_v15  ;;  %v2593_v21 = vpop.f32.mrb[13].mxu1 }
0x1629   :  { %v1606_v31 = vadd.f32 %v3450_v50, %v1596_v49 }
0x162b   :  { %2854 = vtanh.f32 %v1606_v31  ;;  %v2327_v29 = vmul.f32 -1.442695, %v1606_v31 }
0x162d   :  { %2856 = vpow2.f32 %v2327_v29 }
0x162e   :  { %v3625_v55 = vpop.f32.mrb[14].mxu1 }
0x162f   :  { %v2615_v56 = vpop.f32.mrb[15].mxu1 }
0x1635   :  { %v2855_v57 = vpop.eup %2854 }
0x1636   :  { %1616 = vrot.lane.b32.xlu0 %v2855_v57, %s3141_s26 }
0x1637   :  { %v2857_v59 = vpop.eup %2856 }
0x1638   :  { %v1610_v60 = vadd.f32 1.0, %v2857_v59 }
0x163a   :  { %2858 = vrcp.f32 %v1610_v60  ;;  %v1932_v60 = vld [vmem:[#allocation2 + $0x6] sm:$0x3] }
0x1644   :  { %v2859_v41 = vpop.eup %2858 }
0x1645   :  { %v1614_v2 = vmul.f32 %v2859_v41, %v3558_v12 }
0x16a8   :  { %v1617_v61 = vpop.permute.xlu0 %1616 }
0x16a9   :  { %v1619_v62 = vmul.f32 %v2859_v41, %v1617_v61 }
0x16ab   :  { %1621 = vrot.lane.b32.xlu1 %v1619_v62, %s3141_s26 }
0x171d   :  { %v1622_v3 = vpop.permute.xlu1 %1621 }
0x171e   :  { %v3630_v6 = vadd.f32 %v1622_v3, %v1614_v2 }
0x1720   :  { %2860 = vtanh.f32 %v3630_v6 }
0x172a   :  { %v2861_v8 = vpop.eup %2860 }
0x172b   :  { %1627 = vrot.lane.b32.xlu0 %v2861_v8, %s3141_s26 }
0x179d   :  { %v1628_v9 = vpop.permute.xlu0 %1627 }
0x179e   :  { %v1630_v11 = vmul.f32 %v2859_v41, %v1628_v9 }
0x17a0   :  { %v1719_v0 = vmul.f32 %v1630_v11, %v3463_v10 }
0x17a2   :  { %1721 = vrot.lane.b32.xlu1 %v1719_v0, %s3155_s1 }
0x1814   :  { %v1722_v14 = vpop.permute.xlu1 %1721 }
0x1815   :  { %v1724_v15 = vsel %vm167_vm0, %v1722_v14, 0.0 }
0x1816   :  { %1725 = vadd.xlane.f32.xlu0 %v1724_v15 }
0x18a3   :  { %v1726_v16 = vpop.xlane.xlu0 %1725 }
0x18a4   :  { %v1727_v12 = vadd.f32 %v1726_v16, %v3353_v5 }
0x18a6   :  { %v1728_v17 = vsel %vm152_vm1, %v1727_v12, -1000000.0 }
0x18a7   :  { %v1729_v18 = vsel %vm173_vm2, %v1728_v17, -inf }
0x18a8   :  { %1730 = vmax.xlane.f32.xlu1 %v1729_v18 }
0x1935   :  { %v1731_v19 = vpop.xlane.xlu1 %1730 }
0x1936   :  { %v1732_v7 = vsub.f32 %v1728_v17, %v1731_v19 }
0x1938   :  { %v1733_v22 = vmul.f32 1.442695, %v1732_v7 }
0x193a   :  { %2862 = vpow2.f32 %v1733_v22 }
0x1944   :  { %v2863_v10 = vpop.eup %2862 }
0x1945   :  { %v1735_v27 = vsel %vm173_vm2, %v2863_v10, 0.0 }
0x1946   :  { %1736 = vadd.xlane.f32.xlu0 %v1735_v27 }
0x19d3   :  { %v1737_v28 = vpop.xlane.xlu0 %1736 }
0x19d4   :  { %2864 = vrcp.f32 %v1737_v28 }
0x19de   :  { %v2865_v30 = vpop.eup %2864 }
0x19df   :  { %v1739_v32 = vmul.f32 %v2865_v30, %v2863_v10 }
0x19e1   :  { %v1750_v5 = vrot.slane %v1739_v32, %v3363_v23  ;;  %v1743_v4 = vrot.slane %v1739_v32, %v3365_v24 }
0x19e3   :  { %1752 = vbcast.lane.b32.xlu1 %v1750_v5, 256  ;;  %1745 = vbcast.lane.b32.xlu0 %v1743_v4, 256 }
0x19e7   :  { %1643 = vrot.lane.b32.xlu1 %v1630_v11, %s3155_s1 }
0x1a55   :  { %v1753_v35 = vpop.permute.xlu1 %1752  ;;  %v1746_v37 = vpop.permute.xlu0 %1745 }
0x1a56   :  { %v1755_v43 = vmul.f32 %v1753_v35, %v3392_v39  ;;  %v1754_v45 = vmul.f32 %v1746_v37, %v3394_v40 }
0x1a58   :  { %v1763_v46 = vsel %vm201_vm3, %v1755_v43, 0.0  ;;  %v1756_v47 = vsel %vm201_vm3, %v1754_v45, 0.0 }
0x1a59   :  { %v1764_v58 = vrot.slane %v1763_v46, 4  ;;  %v1757_v54 = vrot.slane %v1756_v47, 4  ;;  %v1644_v1 = vpop.permute.xlu1 %1643 }
0x1a5a   :  { %2603 = vmatmul.mubr.msk.f32.vlgmr.msra.gmra.mrb[14].mxu0 %vm201_vm3, %v1644_v1  ;;  %2636 = vmatmul.mubr.msk.f32.vlgmr.msra.gmra.mrb[16].mxu1 %vm201_vm3, %v1644_v1 }
0x1a5b   :  { %v1765_v23 = vadd.f32 %v1764_v58, %v1763_v46  ;;  %v1758_v24 = vadd.f32 %v1757_v54, %v1756_v47  ;;  %2758 = vmatpush3.bf16.msra.mxu0 %v3369_v26  ;;  %2624 = vmatprep.mubr.msk.f32.mxu0 %vm3153_vm4, %v3154_v38 }
0x1a5c   :  { %2759 = vmatprep.subr.bf16.mxu0 %v3152_v25  ;;  %2776 = vmatpush3.bf16.msra.mxu1 %v3479_v33 }
0x1a5d   :  { %v1766_v39 = vrot.slane %v1765_v23, 2  ;;  %v1759_v40 = vrot.slane %v1758_v24, 2  ;;  %2777 = vmatprep.subr.bf16.mxu1 %v3152_v25  ;;  %2657 = vmatprep.mubr.msk.f32.mxu1 %vm3153_vm4, %v3154_v38 }
0x1a5f   :  { %v1767_v51 = vadd.f32 %v1766_v39, %v1765_v23  ;;  %v1760_v52 = vadd.f32 %v1759_v40, %v1758_v24  ;;  %2761 = vmatpush3.bf16.msra.mxu0 %v3379_v36 }
0x1a60   :  { %2768 = vmatprep.subr.bf16.mxu0 %v3152_v25  ;;  %2779 = vmatpush3.bf16.msra.mxu1 %v3489_v44 }
0x1a61   :  { %v1768_v26 = vrot.slane %v1767_v51, 1  ;;  %v1761_v53 = vrot.slane %v1760_v52, 1 }
0x1a63   :  { %v1769_v20 = vadd.f32 %v1768_v26, %v1767_v51  ;;  %v1762_v49 = vadd.f32 %v1761_v53, %v1760_v52 }
0x1a65   :  { %v1850_v33 = vsel %vm299_vm5, %v1769_v20, %v1762_v49 }
0x1a66   :  { %2625 = vmatmul.mubr.msk.f32.vlgmr.msra.gmra.mrb[16].mxu0 %vm201_vm3, %v1850_v33 }
0x1a67   :  { %2770 = vmatpush3.bf16.msra.mxu0 %v3415_v34  ;;  %2646 = vmatprep.mubr.msk.f32.mxu0 %vm3153_vm4, %v3154_v38 }
0x1a68   :  { %2771 = vmatprep.subr.bf16.mxu0 %v3152_v25 }
0x1a6b   :  { %2773 = vmatpush3.bf16.msra.mxu0 %v3422_v42 }
0x1b2d   :  { %v1713_v36 = vpop.f32.mrb[14].mxu0  ;;  %v2032_v21 = vpop.f32.mrb[16].mxu1 }
0x1b2e   :  { %v1714_v44 = vadd.f32 %v3525_v13, %v1713_v36  ;;  %v2604_v31 = vpop.f32.mrb[15].mxu0  ;;  %v2637_v56 = vpop.f32.mrb[17].mxu1 }
0x1b30   :  { %1718 = vst [vmem:[#allocation16 + $0x4] sm:$0x3] %v1714_v44 }
0x1b39   :  { %v1919_v57 = vpop.f32.mrb[16].mxu0 }
0x1b3a   :  { %v1920_v29 = vadd.f32 %v1919_v57, %v3625_v55  ;;  %v2626_v59 = vpop.f32.mrb[17].mxu0 }
0x1b3c   :  { %v1930_v34 = vadd.f32 %v3404_v63, %v1920_v29 }
0x1b3e   :  { %v1933_v41 = vadd.f32 %v1932_v60, %v1930_v34 }
0x1b40   :  { %2866 = vtanh.f32 %v1933_v41  ;;  %v2333_v25 = vmul.f32 -1.442695, %v1933_v41 }
0x1b42   :  { %2868 = vpow2.f32 %v2333_v25 }
0x1b4a   :  { %v2867_v38 = vpop.eup %2866 }
0x1b4b   :  { %1943 = vrot.lane.b32.xlu0 %v2867_v38, %s3141_s26 }
0x1b4c   :  { %v2869_v42 = vpop.eup %2868 }
0x1b4d   :  { %v1937_v61 = vadd.f32 1.0, %v2869_v42 }
0x1b4f   :  { %2870 = vrcp.f32 %v1937_v61 }
0x1b59   :  { %v2871_v62 = vpop.eup %2870 }
0x1b5a   :  { %v1941_v55 = vmul.f32 %v2871_v62, %v3605_v48 }
0x1bbd   :  { %v1944_v2 = vpop.permute.xlu0 %1943 }
0x1bbe   :  { %v1946_v3 = vmul.f32 %v2871_v62, %v1944_v2 }
0x1bc0   :  { %1948 = vrot.lane.b32.xlu1 %v1946_v3, %s3141_s26 }
0x1c32   :  { %v1949_v8 = vpop.permute.xlu1 %1948 }
0x1c33   :  { %v1951_v9 = vadd.f32 %v1949_v8, %v1941_v55 }
0x1c35   :  { %2872 = vtanh.f32 %v1951_v9 }
0x1c3f   :  { %v2873_v63 = vpop.eup %2872 }
0x1c40   :  { %1954 = vrot.lane.b32.xlu0 %v2873_v63, %s3141_s26 }
0x1cb2   :  { %v1955_v11 = vpop.permute.xlu0 %1954 }
0x1cb3   :  { %v1957_v0 = vmul.f32 %v2871_v62, %v1955_v11 }
0x1cb5   :  { %2037 = vrot.lane.b32.xlu1 %v1957_v0, %s3155_s1 }
0x1d27   :  { %v2038_v14 = vpop.permute.xlu1 %2037 }
0x1d28   :  { %2232 = vst.msk [vmem:[#allocation17] sm:$0x3] %vm167_vm0, %v2038_v14  ;;  %2647 = vmatmul.mubr.msk.f32.vlgmr.msra.gmra.mrb[18].mxu0 %vm201_vm3, %v2038_v14 }
0x1dfb   :  { %v2107_v15 = vpop.f32.mrb[18].mxu0 }
0x1dfc   :  { %v2108_v16 = vadd.f32 %v2107_v15, %v2032_v21  ;;  %v2648_v12 = vpop.f32.mrb[19].mxu0 }
0x1dfe   :  { %v2118_v48 = vadd.f32 %v3450_v50, %v2108_v16 }
0x1e00   :  { %2874 = vtanh.f32 %v2118_v48  ;;  %v2337_v18 = vmul.f32 -1.442695, %v2118_v48 }
0x1e02   :  { %2876 = vpow2.f32 %v2337_v18 }
0x1e0a   :  { %v2875_v17 = vpop.eup %2874 }
0x1e0b   :  { %2128 = vrot.lane.b32.xlu0 %v2875_v17, %s3141_s26 }
0x1e0c   :  { %v2877_v19 = vpop.eup %2876 }
0x1e0d   :  { %v2122_v7 = vadd.f32 1.0, %v2877_v19 }
0x1e0f   :  { %2878 = vrcp.f32 %v2122_v7 }
0x1e19   :  { %v2879_v22 = vpop.eup %2878 }
0x1e1a   :  { %v2126_v28 = vmul.f32 %v2879_v22, %v3630_v6 }
0x1e7d   :  { %v2129_v10 = vpop.permute.xlu0 %2128 }
0x1e7e   :  { %v2131_v27 = vmul.f32 %v2879_v22, %v2129_v10 }
0x1e80   :  { %2133 = vrot.lane.b32.xlu1 %v2131_v27, %s3141_s26 }
0x1ef2   :  { %v2134_v30 = vpop.permute.xlu1 %2133 }
0x1ef3   :  { %v2136_v32 = vadd.f32 %v2134_v30, %v2126_v28 }
0x1ef5   :  { %2880 = vtanh.f32 %v2136_v32 }
0x1eff   :  { %v2881_v50 = vpop.eup %2880 }
0x1f00   :  { %2139 = vrot.lane.b32.xlu0 %v2881_v50, %s3141_s26 }
0x1f04   :  { %2234 = vrot.lane.b32.xlu0 %v1951_v9, %s3156_s10 }
0x1f72   :  { %v2140_v5 = vpop.permute.xlu0 %2139 }
0x1f73   :  { %v2142_v4 = vmul.f32 %v2879_v22, %v2140_v5 }
0x1f75   :  { %2155 = vrot.lane.b32.xlu1 %v2142_v4, %s3155_s1 }
0x1f76   :  { %v2235_v35 = vpop.permute.xlu0 %2234 }
0x1f77   :  { %2237 = vst.msk [vmem:[#allocation19] sm:$0x3] %vm167_vm0, %v2235_v35 }
0x1f79   :  { %2242 = vrot.lane.b32.xlu1 %v2136_v32, %s3156_s10 }
0x1fe7   :  { %v2156_v37 = vpop.permute.xlu1 %2155 }
0x1fe8   :  { %2240 = vst.msk [vmem:[#allocation17 + $0x2] sm:$0x3] %vm167_vm0, %v2156_v37  ;;  %2658 = vmatmul.mubr.msk.f32.vlgmr.msra.gmra.mrb[18].mxu1 %vm201_vm3, %v2156_v37 }
0x1feb   :  { %v2243_v6 = vpop.permute.xlu1 %2242 }
0x1fec   :  { %2246 = vst.msk [vmem:[#allocation19 + $0x2] sm:$0x3] %vm167_vm0, %v2243_v6 }
0x1fed   :  { %3069 = shalt.err (!%p3066_p12)
}
0x1fee   :  { %s3070_s2 = scalar_lea.hbm %s3747_s12, 64 }
0x1fef   :  { %p3071_p13 = scmp.ne.s32.totalorder %s3747_s12, %s3070_s2  ;;  %p3074_p0 = scmp.lt.u32.totalorder %s3070_s2, %s3747_s12 }
0x1ff1   :  { %p3076_p1 = pnand %p3074_p0, %p3071_p13 }
0x1ff3   :  { %3079 = shalt.err (!%p3076_p1)
}
0x1ff4   :  { %2270 = dma.vmem_to_hbm [thread:$0]  %s2265_s21, 64, %s3747_s12, [#allocation18], %s3141_s26, %s3141_s26, %s3142_s15  }
0x1ff5   :  { %s3158_s8 = smov [#allocation19]  }
0x1ff6   :  { %s2276_s19 = sshll.u32 %s3158_s8, 4  ;;  %s2277_s19 = int_to_ptr.vmem [resolvable:$true] %s2276_s19 }
0x1ff7   :  { %s3080_s1 = scalar_lea.vmem %s2277_s19, 64  ;;  %p3085_p3 = scmp.lt.s32.totalorder %s2277_s19, %s2277_s19 }
0x1ff8   :  { %p3081_p2 = scmp.ne.s32.totalorder %s2277_s19, %s3080_s1  ;;  %p3086_p4 = scmp.lt.s32.totalorder %s3080_s1, %s3080_s1 }
0x1ffa   :  { %p3087_p5 = por %p3086_p4, %p3085_p3 }
0x1ffc   :  { %p3088_p6 = pnand %p3087_p5, %p3081_p2 }
0x1ffe   :  { %3091 = shalt.err (!%p3088_p6)
}
0x1fff   :  { %s3092_s25 = scalar_lea.hbm %s3748_s13, 64 }
0x2000   :  { %p3093_p7 = scmp.ne.s32.totalorder %s3748_s13, %s3092_s25  ;;  %p3096_p8 = scmp.lt.u32.totalorder %s3092_s25, %s3748_s13 }
0x2002   :  { %p3098_p9 = pnand %p3096_p8, %p3093_p7 }
0x2004   :  { %3101 = shalt.err (!%p3098_p9)
}
0x2005   :  { %2282 = dma.vmem_to_hbm [thread:$0]  %s2277_s19, 64, %s3748_s13, [#allocation18], %s3141_s26, %s3141_s26, %s3142_s15  }
0x2006   :  { %s3159_s9 = smov [#allocation16]  }
0x2007   :  { %s2252_s29 = sshll.u32 %s3159_s9, 4  ;;  %s2253_s29 = int_to_ptr.vmem [resolvable:$true] %s2252_s29 }
0x2008   :  { %s3102_s10 = scalar_lea.vmem %s2253_s29, 128  ;;  %p3107_p11 = scmp.lt.s32.totalorder %s2253_s29, %s2253_s29 }
0x2009   :  { %p3103_p10 = scmp.ne.s32.totalorder %s2253_s29, %s3102_s10  ;;  %p3108_p12 = scmp.lt.s32.totalorder %s3102_s10, %s3102_s10 }
0x200b   :  { %p3109_p13 = por %p3108_p12, %p3107_p11 }
0x200d   :  { %p3110_p0 = pnand %p3109_p13, %p3103_p10 }
0x20bb   :  { %v2225_v43 = vpop.f32.mrb[18].mxu1 }
0x20bc   :  { %v2226_v45 = vadd.f32 %v3525_v13, %v2225_v43  ;;  %v2659_v46 = vpop.f32.mrb[19].mxu1 }
0x20be   :  { %2230 = vst [vmem:[#allocation16 + $0x6] sm:$0x3] %v2226_v45 }
0x20bf   :  { %3113 = shalt.err (!%p3110_p0)
}
0x20c0   :  { %s3114_s30 = scalar_lea.hbm %s3746_s11, 128 }
0x20c1   :  { %p3115_p1 = scmp.ne.s32.totalorder %s3746_s11, %s3114_s30  ;;  %p3118_p2 = scmp.lt.u32.totalorder %s3114_s30, %s3746_s11 }
0x20c3   :  { %p3120_p3 = pnand %p3118_p2, %p3115_p1 }
0x20c5   :  { %3123 = shalt.err (!%p3120_p3)
}
0x20c6   :  { %2258 = dma.vmem_to_hbm [thread:$0]  %s2253_s29, 128, %s3746_s11, [#allocation4], %s3141_s26, %s3141_s26, %s3142_s15  }
0x20c7   :  { %3134 = dma.done.wait [#allocation4], 128  }
0x20c8   :  { %3135 = vsyncadd [#allocation4], 4294967168 }
0x20c9   :  { %3136 = dma.done.wait [#allocation18], 128  }
0x20ca   :  { %3137 = vsyncadd [#allocation18], 4294967168 }
0x20cb   :  { %2292 = vsyncpa [#allocation3], 1 }
0x20cc   :  { %2293 = vsyncpa [#allocation6], 1 }
0x20cd   :  { %2294 = vsyncpa [#allocation9], 1 }
0x20ce   :  { %2295 = vsyncpa [#allocation12], 1 }
0x20cf   :  { %2296 = vsyncpa [#allocation15], 1 }
0x20d0   :  { %2297 = vsyncpa [#allocation4], 1 }
0x20d1   :  { %2298 = vsyncpa [#allocation18], 1 }

</bundles_post_ra>
